<compile_context>
chip_gen: v5e
topology: v5e:2x2
jax: 0.10.0
libtpu: 0.0.40
codegen_flags: <defaults>
</compile_context>

<pallas_src>
import jax
import jax.numpy as jnp
from jax import lax
from jax.experimental import pallas as pl
from jax.experimental.pallas import tpu as pltpu


def _round_up(x, m):
    return (x + m - 1) // m * m


# ----------------------------------------------------------------------------- #
# Fused Pallas kernel
# ----------------------------------------------------------------------------- #
def _make_disc_kernel(T, BP, HP, num_layers):
    """Fused Discriminator kernel (single launch, grid=()).

    Positional refs:
      x_ref                       : (T*BP, DP)  bf16, time-major, zero-padded
      per layer l (4 refs)        : wih (D_l, 3*HP) bf16, whh (HP, 3*HP) bf16,
                                    bih (1, 3*HP) f32,    bhh (1, 3*HP) f32
      fcw_ref                     : (HP, 128) f32 (only column 0 is real)
      fcb_ref                     : (1, 128)  f32
      o_ref                       : (BP, 128) f32 output (real result in [:B, :1])
      seq_ref (scratch, if L > 1) : (T*BP, HP) f32 layer-to-layer hidden sequence
    Gate column order is PyTorch's [r, z, n]; each gate block is HP lanes wide.
    """

    def kernel(*refs):
        x_ref = refs[0]
        layer_refs = [refs[1 + 4 * l: 1 + 4 * (l + 1)] for l in range(num_layers)]
        fcw_ref = refs[1 + 4 * num_layers]
        fcb_ref = refs[2 + 4 * num_layers]
        o_ref = refs[3 + 4 * num_layers]
        seq_ref = refs[4 + 4 * num_layers] if num_layers > 1 else None

        h = jnp.zeros((BP, HP), jnp.float32)
        for l in range(num_layers):
            wih_ref, whh_ref, bih_ref, bhh_ref = layer_refs[l]

            # Layer input (bf16 matmul operand). The bf16 cast of the previous
            # layer's f32 sequence happens once here, off the serial path.
            inp = x_ref[...] if l == 0 else seq_ref[...].astype(jnp.bfloat16)

            # Hoisted input projection for ALL timesteps: one (T*BP, D)x(D, 3*HP)
            # bf16 MXU matmul with f32 accumulation, bias folded in once.
            gx_all = (
                jnp.dot(inp, wih_ref[...], preferred_element_type=jnp.float32)
                + bih_ref[...]
            )

            whh = whh_ref[...]            # bf16, reused every step
            bhh = bhh_ref[...]            # f32
            h = jnp.zeros((BP, HP), jnp.float32)

            # Serial recurrence, fully unrolled (T is small). Only the
            # (BP,HP)x(HP,3HP) hidden matmul + f32 gate math per step; all slices
            # below are (8,128)-tile aligned -> no lane rotations / masked stores.
            # TODO(synk): keep whh staged in the MXU across the loop via
            # pltpu.matmul_push_rhs / matmul_acc_lhs / matmul_pop, and switch to a
            # lax.fori_loop(unroll=4..8) with gx_all in a scratch ref once T > ~16.
            for t in range(T):
                gh = (
                    jnp.dot(h.astype(jnp.bfloat16), whh,
                            preferred_element_type=jnp.float32)
                    + bhh
                )
                gx = gx_all[t * BP:(t + 1) * BP, :]
                r = jax.nn.sigmoid(gx[:, 0:HP] + gh[:, 0:HP])
                z = jax.nn.sigmoid(gx[:, HP:2 * HP] + gh[:, HP:2 * HP])
                n = jnp.tanh(gx[:, 2 * HP:3 * HP] + r * gh[:, 2 * HP:3 * HP])
                h = (1.0 - z) * n + z * h
                if l < num_layers - 1:
                    # f32 whole-tile (8,128) store: unmasked vst.
                    seq_ref[t * BP:(t + 1) * BP, :] = h

        # fc + sigmoid on the final hidden state. fc_w padded to 128 output lanes
        # -> single lane-dense store.
        logit = (
            jnp.dot(h, fcw_ref[...], preferred_element_type=jnp.float32)
            + fcb_ref[...]
        )
        o_ref[...] = jax.nn.sigmoid(logit)

    return kernel


# ----------------------------------------------------------------------------- #
# Wrapper (padding / layout plumbing + pallas_call)
# ----------------------------------------------------------------------------- #
def _pad_gate_weight(w, rows_to, H, HP):
    """(rows, 3H) with [r|z|n] columns -> (rows_to, 3*HP), zero padded per gate block."""
    rows = w.shape[0]
    w3 = w.reshape(rows, 3, H)
    w3 = jnp.pad(w3, ((0, rows_to - rows), (0, 0), (0, HP - H)))
    return w3.reshape(rows_to, 3 * HP)


def discriminator_pallas(x, params):
    """x: (B, T, input_size) batch-first, like the PyTorch module. Returns (B, 1)."""
    B, T, Din = x.shape
    H = params["gru"][0]["whh"].shape[0]
    num_layers = len(params["gru"])

    HP = _round_up(H, 128)    # lane-aligned gate-block width
    BP = _round_up(B, 8)      # f32 sublane-aligned batch
    DP = _round_up(Din, 128)  # lane-aligned input features
    OP = 128                  # lane-dense fc output width

    # Time-major + zero-pad + bf16 cast in one fused XLA op (row index = t*BP + b).
    xt = jnp.transpose(x, (1, 0, 2)).astype(jnp.float32)
    xt = jnp.pad(xt, ((0, 0), (0, BP - B), (0, DP - Din)))
    x2d = xt.reshape(T * BP, DP).astype(jnp.bfloat16)

    flat_args = [x2d]
    for l, layer in enumerate(params["gru"]):
        rows_to = DP if l == 0 else HP
        flat_args += [
            _pad_gate_weight(layer["wih"], rows_to, H, HP).astype(jnp.bfloat16),
            _pad_gate_weight(layer["whh"], HP, H, HP).astype(jnp.bfloat16),
            _pad_gate_weight(layer["bih"], 1, H, HP).astype(jnp.float32),
            _pad_gate_weight(layer["bhh"], 1, H, HP).astype(jnp.float32),
        ]
    fc_w = jnp.pad(params["fc_w"], ((0, HP - H), (0, OP - 1))).astype(jnp.float32)
    fc_b = jnp.pad(params["fc_b"], ((0, 0), (0, OP - 1))).astype(jnp.float32)
    flat_args += [fc_w, fc_b]

    vmem = pl.BlockSpec(memory_space=pltpu.MemorySpace.VMEM)
    kernel = _make_disc_kernel(T, BP, HP, num_layers)
    scratch = [pltpu.VMEM((T * BP, HP), jnp.float32)] if num_layers > 1 else []

    out = pl.pallas_call(
        kernel,
        out_shape=jax.ShapeDtypeStruct((BP, OP), jnp.float32),
        in_specs=[vmem] * len(flat_args),
        out_specs=vmem,
        scratch_shapes=scratch,
        # Explicit VMEM budget (raises v5e's 16 MiB default, safe on v7x's 64 MiB).
        # At scaled-up T*B, chunk gx_all over time (emit_pipeline) and add a
        # parallel batch grid axis for v7x's second TensorCore.
        compiler_params=pltpu.CompilerParams(vmem_limit_bytes=32 * 1024 * 1024),
    )(*flat_args)
    return out[:B, :1]


discriminator_forward = jax.jit(discriminator_pallas)


# ----------------------------------------------------------------------------- #
# Deterministic parameter init (PyTorch-style uniform(-1/sqrt(H), 1/sqrt(H)))
# Fused gate layout: wih (Din, 3H), whh (H, 3H), biases (1, 3H), columns [r|z|n].
# ----------------------------------------------------------------------------- #
def init_params(key, input_size, hidden_size, num_layers):
    bound = 1.0 / jnp.sqrt(jnp.float32(hidden_size))
    layers = []
    for layer_idx in range(num_layers):
        din = input_size if layer_idx == 0 else hidden_size
        key, k1, k2, k3, k4 = jax.random.split(key, 5)
        layers.append(
            dict(
                wih=jax.random.uniform(k1, (din, 3 * hidden_size), jnp.float32, -bound, bound),
                whh=jax.random.uniform(k2, (hidden_size, 3 * hidden_size), jnp.float32, -bound, bound),
                bih=jax.random.uniform(k3, (1, 3 * hidden_size), jnp.float32, -bound, bound),
                bhh=jax.random.uniform(k4, (1, 3 * hidden_size), jnp.float32, -bound, bound),
            )
        )
    key, k5, k6 = jax.random.split(key, 3)
    fc_w = jax.random.uniform(k5, (hidden_size, 1), jnp.float32, -bound, bound)
    fc_b = jax.random.uniform(k6, (1, 1), jnp.float32, -bound, bound)
    return dict(gru=layers, fc_w=fc_w, fc_b=fc_b)


# ----------------------------------------------------------------------------- #
# Pure-JAX reference (lax.scan) with the same precision policy (bf16 matmul
# operands, f32 accumulation, f32 gate math) for tight correctness checking.
# ----------------------------------------------------------------------------- #
def discriminator_ref(x, params):
    H = params["gru"][0]["whh"].shape[0]
    seq = jnp.transpose(x, (1, 0, 2)).astype(jnp.float32)   # (T, B, Din)
    B = seq.shape[1]
    for layer in params["gru"]:
        wih = layer["wih"].astype(jnp.bfloat16)
        whh = layer["whh"].astype(jnp.bfloat16)
        bih, bhh = layer["bih"], layer["bhh"]

        def step(h, x_t, wih=wih, whh=whh, bih=bih, bhh=bhh):
            gx = jnp.dot(x_t.astype(jnp.bfloat16), wih,
                         preferred_element_type=jnp.float32) + bih
            gh = jnp.dot(h.astype(jnp.bfloat16), whh,
                         preferred_element_type=jnp.float32) + bhh
            r = jax.nn.sigmoid(gx[:, :H] + gh[:, :H])
            z = jax.nn.sigmoid(gx[:, H:2 * H] + gh[:, H:2 * H])
            n = jnp.tanh(gx[:, 2 * H:] + r * gh[:, 2 * H:])
            h_new = (1.0 - z) * n + z * h
            return h_new, h_new

        h0 = jnp.zeros((B, H), jnp.float32)
        _, seq = lax.scan(step, h0, seq)
    h_last = seq[-1]
    logit = jnp.dot(h_last, params["fc_w"], preferred_element_type=jnp.float32) + params["fc_b"]
    return jax.nn.sigmoid(logit)


# ----------------------------------------------------------------------------- #
if __name__ == "__main__":
    B, T, INPUT_SIZE, HIDDEN_SIZE, NUM_LAYERS = 2, 8, 4, 32, 2

    key = jax.random.PRNGKey(0)
    key, kx, kp = jax.random.split(key, 3)
    x = jax.random.normal(kx, (B, T, INPUT_SIZE), jnp.float32)
    params = init_params(kp, INPUT_SIZE, HIDDEN_SIZE, NUM_LAYERS)

    y = discriminator_forward(x, params)
    y = jax.block_until_ready(y)

    y_ref = discriminator_ref(x, params)
    assert y.shape == (B, 1)
    assert jnp.allclose(y, y_ref, rtol=1e-4, atol=1e-4), (y, y_ref)

    print("KERNEL_OK")
</pallas_src>

<mosaic_0001>
module attributes {stable_mosaic.version = 11 : i64} {
  func.func @kernel(%arg0: memref<64x128xbf16, #tpu.memory_space<vmem>>, %arg1: memref<128x384xbf16, #tpu.memory_space<vmem>>, %arg2: memref<128x384xbf16, #tpu.memory_space<vmem>>, %arg3: memref<1x384xf32, #tpu.memory_space<vmem>>, %arg4: memref<1x384xf32, #tpu.memory_space<vmem>>, %arg5: memref<128x384xbf16, #tpu.memory_space<vmem>>, %arg6: memref<128x384xbf16, #tpu.memory_space<vmem>>, %arg7: memref<1x384xf32, #tpu.memory_space<vmem>>, %arg8: memref<1x384xf32, #tpu.memory_space<vmem>>, %arg9: memref<128x128xf32, #tpu.memory_space<vmem>>, %arg10: memref<1x128xf32, #tpu.memory_space<vmem>>, %arg11: memref<8x128xf32, #tpu.memory_space<vmem>>, %arg12: memref<64x128xf32, #tpu.memory_space<vmem>>) attributes {dimension_semantics = [], scalar_prefetch = 0 : i64, scratch_operands = 1 : i64, tpu.core_type = #tpu.core_type<tc>} {
    %c0 = arith.constant 0 : index
    %c0_0 = arith.constant 0 : index
    %0 = vector.load %arg0[%c0, %c0_0] : memref<64x128xbf16, #tpu.memory_space<vmem>>, vector<64x128xbf16>
    %c0_1 = arith.constant 0 : index
    %c0_2 = arith.constant 0 : index
    %1 = vector.load %arg1[%c0_1, %c0_2] : memref<128x384xbf16, #tpu.memory_space<vmem>>, vector<128x384xbf16>
    %cst = arith.constant dense<0.000000e+00> : vector<64x384xf32>
    %2 = tpu.matmul %0, %1, %cst {dimension_numbers = #tpu.dot_dimension_numbers<[1], [0], [0], [1], [0, 0, 1, 1], [], []>} : vector<64x128xbf16>, vector<128x384xbf16>, vector<64x384xf32> -> vector<64x384xf32>
    %c0_3 = arith.constant 0 : index
    %c0_4 = arith.constant 0 : index
    %3 = vector.load %arg3[%c0_3, %c0_4] : memref<1x384xf32, #tpu.memory_space<vmem>>, vector<1x384xf32>
    %4 = vector.broadcast %3 : vector<1x384xf32> to vector<64x384xf32>
    %5 = arith.addf %2, %4 : vector<64x384xf32>
    %c0_5 = arith.constant 0 : index
    %c0_6 = arith.constant 0 : index
    %6 = vector.load %arg2[%c0_5, %c0_6] : memref<128x384xbf16, #tpu.memory_space<vmem>>, vector<128x384xbf16>
    %c0_7 = arith.constant 0 : index
    %c0_8 = arith.constant 0 : index
    %7 = vector.load %arg4[%c0_7, %c0_8] : memref<1x384xf32, #tpu.memory_space<vmem>>, vector<1x384xf32>
    %cst_9 = arith.constant 0.000000e+00 : f32
    %8 = vector.broadcast %cst_9 : f32 to vector<8x128xf32>
    %9 = arith.truncf %8 : vector<8x128xf32> to vector<8x128xbf16>
    %cst_10 = arith.constant dense<0.000000e+00> : vector<8x384xf32>
    %10 = tpu.matmul %9, %6, %cst_10 {dimension_numbers = #tpu.dot_dimension_numbers<[1], [0], [0], [1], [0, 0, 1, 1], [], []>} : vector<8x128xbf16>, vector<128x384xbf16>, vector<8x384xf32> -> vector<8x384xf32>
    %11 = vector.broadcast %7 : vector<1x384xf32> to vector<8x384xf32>
    %12 = arith.addf %10, %11 : vector<8x384xf32>
    %13 = vector.extract_strided_slice %5 {offsets = [0, 0], sizes = [8, 384], strides = [1, 1]} : vector<64x384xf32> to vector<8x384xf32>
    %14 = vector.extract_strided_slice %13 {offsets = [0, 0], sizes = [8, 128], strides = [1, 1]} : vector<8x384xf32> to vector<8x128xf32>
    %15 = vector.extract_strided_slice %12 {offsets = [0, 0], sizes = [8, 128], strides = [1, 1]} : vector<8x384xf32> to vector<8x128xf32>
    %16 = arith.addf %14, %15 : vector<8x128xf32>
    %17 = arith.negf %16 : vector<8x128xf32>
    %18 = math.exp %17 : vector<8x128xf32>
    %cst_11 = arith.constant 1.000000e+00 : f32
    %19 = vector.broadcast %cst_11 : f32 to vector<8x128xf32>
    %20 = arith.addf %19, %18 : vector<8x128xf32>
    %21 = arith.divf %19, %20 : vector<8x128xf32>
    %22 = vector.extract_strided_slice %13 {offsets = [0, 128], sizes = [8, 128], strides = [1, 1]} : vector<8x384xf32> to vector<8x128xf32>
    %23 = vector.extract_strided_slice %12 {offsets = [0, 128], sizes = [8, 128], strides = [1, 1]} : vector<8x384xf32> to vector<8x128xf32>
    %24 = arith.addf %22, %23 : vector<8x128xf32>
    %25 = arith.negf %24 : vector<8x128xf32>
    %26 = math.exp %25 : vector<8x128xf32>
    %cst_12 = arith.constant 1.000000e+00 : f32
    %27 = vector.broadcast %cst_12 : f32 to vector<8x128xf32>
    %28 = arith.addf %27, %26 : vector<8x128xf32>
    %29 = arith.divf %27, %28 : vector<8x128xf32>
    %30 = vector.extract_strided_slice %13 {offsets = [0, 256], sizes = [8, 128], strides = [1, 1]} : vector<8x384xf32> to vector<8x128xf32>
    %31 = vector.extract_strided_slice %12 {offsets = [0, 256], sizes = [8, 128], strides = [1, 1]} : vector<8x384xf32> to vector<8x128xf32>
    %32 = arith.mulf %21, %31 : vector<8x128xf32>
    %33 = arith.addf %30, %32 : vector<8x128xf32>
    %34 = math.tanh %33 : vector<8x128xf32>
    %cst_13 = arith.constant 1.000000e+00 : f32
    %35 = vector.broadcast %cst_13 : f32 to vector<8x128xf32>
    %36 = arith.subf %35, %29 : vector<8x128xf32>
    %37 = arith.mulf %36, %34 : vector<8x128xf32>
    %38 = arith.mulf %29, %8 : vector<8x128xf32>
    %39 = arith.addf %37, %38 : vector<8x128xf32>
    %c0_14 = arith.constant 0 : index
    %c0_15 = arith.constant 0 : index
    %40 = vector.load %arg12[%c0_14, %c0_15] : memref<64x128xf32, #tpu.memory_space<vmem>>, vector<8x128xf32>
    tpu.vector_store %arg12[%c0_14, %c0_15], %39 {strides = array<i32>} : memref<64x128xf32, #tpu.memory_space<vmem>>, vector<8x128xf32>,
    %41 = arith.truncf %39 : vector<8x128xf32> to vector<8x128xbf16>
    %cst_16 = arith.constant dense<0.000000e+00> : vector<8x384xf32>
    %42 = tpu.matmul %41, %6, %cst_16 {dimension_numbers = #tpu.dot_dimension_numbers<[1], [0], [0], [1], [0, 0, 1, 1], [], []>} : vector<8x128xbf16>, vector<128x384xbf16>, vector<8x384xf32> -> vector<8x384xf32>
    %43 = vector.broadcast %7 : vector<1x384xf32> to vector<8x384xf32>
    %44 = arith.addf %42, %43 : vector<8x384xf32>
    %45 = vector.extract_strided_slice %5 {offsets = [8, 0], sizes = [8, 384], strides = [1, 1]} : vector<64x384xf32> to vector<8x384xf32>
    %46 = vector.extract_strided_slice %45 {offsets = [0, 0], sizes = [8, 128], strides = [1, 1]} : vector<8x384xf32> to vector<8x128xf32>
    %47 = vector.extract_strided_slice %44 {offsets = [0, 0], sizes = [8, 128], strides = [1, 1]} : vector<8x384xf32> to vector<8x128xf32>
    %48 = arith.addf %46, %47 : vector<8x128xf32>
    %49 = arith.negf %48 : vector<8x128xf32>
    %50 = math.exp %49 : vector<8x128xf32>
    %cst_17 = arith.constant 1.000000e+00 : f32
    %51 = vector.broadcast %cst_17 : f32 to vector<8x128xf32>
    %52 = arith.addf %51, %50 : vector<8x128xf32>
    %53 = arith.divf %51, %52 : vector<8x128xf32>
    %54 = vector.extract_strided_slice %45 {offsets = [0, 128], sizes = [8, 128], strides = [1, 1]} : vector<8x384xf32> to vector<8x128xf32>
    %55 = vector.extract_strided_slice %44 {offsets = [0, 128], sizes = [8, 128], strides = [1, 1]} : vector<8x384xf32> to vector<8x128xf32>
    %56 = arith.addf %54, %55 : vector<8x128xf32>
    %57 = arith.negf %56 : vector<8x128xf32>
    %58 = math.exp %57 : vector<8x128xf32>
    %cst_18 = arith.constant 1.000000e+00 : f32
    %59 = vector.broadcast %cst_18 : f32 to vector<8x128xf32>
    %60 = arith.addf %59, %58 : vector<8x128xf32>
    %61 = arith.divf %59, %60 : vector<8x128xf32>
    %62 = vector.extract_strided_slice %45 {offsets = [0, 256], sizes = [8, 128], strides = [1, 1]} : vector<8x384xf32> to vector<8x128xf32>
    %63 = vector.extract_strided_slice %44 {offsets = [0, 256], sizes = [8, 128], strides = [1, 1]} : vector<8x384xf32> to vector<8x128xf32>
    %64 = arith.mulf %53, %63 : vector<8x128xf32>
    %65 = arith.addf %62, %64 : vector<8x128xf32>
    %66 = math.tanh %65 : vector<8x128xf32>
    %cst_19 = arith.constant 1.000000e+00 : f32
    %67 = vector.broadcast %cst_19 : f32 to vector<8x128xf32>
    %68 = arith.subf %67, %61 : vector<8x128xf32>
    %69 = arith.mulf %68, %66 : vector<8x128xf32>
    %70 = arith.mulf %61, %39 : vector<8x128xf32>
    %71 = arith.addf %69, %70 : vector<8x128xf32>
    %c8 = arith.constant 8 : index
    %c0_20 = arith.constant 0 : index
    %72 = vector.load %arg12[%c8, %c0_20] : memref<64x128xf32, #tpu.memory_space<vmem>>, vector<8x128xf32>
    tpu.vector_store %arg12[%c8, %c0_20], %71 {strides = array<i32>} : memref<64x128xf32, #tpu.memory_space<vmem>>, vector<8x128xf32>,
    %73 = arith.truncf %71 : vector<8x128xf32> to vector<8x128xbf16>
    %cst_21 = arith.constant dense<0.000000e+00> : vector<8x384xf32>
    %74 = tpu.matmul %73, %6, %cst_21 {dimension_numbers = #tpu.dot_dimension_numbers<[1], [0], [0], [1], [0, 0, 1, 1], [], []>} : vector<8x128xbf16>, vector<128x384xbf16>, vector<8x384xf32> -> vector<8x384xf32>
    %75 = vector.broadcast %7 : vector<1x384xf32> to vector<8x384xf32>
    %76 = arith.addf %74, %75 : vector<8x384xf32>
    %77 = vector.extract_strided_slice %5 {offsets = [16, 0], sizes = [8, 384], strides = [1, 1]} : vector<64x384xf32> to vector<8x384xf32>
    %78 = vector.extract_strided_slice %77 {offsets = [0, 0], sizes = [8, 128], strides = [1, 1]} : vector<8x384xf32> to vector<8x128xf32>
    %79 = vector.extract_strided_slice %76 {offsets = [0, 0], sizes = [8, 128], strides = [1, 1]} : vector<8x384xf32> to vector<8x128xf32>
    %80 = arith.addf %78, %79 : vector<8x128xf32>
    %81 = arith.negf %80 : vector<8x128xf32>
    %82 = math.exp %81 : vector<8x128xf32>
    %cst_22 = arith.constant 1.000000e+00 : f32
    %83 = vector.broadcast %cst_22 : f32 to vector<8x128xf32>
    %84 = arith.addf %83, %82 : vector<8x128xf32>
    %85 = arith.divf %83, %84 : vector<8x128xf32>
    %86 = vector.extract_strided_slice %77 {offsets = [0, 128], sizes = [8, 128], strides = [1, 1]} : vector<8x384xf32> to vector<8x128xf32>
    %87 = vector.extract_strided_slice %76 {offsets = [0, 128], sizes = [8, 128], strides = [1, 1]} : vector<8x384xf32> to vector<8x128xf32>
    %88 = arith.addf %86, %87 : vector<8x128xf32>
    %89 = arith.negf %88 : vector<8x128xf32>
    %90 = math.exp %89 : vector<8x128xf32>
    %cst_23 = arith.constant 1.000000e+00 : f32
    %91 = vector.broadcast %cst_23 : f32 to vector<8x128xf32>
    %92 = arith.addf %91, %90 : vector<8x128xf32>
    %93 = arith.divf %91, %92 : vector<8x128xf32>
    %94 = vector.extract_strided_slice %77 {offsets = [0, 256], sizes = [8, 128], strides = [1, 1]} : vector<8x384xf32> to vector<8x128xf32>
    %95 = vector.extract_strided_slice %76 {offsets = [0, 256], sizes = [8, 128], strides = [1, 1]} : vector<8x384xf32> to vector<8x128xf32>
    %96 = arith.mulf %85, %95 : vector<8x128xf32>
    %97 = arith.addf %94, %96 : vector<8x128xf32>
    %98 = math.tanh %97 : vector<8x128xf32>
    %cst_24 = arith.constant 1.000000e+00 : f32
    %99 = vector.broadcast %cst_24 : f32 to vector<8x128xf32>
    %100 = arith.subf %99, %93 : vector<8x128xf32>
    %101 = arith.mulf %100, %98 : vector<8x128xf32>
    %102 = arith.mulf %93, %71 : vector<8x128xf32>
    %103 = arith.addf %101, %102 : vector<8x128xf32>
    %c16 = arith.constant 16 : index
    %c0_25 = arith.constant 0 : index
    %104 = vector.load %arg12[%c16, %c0_25] : memref<64x128xf32, #tpu.memory_space<vmem>>, vector<8x128xf32>
    tpu.vector_store %arg12[%c16, %c0_25], %103 {strides = array<i32>} : memref<64x128xf32, #tpu.memory_space<vmem>>, vector<8x128xf32>,
    %105 = arith.truncf %103 : vector<8x128xf32> to vector<8x128xbf16>
    %cst_26 = arith.constant dense<0.000000e+00> : vector<8x384xf32>
    %106 = tpu.matmul %105, %6, %cst_26 {dimension_numbers = #tpu.dot_dimension_numbers<[1], [0], [0], [1], [0, 0, 1, 1], [], []>} : vector<8x128xbf16>, vector<128x384xbf16>, vector<8x384xf32> -> vector<8x384xf32>
    %107 = vector.broadcast %7 : vector<1x384xf32> to vector<8x384xf32>
    %108 = arith.addf %106, %107 : vector<8x384xf32>
    %109 = vector.extract_strided_slice %5 {offsets = [24, 0], sizes = [8, 384], strides = [1, 1]} : vector<64x384xf32> to vector<8x384xf32>
    %110 = vector.extract_strided_slice %109 {offsets = [0, 0], sizes = [8, 128], strides = [1, 1]} : vector<8x384xf32> to vector<8x128xf32>
    %111 = vector.extract_strided_slice %108 {offsets = [0, 0], sizes = [8, 128], strides = [1, 1]} : vector<8x384xf32> to vector<8x128xf32>
    %112 = arith.addf %110, %111 : vector<8x128xf32>
    %113 = arith.negf %112 : vector<8x128xf32>
    %114 = math.exp %113 : vector<8x128xf32>
    %cst_27 = arith.constant 1.000000e+00 : f32
    %115 = vector.broadcast %cst_27 : f32 to vector<8x128xf32>
    %116 = arith.addf %115, %114 : vector<8x128xf32>
    %117 = arith.divf %115, %116 : vector<8x128xf32>
    %118 = vector.extract_strided_slice %109 {offsets = [0, 128], sizes = [8, 128], strides = [1, 1]} : vector<8x384xf32> to vector<8x128xf32>
    %119 = vector.extract_strided_slice %108 {offsets = [0, 128], sizes = [8, 128], strides = [1, 1]} : vector<8x384xf32> to vector<8x128xf32>
    %120 = arith.addf %118, %119 : vector<8x128xf32>
    %121 = arith.negf %120 : vector<8x128xf32>
    %122 = math.exp %121 : vector<8x128xf32>
    %cst_28 = arith.constant 1.000000e+00 : f32
    %123 = vector.broadcast %cst_28 : f32 to vector<8x128xf32>
    %124 = arith.addf %123, %122 : vector<8x128xf32>
    %125 = arith.divf %123, %124 : vector<8x128xf32>
    %126 = vector.extract_strided_slice %109 {offsets = [0, 256], sizes = [8, 128], strides = [1, 1]} : vector<8x384xf32> to vector<8x128xf32>
    %127 = vector.extract_strided_slice %108 {offsets = [0, 256], sizes = [8, 128], strides = [1, 1]} : vector<8x384xf32> to vector<8x128xf32>
    %128 = arith.mulf %117, %127 : vector<8x128xf32>
    %129 = arith.addf %126, %128 : vector<8x128xf32>
    %130 = math.tanh %129 : vector<8x128xf32>
    %cst_29 = arith.constant 1.000000e+00 : f32
    %131 = vector.broadcast %cst_29 : f32 to vector<8x128xf32>
    %132 = arith.subf %131, %125 : vector<8x128xf32>
    %133 = arith.mulf %132, %130 : vector<8x128xf32>
    %134 = arith.mulf %125, %103 : vector<8x128xf32>
    %135 = arith.addf %133, %134 : vector<8x128xf32>
    %c24 = arith.constant 24 : index
    %c0_30 = arith.constant 0 : index
    %136 = vector.load %arg12[%c24, %c0_30] : memref<64x128xf32, #tpu.memory_space<vmem>>, vector<8x128xf32>
    tpu.vector_store %arg12[%c24, %c0_30], %135 {strides = array<i32>} : memref<64x128xf32, #tpu.memory_space<vmem>>, vector<8x128xf32>,
    %137 = arith.truncf %135 : vector<8x128xf32> to vector<8x128xbf16>
    %cst_31 = arith.constant dense<0.000000e+00> : vector<8x384xf32>
    %138 = tpu.matmul %137, %6, %cst_31 {dimension_numbers = #tpu.dot_dimension_numbers<[1], [0], [0], [1], [0, 0, 1, 1], [], []>} : vector<8x128xbf16>, vector<128x384xbf16>, vector<8x384xf32> -> vector<8x384xf32>
    %139 = vector.broadcast %7 : vector<1x384xf32> to vector<8x384xf32>
    %140 = arith.addf %138, %139 : vector<8x384xf32>
    %141 = vector.extract_strided_slice %5 {offsets = [32, 0], sizes = [8, 384], strides = [1, 1]} : vector<64x384xf32> to vector<8x384xf32>
    %142 = vector.extract_strided_slice %141 {offsets = [0, 0], sizes = [8, 128], strides = [1, 1]} : vector<8x384xf32> to vector<8x128xf32>
    %143 = vector.extract_strided_slice %140 {offsets = [0, 0], sizes = [8, 128], strides = [1, 1]} : vector<8x384xf32> to vector<8x128xf32>
    %144 = arith.addf %142, %143 : vector<8x128xf32>
    %145 = arith.negf %144 : vector<8x128xf32>
    %146 = math.exp %145 : vector<8x128xf32>
    %cst_32 = arith.constant 1.000000e+00 : f32
    %147 = vector.broadcast %cst_32 : f32 to vector<8x128xf32>
    %148 = arith.addf %147, %146 : vector<8x128xf32>
    %149 = arith.divf %147, %148 : vector<8x128xf32>
    %150 = vector.extract_strided_slice %141 {offsets = [0, 128], sizes = [8, 128], strides = [1, 1]} : vector<8x384xf32> to vector<8x128xf32>
    %151 = vector.extract_strided_slice %140 {offsets = [0, 128], sizes = [8, 128], strides = [1, 1]} : vector<8x384xf32> to vector<8x128xf32>
    %152 = arith.addf %150, %151 : vector<8x128xf32>
    %153 = arith.negf %152 : vector<8x128xf32>
    %154 = math.exp %153 : vector<8x128xf32>
    %cst_33 = arith.constant 1.000000e+00 : f32
    %155 = vector.broadcast %cst_33 : f32 to vector<8x128xf32>
    %156 = arith.addf %155, %154 : vector<8x128xf32>
    %157 = arith.divf %155, %156 : vector<8x128xf32>
    %158 = vector.extract_strided_slice %141 {offsets = [0, 256], sizes = [8, 128], strides = [1, 1]} : vector<8x384xf32> to vector<8x128xf32>
    %159 = vector.extract_strided_slice %140 {offsets = [0, 256], sizes = [8, 128], strides = [1, 1]} : vector<8x384xf32> to vector<8x128xf32>
    %160 = arith.mulf %149, %159 : vector<8x128xf32>
    %161 = arith.addf %158, %160 : vector<8x128xf32>
    %162 = math.tanh %161 : vector<8x128xf32>
    %cst_34 = arith.constant 1.000000e+00 : f32
    %163 = vector.broadcast %cst_34 : f32 to vector<8x128xf32>
    %164 = arith.subf %163, %157 : vector<8x128xf32>
    %165 = arith.mulf %164, %162 : vector<8x128xf32>
    %166 = arith.mulf %157, %135 : vector<8x128xf32>
    %167 = arith.addf %165, %166 : vector<8x128xf32>
    %c32 = arith.constant 32 : index
    %c0_35 = arith.constant 0 : index
    %168 = vector.load %arg12[%c32, %c0_35] : memref<64x128xf32, #tpu.memory_space<vmem>>, vector<8x128xf32>
    tpu.vector_store %arg12[%c32, %c0_35], %167 {strides = array<i32>} : memref<64x128xf32, #tpu.memory_space<vmem>>, vector<8x128xf32>,
    %169 = arith.truncf %167 : vector<8x128xf32> to vector<8x128xbf16>
    %cst_36 = arith.constant dense<0.000000e+00> : vector<8x384xf32>
    %170 = tpu.matmul %169, %6, %cst_36 {dimension_numbers = #tpu.dot_dimension_numbers<[1], [0], [0], [1], [0, 0, 1, 1], [], []>} : vector<8x128xbf16>, vector<128x384xbf16>, vector<8x384xf32> -> vector<8x384xf32>
    %171 = vector.broadcast %7 : vector<1x384xf32> to vector<8x384xf32>
    %172 = arith.addf %170, %171 : vector<8x384xf32>
    %173 = vector.extract_strided_slice %5 {offsets = [40, 0], sizes = [8, 384], strides = [1, 1]} : vector<64x384xf32> to vector<8x384xf32>
    %174 = vector.extract_strided_slice %173 {offsets = [0, 0], sizes = [8, 128], strides = [1, 1]} : vector<8x384xf32> to vector<8x128xf32>
    %175 = vector.extract_strided_slice %172 {offsets = [0, 0], sizes = [8, 128], strides = [1, 1]} : vector<8x384xf32> to vector<8x128xf32>
    %176 = arith.addf %174, %175 : vector<8x128xf32>
    %177 = arith.negf %176 : vector<8x128xf32>
    %178 = math.exp %177 : vector<8x128xf32>
    %cst_37 = arith.constant 1.000000e+00 : f32
    %179 = vector.broadcast %cst_37 : f32 to vector<8x128xf32>
    %180 = arith.addf %179, %178 : vector<8x128xf32>
    %181 = arith.divf %179, %180 : vector<8x128xf32>
    %182 = vector.extract_strided_slice %173 {offsets = [0, 128], sizes = [8, 128], strides = [1, 1]} : vector<8x384xf32> to vector<8x128xf32>
    %183 = vector.extract_strided_slice %172 {offsets = [0, 128], sizes = [8, 128], strides = [1, 1]} : vector<8x384xf32> to vector<8x128xf32>
    %184 = arith.addf %182, %183 : vector<8x128xf32>
    %185 = arith.negf %184 : vector<8x128xf32>
    %186 = math.exp %185 : vector<8x128xf32>
    %cst_38 = arith.constant 1.000000e+00 : f32
    %187 = vector.broadcast %cst_38 : f32 to vector<8x128xf32>
    %188 = arith.addf %187, %186 : vector<8x128xf32>
    %189 = arith.divf %187, %188 : vector<8x128xf32>
    %190 = vector.extract_strided_slice %173 {offsets = [0, 256], sizes = [8, 128], strides = [1, 1]} : vector<8x384xf32> to vector<8x128xf32>
    %191 = vector.extract_strided_slice %172 {offsets = [0, 256], sizes = [8, 128], strides = [1, 1]} : vector<8x384xf32> to vector<8x128xf32>
    %192 = arith.mulf %181, %191 : vector<8x128xf32>
    %193 = arith.addf %190, %192 : vector<8x128xf32>
    %194 = math.tanh %193 : vector<8x128xf32>
    %cst_39 = arith.constant 1.000000e+00 : f32
    %195 = vector.broadcast %cst_39 : f32 to vector<8x128xf32>
    %196 = arith.subf %195, %189 : vector<8x128xf32>
    %197 = arith.mulf %196, %194 : vector<8x128xf32>
    %198 = arith.mulf %189, %167 : vector<8x128xf32>
    %199 = arith.addf %197, %198 : vector<8x128xf32>
    %c40 = arith.constant 40 : index
    %c0_40 = arith.constant 0 : index
    %200 = vector.load %arg12[%c40, %c0_40] : memref<64x128xf32, #tpu.memory_space<vmem>>, vector<8x128xf32>
    tpu.vector_store %arg12[%c40, %c0_40], %199 {strides = array<i32>} : memref<64x128xf32, #tpu.memory_space<vmem>>, vector<8x128xf32>,
    %201 = arith.truncf %199 : vector<8x128xf32> to vector<8x128xbf16>
    %cst_41 = arith.constant dense<0.000000e+00> : vector<8x384xf32>
    %202 = tpu.matmul %201, %6, %cst_41 {dimension_numbers = #tpu.dot_dimension_numbers<[1], [0], [0], [1], [0, 0, 1, 1], [], []>} : vector<8x128xbf16>, vector<128x384xbf16>, vector<8x384xf32> -> vector<8x384xf32>
    %203 = vector.broadcast %7 : vector<1x384xf32> to vector<8x384xf32>
    %204 = arith.addf %202, %203 : vector<8x384xf32>
    %205 = vector.extract_strided_slice %5 {offsets = [48, 0], sizes = [8, 384], strides = [1, 1]} : vector<64x384xf32> to vector<8x384xf32>
    %206 = vector.extract_strided_slice %205 {offsets = [0, 0], sizes = [8, 128], strides = [1, 1]} : vector<8x384xf32> to vector<8x128xf32>
    %207 = vector.extract_strided_slice %204 {offsets = [0, 0], sizes = [8, 128], strides = [1, 1]} : vector<8x384xf32> to vector<8x128xf32>
    %208 = arith.addf %206, %207 : vector<8x128xf32>
    %209 = arith.negf %208 : vector<8x128xf32>
    %210 = math.exp %209 : vector<8x128xf32>
    %cst_42 = arith.constant 1.000000e+00 : f32
    %211 = vector.broadcast %cst_42 : f32 to vector<8x128xf32>
    %212 = arith.addf %211, %210 : vector<8x128xf32>
    %213 = arith.divf %211, %212 : vector<8x128xf32>
    %214 = vector.extract_strided_slice %205 {offsets = [0, 128], sizes = [8, 128], strides = [1, 1]} : vector<8x384xf32> to vector<8x128xf32>
    %215 = vector.extract_strided_slice %204 {offsets = [0, 128], sizes = [8, 128], strides = [1, 1]} : vector<8x384xf32> to vector<8x128xf32>
    %216 = arith.addf %214, %215 : vector<8x128xf32>
    %217 = arith.negf %216 : vector<8x128xf32>
    %218 = math.exp %217 : vector<8x128xf32>
    %cst_43 = arith.constant 1.000000e+00 : f32
    %219 = vector.broadcast %cst_43 : f32 to vector<8x128xf32>
    %220 = arith.addf %219, %218 : vector<8x128xf32>
    %221 = arith.divf %219, %220 : vector<8x128xf32>
    %222 = vector.extract_strided_slice %205 {offsets = [0, 256], sizes = [8, 128], strides = [1, 1]} : vector<8x384xf32> to vector<8x128xf32>
    %223 = vector.extract_strided_slice %204 {offsets = [0, 256], sizes = [8, 128], strides = [1, 1]} : vector<8x384xf32> to vector<8x128xf32>
    %224 = arith.mulf %213, %223 : vector<8x128xf32>
    %225 = arith.addf %222, %224 : vector<8x128xf32>
    %226 = math.tanh %225 : vector<8x128xf32>
    %cst_44 = arith.constant 1.000000e+00 : f32
    %227 = vector.broadcast %cst_44 : f32 to vector<8x128xf32>
    %228 = arith.subf %227, %221 : vector<8x128xf32>
    %229 = arith.mulf %228, %226 : vector<8x128xf32>
    %230 = arith.mulf %221, %199 : vector<8x128xf32>
    %231 = arith.addf %229, %230 : vector<8x128xf32>
    %c48 = arith.constant 48 : index
    %c0_45 = arith.constant 0 : index
    %232 = vector.load %arg12[%c48, %c0_45] : memref<64x128xf32, #tpu.memory_space<vmem>>, vector<8x128xf32>
    tpu.vector_store %arg12[%c48, %c0_45], %231 {strides = array<i32>} : memref<64x128xf32, #tpu.memory_space<vmem>>, vector<8x128xf32>,
    %233 = arith.truncf %231 : vector<8x128xf32> to vector<8x128xbf16>
    %cst_46 = arith.constant dense<0.000000e+00> : vector<8x384xf32>
    %234 = tpu.matmul %233, %6, %cst_46 {dimension_numbers = #tpu.dot_dimension_numbers<[1], [0], [0], [1], [0, 0, 1, 1], [], []>} : vector<8x128xbf16>, vector<128x384xbf16>, vector<8x384xf32> -> vector<8x384xf32>
    %235 = vector.broadcast %7 : vector<1x384xf32> to vector<8x384xf32>
    %236 = arith.addf %234, %235 : vector<8x384xf32>
    %237 = vector.extract_strided_slice %5 {offsets = [56, 0], sizes = [8, 384], strides = [1, 1]} : vector<64x384xf32> to vector<8x384xf32>
    %238 = vector.extract_strided_slice %237 {offsets = [0, 0], sizes = [8, 128], strides = [1, 1]} : vector<8x384xf32> to vector<8x128xf32>
    %239 = vector.extract_strided_slice %236 {offsets = [0, 0], sizes = [8, 128], strides = [1, 1]} : vector<8x384xf32> to vector<8x128xf32>
    %240 = arith.addf %238, %239 : vector<8x128xf32>
    %241 = arith.negf %240 : vector<8x128xf32>
    %242 = math.exp %241 : vector<8x128xf32>
    %cst_47 = arith.constant 1.000000e+00 : f32
    %243 = vector.broadcast %cst_47 : f32 to vector<8x128xf32>
    %244 = arith.addf %243, %242 : vector<8x128xf32>
    %245 = arith.divf %243, %244 : vector<8x128xf32>
    %246 = vector.extract_strided_slice %237 {offsets = [0, 128], sizes = [8, 128], strides = [1, 1]} : vector<8x384xf32> to vector<8x128xf32>
    %247 = vector.extract_strided_slice %236 {offsets = [0, 128], sizes = [8, 128], strides = [1, 1]} : vector<8x384xf32> to vector<8x128xf32>
    %248 = arith.addf %246, %247 : vector<8x128xf32>
    %249 = arith.negf %248 : vector<8x128xf32>
    %250 = math.exp %249 : vector<8x128xf32>
    %cst_48 = arith.constant 1.000000e+00 : f32
    %251 = vector.broadcast %cst_48 : f32 to vector<8x128xf32>
    %252 = arith.addf %251, %250 : vector<8x128xf32>
    %253 = arith.divf %251, %252 : vector<8x128xf32>
    %254 = vector.extract_strided_slice %237 {offsets = [0, 256], sizes = [8, 128], strides = [1, 1]} : vector<8x384xf32> to vector<8x128xf32>
    %255 = vector.extract_strided_slice %236 {offsets = [0, 256], sizes = [8, 128], strides = [1, 1]} : vector<8x384xf32> to vector<8x128xf32>
    %256 = arith.mulf %245, %255 : vector<8x128xf32>
    %257 = arith.addf %254, %256 : vector<8x128xf32>
    %258 = math.tanh %257 : vector<8x128xf32>
    %cst_49 = arith.constant 1.000000e+00 : f32
    %259 = vector.broadcast %cst_49 : f32 to vector<8x128xf32>
    %260 = arith.subf %259, %253 : vector<8x128xf32>
    %261 = arith.mulf %260, %258 : vector<8x128xf32>
    %262 = arith.mulf %253, %231 : vector<8x128xf32>
    %263 = arith.addf %261, %262 : vector<8x128xf32>
    %c56 = arith.constant 56 : index
    %c0_50 = arith.constant 0 : index
    %264 = vector.load %arg12[%c56, %c0_50] : memref<64x128xf32, #tpu.memory_space<vmem>>, vector<8x128xf32>
    tpu.vector_store %arg12[%c56, %c0_50], %263 {strides = array<i32>} : memref<64x128xf32, #tpu.memory_space<vmem>>, vector<8x128xf32>,
    %c0_51 = arith.constant 0 : index
    %c0_52 = arith.constant 0 : index
    %265 = vector.load %arg12[%c0_51, %c0_52] : memref<64x128xf32, #tpu.memory_space<vmem>>, vector<64x128xf32>
    %266 = arith.truncf %265 : vector<64x128xf32> to vector<64x128xbf16>
    %c0_53 = arith.constant 0 : index
    %c0_54 = arith.constant 0 : index
    %267 = vector.load %arg5[%c0_53, %c0_54] : memref<128x384xbf16, #tpu.memory_space<vmem>>, vector<128x384xbf16>
    %cst_55 = arith.constant dense<0.000000e+00> : vector<64x384xf32>
    %268 = tpu.matmul %266, %267, %cst_55 {dimension_numbers = #tpu.dot_dimension_numbers<[1], [0], [0], [1], [0, 0, 1, 1], [], []>} : vector<64x128xbf16>, vector<128x384xbf16>, vector<64x384xf32> -> vector<64x384xf32>
    %c0_56 = arith.constant 0 : index
    %c0_57 = arith.constant 0 : index
    %269 = vector.load %arg7[%c0_56, %c0_57] : memref<1x384xf32, #tpu.memory_space<vmem>>, vector<1x384xf32>
    %270 = vector.broadcast %269 : vector<1x384xf32> to vector<64x384xf32>
    %271 = arith.addf %268, %270 : vector<64x384xf32>
    %c0_58 = arith.constant 0 : index
    %c0_59 = arith.constant 0 : index
    %272 = vector.load %arg6[%c0_58, %c0_59] : memref<128x384xbf16, #tpu.memory_space<vmem>>, vector<128x384xbf16>
    %c0_60 = arith.constant 0 : index
    %c0_61 = arith.constant 0 : index
    %273 = vector.load %arg8[%c0_60, %c0_61] : memref<1x384xf32, #tpu.memory_space<vmem>>, vector<1x384xf32>
    %cst_62 = arith.constant 0.000000e+00 : f32
    %274 = vector.broadcast %cst_62 : f32 to vector<8x128xf32>
    %275 = arith.truncf %274 : vector<8x128xf32> to vector<8x128xbf16>
    %cst_63 = arith.constant dense<0.000000e+00> : vector<8x384xf32>
    %276 = tpu.matmul %275, %272, %cst_63 {dimension_numbers = #tpu.dot_dimension_numbers<[1], [0], [0], [1], [0, 0, 1, 1], [], []>} : vector<8x128xbf16>, vector<128x384xbf16>, vector<8x384xf32> -> vector<8x384xf32>
    %277 = vector.broadcast %273 : vector<1x384xf32> to vector<8x384xf32>
    %278 = arith.addf %276, %277 : vector<8x384xf32>
    %279 = vector.extract_strided_slice %271 {offsets = [0, 0], sizes = [8, 384], strides = [1, 1]} : vector<64x384xf32> to vector<8x384xf32>
    %280 = vector.extract_strided_slice %279 {offsets = [0, 0], sizes = [8, 128], strides = [1, 1]} : vector<8x384xf32> to vector<8x128xf32>
    %281 = vector.extract_strided_slice %278 {offsets = [0, 0], sizes = [8, 128], strides = [1, 1]} : vector<8x384xf32> to vector<8x128xf32>
    %282 = arith.addf %280, %281 : vector<8x128xf32>
    %283 = arith.negf %282 : vector<8x128xf32>
    %284 = math.exp %283 : vector<8x128xf32>
    %cst_64 = arith.constant 1.000000e+00 : f32
    %285 = vector.broadcast %cst_64 : f32 to vector<8x128xf32>
    %286 = arith.addf %285, %284 : vector<8x128xf32>
    %287 = arith.divf %285, %286 : vector<8x128xf32>
    %288 = vector.extract_strided_slice %279 {offsets = [0, 128], sizes = [8, 128], strides = [1, 1]} : vector<8x384xf32> to vector<8x128xf32>
    %289 = vector.extract_strided_slice %278 {offsets = [0, 128], sizes = [8, 128], strides = [1, 1]} : vector<8x384xf32> to vector<8x128xf32>
    %290 = arith.addf %288, %289 : vector<8x128xf32>
    %291 = arith.negf %290 : vector<8x128xf32>
    %292 = math.exp %291 : vector<8x128xf32>
    %cst_65 = arith.constant 1.000000e+00 : f32
    %293 = vector.broadcast %cst_65 : f32 to vector<8x128xf32>
    %294 = arith.addf %293, %292 : vector<8x128xf32>
    %295 = arith.divf %293, %294 : vector<8x128xf32>
    %296 = vector.extract_strided_slice %279 {offsets = [0, 256], sizes = [8, 128], strides = [1, 1]} : vector<8x384xf32> to vector<8x128xf32>
    %297 = vector.extract_strided_slice %278 {offsets = [0, 256], sizes = [8, 128], strides = [1, 1]} : vector<8x384xf32> to vector<8x128xf32>
    %298 = arith.mulf %287, %297 : vector<8x128xf32>
    %299 = arith.addf %296, %298 : vector<8x128xf32>
    %300 = math.tanh %299 : vector<8x128xf32>
    %cst_66 = arith.constant 1.000000e+00 : f32
    %301 = vector.broadcast %cst_66 : f32 to vector<8x128xf32>
    %302 = arith.subf %301, %295 : vector<8x128xf32>
    %303 = arith.mulf %302, %300 : vector<8x128xf32>
    %304 = arith.mulf %295, %274 : vector<8x128xf32>
    %305 = arith.addf %303, %304 : vector<8x128xf32>
    %306 = arith.truncf %305 : vector<8x128xf32> to vector<8x128xbf16>
    %cst_67 = arith.constant dense<0.000000e+00> : vector<8x384xf32>
    %307 = tpu.matmul %306, %272, %cst_67 {dimension_numbers = #tpu.dot_dimension_numbers<[1], [0], [0], [1], [0, 0, 1, 1], [], []>} : vector<8x128xbf16>, vector<128x384xbf16>, vector<8x384xf32> -> vector<8x384xf32>
    %308 = vector.broadcast %273 : vector<1x384xf32> to vector<8x384xf32>
    %309 = arith.addf %307, %308 : vector<8x384xf32>
    %310 = vector.extract_strided_slice %271 {offsets = [8, 0], sizes = [8, 384], strides = [1, 1]} : vector<64x384xf32> to vector<8x384xf32>
    %311 = vector.extract_strided_slice %310 {offsets = [0, 0], sizes = [8, 128], strides = [1, 1]} : vector<8x384xf32> to vector<8x128xf32>
    %312 = vector.extract_strided_slice %309 {offsets = [0, 0], sizes = [8, 128], strides = [1, 1]} : vector<8x384xf32> to vector<8x128xf32>
    %313 = arith.addf %311, %312 : vector<8x128xf32>
    %314 = arith.negf %313 : vector<8x128xf32>
    %315 = math.exp %314 : vector<8x128xf32>
    %cst_68 = arith.constant 1.000000e+00 : f32
    %316 = vector.broadcast %cst_68 : f32 to vector<8x128xf32>
    %317 = arith.addf %316, %315 : vector<8x128xf32>
    %318 = arith.divf %316, %317 : vector<8x128xf32>
    %319 = vector.extract_strided_slice %310 {offsets = [0, 128], sizes = [8, 128], strides = [1, 1]} : vector<8x384xf32> to vector<8x128xf32>
    %320 = vector.extract_strided_slice %309 {offsets = [0, 128], sizes = [8, 128], strides = [1, 1]} : vector<8x384xf32> to vector<8x128xf32>
    %321 = arith.addf %319, %320 : vector<8x128xf32>
    %322 = arith.negf %321 : vector<8x128xf32>
    %323 = math.exp %322 : vector<8x128xf32>
    %cst_69 = arith.constant 1.000000e+00 : f32
    %324 = vector.broadcast %cst_69 : f32 to vector<8x128xf32>
    %325 = arith.addf %324, %323 : vector<8x128xf32>
    %326 = arith.divf %324, %325 : vector<8x128xf32>
    %327 = vector.extract_strided_slice %310 {offsets = [0, 256], sizes = [8, 128], strides = [1, 1]} : vector<8x384xf32> to vector<8x128xf32>
    %328 = vector.extract_strided_slice %309 {offsets = [0, 256], sizes = [8, 128], strides = [1, 1]} : vector<8x384xf32> to vector<8x128xf32>
    %329 = arith.mulf %318, %328 : vector<8x128xf32>
    %330 = arith.addf %327, %329 : vector<8x128xf32>
    %331 = math.tanh %330 : vector<8x128xf32>
    %cst_70 = arith.constant 1.000000e+00 : f32
    %332 = vector.broadcast %cst_70 : f32 to vector<8x128xf32>
    %333 = arith.subf %332, %326 : vector<8x128xf32>
    %334 = arith.mulf %333, %331 : vector<8x128xf32>
    %335 = arith.mulf %326, %305 : vector<8x128xf32>
    %336 = arith.addf %334, %335 : vector<8x128xf32>
    %337 = arith.truncf %336 : vector<8x128xf32> to vector<8x128xbf16>
    %cst_71 = arith.constant dense<0.000000e+00> : vector<8x384xf32>
    %338 = tpu.matmul %337, %272, %cst_71 {dimension_numbers = #tpu.dot_dimension_numbers<[1], [0], [0], [1], [0, 0, 1, 1], [], []>} : vector<8x128xbf16>, vector<128x384xbf16>, vector<8x384xf32> -> vector<8x384xf32>
    %339 = vector.broadcast %273 : vector<1x384xf32> to vector<8x384xf32>
    %340 = arith.addf %338, %339 : vector<8x384xf32>
    %341 = vector.extract_strided_slice %271 {offsets = [16, 0], sizes = [8, 384], strides = [1, 1]} : vector<64x384xf32> to vector<8x384xf32>
    %342 = vector.extract_strided_slice %341 {offsets = [0, 0], sizes = [8, 128], strides = [1, 1]} : vector<8x384xf32> to vector<8x128xf32>
    %343 = vector.extract_strided_slice %340 {offsets = [0, 0], sizes = [8, 128], strides = [1, 1]} : vector<8x384xf32> to vector<8x128xf32>
    %344 = arith.addf %342, %343 : vector<8x128xf32>
    %345 = arith.negf %344 : vector<8x128xf32>
    %346 = math.exp %345 : vector<8x128xf32>
    %cst_72 = arith.constant 1.000000e+00 : f32
    %347 = vector.broadcast %cst_72 : f32 to vector<8x128xf32>
    %348 = arith.addf %347, %346 : vector<8x128xf32>
    %349 = arith.divf %347, %348 : vector<8x128xf32>
    %350 = vector.extract_strided_slice %341 {offsets = [0, 128], sizes = [8, 128], strides = [1, 1]} : vector<8x384xf32> to vector<8x128xf32>
    %351 = vector.extract_strided_slice %340 {offsets = [0, 128], sizes = [8, 128], strides = [1, 1]} : vector<8x384xf32> to vector<8x128xf32>
    %352 = arith.addf %350, %351 : vector<8x128xf32>
    %353 = arith.negf %352 : vector<8x128xf32>
    %354 = math.exp %353 : vector<8x128xf32>
    %cst_73 = arith.constant 1.000000e+00 : f32
    %355 = vector.broadcast %cst_73 : f32 to vector<8x128xf32>
    %356 = arith.addf %355, %354 : vector<8x128xf32>
    %357 = arith.divf %355, %356 : vector<8x128xf32>
    %358 = vector.extract_strided_slice %341 {offsets = [0, 256], sizes = [8, 128], strides = [1, 1]} : vector<8x384xf32> to vector<8x128xf32>
    %359 = vector.extract_strided_slice %340 {offsets = [0, 256], sizes = [8, 128], strides = [1, 1]} : vector<8x384xf32> to vector<8x128xf32>
    %360 = arith.mulf %349, %359 : vector<8x128xf32>
    %361 = arith.addf %358, %360 : vector<8x128xf32>
    %362 = math.tanh %361 : vector<8x128xf32>
    %cst_74 = arith.constant 1.000000e+00 : f32
    %363 = vector.broadcast %cst_74 : f32 to vector<8x128xf32>
    %364 = arith.subf %363, %357 : vector<8x128xf32>
    %365 = arith.mulf %364, %362 : vector<8x128xf32>
    %366 = arith.mulf %357, %336 : vector<8x128xf32>
    %367 = arith.addf %365, %366 : vector<8x128xf32>
    %368 = arith.truncf %367 : vector<8x128xf32> to vector<8x128xbf16>
    %cst_75 = arith.constant dense<0.000000e+00> : vector<8x384xf32>
    %369 = tpu.matmul %368, %272, %cst_75 {dimension_numbers = #tpu.dot_dimension_numbers<[1], [0], [0], [1], [0, 0, 1, 1], [], []>} : vector<8x128xbf16>, vector<128x384xbf16>, vector<8x384xf32> -> vector<8x384xf32>
    %370 = vector.broadcast %273 : vector<1x384xf32> to vector<8x384xf32>
    %371 = arith.addf %369, %370 : vector<8x384xf32>
    %372 = vector.extract_strided_slice %271 {offsets = [24, 0], sizes = [8, 384], strides = [1, 1]} : vector<64x384xf32> to vector<8x384xf32>
    %373 = vector.extract_strided_slice %372 {offsets = [0, 0], sizes = [8, 128], strides = [1, 1]} : vector<8x384xf32> to vector<8x128xf32>
    %374 = vector.extract_strided_slice %371 {offsets = [0, 0], sizes = [8, 128], strides = [1, 1]} : vector<8x384xf32> to vector<8x128xf32>
    %375 = arith.addf %373, %374 : vector<8x128xf32>
    %376 = arith.negf %375 : vector<8x128xf32>
    %377 = math.exp %376 : vector<8x128xf32>
    %cst_76 = arith.constant 1.000000e+00 : f32
    %378 = vector.broadcast %cst_76 : f32 to vector<8x128xf32>
    %379 = arith.addf %378, %377 : vector<8x128xf32>
    %380 = arith.divf %378, %379 : vector<8x128xf32>
    %381 = vector.extract_strided_slice %372 {offsets = [0, 128], sizes = [8, 128], strides = [1, 1]} : vector<8x384xf32> to vector<8x128xf32>
    %382 = vector.extract_strided_slice %371 {offsets = [0, 128], sizes = [8, 128], strides = [1, 1]} : vector<8x384xf32> to vector<8x128xf32>
    %383 = arith.addf %381, %382 : vector<8x128xf32>
    %384 = arith.negf %383 : vector<8x128xf32>
    %385 = math.exp %384 : vector<8x128xf32>
    %cst_77 = arith.constant 1.000000e+00 : f32
    %386 = vector.broadcast %cst_77 : f32 to vector<8x128xf32>
    %387 = arith.addf %386, %385 : vector<8x128xf32>
    %388 = arith.divf %386, %387 : vector<8x128xf32>
    %389 = vector.extract_strided_slice %372 {offsets = [0, 256], sizes = [8, 128], strides = [1, 1]} : vector<8x384xf32> to vector<8x128xf32>
    %390 = vector.extract_strided_slice %371 {offsets = [0, 256], sizes = [8, 128], strides = [1, 1]} : vector<8x384xf32> to vector<8x128xf32>
    %391 = arith.mulf %380, %390 : vector<8x128xf32>
    %392 = arith.addf %389, %391 : vector<8x128xf32>
    %393 = math.tanh %392 : vector<8x128xf32>
    %cst_78 = arith.constant 1.000000e+00 : f32
    %394 = vector.broadcast %cst_78 : f32 to vector<8x128xf32>
    %395 = arith.subf %394, %388 : vector<8x128xf32>
    %396 = arith.mulf %395, %393 : vector<8x128xf32>
    %397 = arith.mulf %388, %367 : vector<8x128xf32>
    %398 = arith.addf %396, %397 : vector<8x128xf32>
    %399 = arith.truncf %398 : vector<8x128xf32> to vector<8x128xbf16>
    %cst_79 = arith.constant dense<0.000000e+00> : vector<8x384xf32>
    %400 = tpu.matmul %399, %272, %cst_79 {dimension_numbers = #tpu.dot_dimension_numbers<[1], [0], [0], [1], [0, 0, 1, 1], [], []>} : vector<8x128xbf16>, vector<128x384xbf16>, vector<8x384xf32> -> vector<8x384xf32>
    %401 = vector.broadcast %273 : vector<1x384xf32> to vector<8x384xf32>
    %402 = arith.addf %400, %401 : vector<8x384xf32>
    %403 = vector.extract_strided_slice %271 {offsets = [32, 0], sizes = [8, 384], strides = [1, 1]} : vector<64x384xf32> to vector<8x384xf32>
    %404 = vector.extract_strided_slice %403 {offsets = [0, 0], sizes = [8, 128], strides = [1, 1]} : vector<8x384xf32> to vector<8x128xf32>
    %405 = vector.extract_strided_slice %402 {offsets = [0, 0], sizes = [8, 128], strides = [1, 1]} : vector<8x384xf32> to vector<8x128xf32>
    %406 = arith.addf %404, %405 : vector<8x128xf32>
    %407 = arith.negf %406 : vector<8x128xf32>
    %408 = math.exp %407 : vector<8x128xf32>
    %cst_80 = arith.constant 1.000000e+00 : f32
    %409 = vector.broadcast %cst_80 : f32 to vector<8x128xf32>
    %410 = arith.addf %409, %408 : vector<8x128xf32>
    %411 = arith.divf %409, %410 : vector<8x128xf32>
    %412 = vector.extract_strided_slice %403 {offsets = [0, 128], sizes = [8, 128], strides = [1, 1]} : vector<8x384xf32> to vector<8x128xf32>
    %413 = vector.extract_strided_slice %402 {offsets = [0, 128], sizes = [8, 128], strides = [1, 1]} : vector<8x384xf32> to vector<8x128xf32>
    %414 = arith.addf %412, %413 : vector<8x128xf32>
    %415 = arith.negf %414 : vector<8x128xf32>
    %416 = math.exp %415 : vector<8x128xf32>
    %cst_81 = arith.constant 1.000000e+00 : f32
    %417 = vector.broadcast %cst_81 : f32 to vector<8x128xf32>
    %418 = arith.addf %417, %416 : vector<8x128xf32>
    %419 = arith.divf %417, %418 : vector<8x128xf32>
    %420 = vector.extract_strided_slice %403 {offsets = [0, 256], sizes = [8, 128], strides = [1, 1]} : vector<8x384xf32> to vector<8x128xf32>
    %421 = vector.extract_strided_slice %402 {offsets = [0, 256], sizes = [8, 128], strides = [1, 1]} : vector<8x384xf32> to vector<8x128xf32>
    %422 = arith.mulf %411, %421 : vector<8x128xf32>
    %423 = arith.addf %420, %422 : vector<8x128xf32>
    %424 = math.tanh %423 : vector<8x128xf32>
    %cst_82 = arith.constant 1.000000e+00 : f32
    %425 = vector.broadcast %cst_82 : f32 to vector<8x128xf32>
    %426 = arith.subf %425, %419 : vector<8x128xf32>
    %427 = arith.mulf %426, %424 : vector<8x128xf32>
    %428 = arith.mulf %419, %398 : vector<8x128xf32>
    %429 = arith.addf %427, %428 : vector<8x128xf32>
    %430 = arith.truncf %429 : vector<8x128xf32> to vector<8x128xbf16>
    %cst_83 = arith.constant dense<0.000000e+00> : vector<8x384xf32>
    %431 = tpu.matmul %430, %272, %cst_83 {dimension_numbers = #tpu.dot_dimension_numbers<[1], [0], [0], [1], [0, 0, 1, 1], [], []>} : vector<8x128xbf16>, vector<128x384xbf16>, vector<8x384xf32> -> vector<8x384xf32>
    %432 = vector.broadcast %273 : vector<1x384xf32> to vector<8x384xf32>
    %433 = arith.addf %431, %432 : vector<8x384xf32>
    %434 = vector.extract_strided_slice %271 {offsets = [40, 0], sizes = [8, 384], strides = [1, 1]} : vector<64x384xf32> to vector<8x384xf32>
    %435 = vector.extract_strided_slice %434 {offsets = [0, 0], sizes = [8, 128], strides = [1, 1]} : vector<8x384xf32> to vector<8x128xf32>
    %436 = vector.extract_strided_slice %433 {offsets = [0, 0], sizes = [8, 128], strides = [1, 1]} : vector<8x384xf32> to vector<8x128xf32>
    %437 = arith.addf %435, %436 : vector<8x128xf32>
    %438 = arith.negf %437 : vector<8x128xf32>
    %439 = math.exp %438 : vector<8x128xf32>
    %cst_84 = arith.constant 1.000000e+00 : f32
    %440 = vector.broadcast %cst_84 : f32 to vector<8x128xf32>
    %441 = arith.addf %440, %439 : vector<8x128xf32>
    %442 = arith.divf %440, %441 : vector<8x128xf32>
    %443 = vector.extract_strided_slice %434 {offsets = [0, 128], sizes = [8, 128], strides = [1, 1]} : vector<8x384xf32> to vector<8x128xf32>
    %444 = vector.extract_strided_slice %433 {offsets = [0, 128], sizes = [8, 128], strides = [1, 1]} : vector<8x384xf32> to vector<8x128xf32>
    %445 = arith.addf %443, %444 : vector<8x128xf32>
    %446 = arith.negf %445 : vector<8x128xf32>
    %447 = math.exp %446 : vector<8x128xf32>
    %cst_85 = arith.constant 1.000000e+00 : f32
    %448 = vector.broadcast %cst_85 : f32 to vector<8x128xf32>
    %449 = arith.addf %448, %447 : vector<8x128xf32>
    %450 = arith.divf %448, %449 : vector<8x128xf32>
    %451 = vector.extract_strided_slice %434 {offsets = [0, 256], sizes = [8, 128], strides = [1, 1]} : vector<8x384xf32> to vector<8x128xf32>
    %452 = vector.extract_strided_slice %433 {offsets = [0, 256], sizes = [8, 128], strides = [1, 1]} : vector<8x384xf32> to vector<8x128xf32>
    %453 = arith.mulf %442, %452 : vector<8x128xf32>
    %454 = arith.addf %451, %453 : vector<8x128xf32>
    %455 = math.tanh %454 : vector<8x128xf32>
    %cst_86 = arith.constant 1.000000e+00 : f32
    %456 = vector.broadcast %cst_86 : f32 to vector<8x128xf32>
    %457 = arith.subf %456, %450 : vector<8x128xf32>
    %458 = arith.mulf %457, %455 : vector<8x128xf32>
    %459 = arith.mulf %450, %429 : vector<8x128xf32>
    %460 = arith.addf %458, %459 : vector<8x128xf32>
    %461 = arith.truncf %460 : vector<8x128xf32> to vector<8x128xbf16>
    %cst_87 = arith.constant dense<0.000000e+00> : vector<8x384xf32>
    %462 = tpu.matmul %461, %272, %cst_87 {dimension_numbers = #tpu.dot_dimension_numbers<[1], [0], [0], [1], [0, 0, 1, 1], [], []>} : vector<8x128xbf16>, vector<128x384xbf16>, vector<8x384xf32> -> vector<8x384xf32>
    %463 = vector.broadcast %273 : vector<1x384xf32> to vector<8x384xf32>
    %464 = arith.addf %462, %463 : vector<8x384xf32>
    %465 = vector.extract_strided_slice %271 {offsets = [48, 0], sizes = [8, 384], strides = [1, 1]} : vector<64x384xf32> to vector<8x384xf32>
    %466 = vector.extract_strided_slice %465 {offsets = [0, 0], sizes = [8, 128], strides = [1, 1]} : vector<8x384xf32> to vector<8x128xf32>
    %467 = vector.extract_strided_slice %464 {offsets = [0, 0], sizes = [8, 128], strides = [1, 1]} : vector<8x384xf32> to vector<8x128xf32>
    %468 = arith.addf %466, %467 : vector<8x128xf32>
    %469 = arith.negf %468 : vector<8x128xf32>
    %470 = math.exp %469 : vector<8x128xf32>
    %cst_88 = arith.constant 1.000000e+00 : f32
    %471 = vector.broadcast %cst_88 : f32 to vector<8x128xf32>
    %472 = arith.addf %471, %470 : vector<8x128xf32>
    %473 = arith.divf %471, %472 : vector<8x128xf32>
    %474 = vector.extract_strided_slice %465 {offsets = [0, 128], sizes = [8, 128], strides = [1, 1]} : vector<8x384xf32> to vector<8x128xf32>
    %475 = vector.extract_strided_slice %464 {offsets = [0, 128], sizes = [8, 128], strides = [1, 1]} : vector<8x384xf32> to vector<8x128xf32>
    %476 = arith.addf %474, %475 : vector<8x128xf32>
    %477 = arith.negf %476 : vector<8x128xf32>
    %478 = math.exp %477 : vector<8x128xf32>
    %cst_89 = arith.constant 1.000000e+00 : f32
    %479 = vector.broadcast %cst_89 : f32 to vector<8x128xf32>
    %480 = arith.addf %479, %478 : vector<8x128xf32>
    %481 = arith.divf %479, %480 : vector<8x128xf32>
    %482 = vector.extract_strided_slice %465 {offsets = [0, 256], sizes = [8, 128], strides = [1, 1]} : vector<8x384xf32> to vector<8x128xf32>
    %483 = vector.extract_strided_slice %464 {offsets = [0, 256], sizes = [8, 128], strides = [1, 1]} : vector<8x384xf32> to vector<8x128xf32>
    %484 = arith.mulf %473, %483 : vector<8x128xf32>
    %485 = arith.addf %482, %484 : vector<8x128xf32>
    %486 = math.tanh %485 : vector<8x128xf32>
    %cst_90 = arith.constant 1.000000e+00 : f32
    %487 = vector.broadcast %cst_90 : f32 to vector<8x128xf32>
    %488 = arith.subf %487, %481 : vector<8x128xf32>
    %489 = arith.mulf %488, %486 : vector<8x128xf32>
    %490 = arith.mulf %481, %460 : vector<8x128xf32>
    %491 = arith.addf %489, %490 : vector<8x128xf32>
    %492 = arith.truncf %491 : vector<8x128xf32> to vector<8x128xbf16>
    %cst_91 = arith.constant dense<0.000000e+00> : vector<8x384xf32>
    %493 = tpu.matmul %492, %272, %cst_91 {dimension_numbers = #tpu.dot_dimension_numbers<[1], [0], [0], [1], [0, 0, 1, 1], [], []>} : vector<8x128xbf16>, vector<128x384xbf16>, vector<8x384xf32> -> vector<8x384xf32>
    %494 = vector.broadcast %273 : vector<1x384xf32> to vector<8x384xf32>
    %495 = arith.addf %493, %494 : vector<8x384xf32>
    %496 = vector.extract_strided_slice %271 {offsets = [56, 0], sizes = [8, 384], strides = [1, 1]} : vector<64x384xf32> to vector<8x384xf32>
    %497 = vector.extract_strided_slice %496 {offsets = [0, 0], sizes = [8, 128], strides = [1, 1]} : vector<8x384xf32> to vector<8x128xf32>
    %498 = vector.extract_strided_slice %495 {offsets = [0, 0], sizes = [8, 128], strides = [1, 1]} : vector<8x384xf32> to vector<8x128xf32>
    %499 = arith.addf %497, %498 : vector<8x128xf32>
    %500 = arith.negf %499 : vector<8x128xf32>
    %501 = math.exp %500 : vector<8x128xf32>
    %cst_92 = arith.constant 1.000000e+00 : f32
    %502 = vector.broadcast %cst_92 : f32 to vector<8x128xf32>
    %503 = arith.addf %502, %501 : vector<8x128xf32>
    %504 = arith.divf %502, %503 : vector<8x128xf32>
    %505 = vector.extract_strided_slice %496 {offsets = [0, 128], sizes = [8, 128], strides = [1, 1]} : vector<8x384xf32> to vector<8x128xf32>
    %506 = vector.extract_strided_slice %495 {offsets = [0, 128], sizes = [8, 128], strides = [1, 1]} : vector<8x384xf32> to vector<8x128xf32>
    %507 = arith.addf %505, %506 : vector<8x128xf32>
    %508 = arith.negf %507 : vector<8x128xf32>
    %509 = math.exp %508 : vector<8x128xf32>
    %cst_93 = arith.constant 1.000000e+00 : f32
    %510 = vector.broadcast %cst_93 : f32 to vector<8x128xf32>
    %511 = arith.addf %510, %509 : vector<8x128xf32>
    %512 = arith.divf %510, %511 : vector<8x128xf32>
    %513 = vector.extract_strided_slice %496 {offsets = [0, 256], sizes = [8, 128], strides = [1, 1]} : vector<8x384xf32> to vector<8x128xf32>
    %514 = vector.extract_strided_slice %495 {offsets = [0, 256], sizes = [8, 128], strides = [1, 1]} : vector<8x384xf32> to vector<8x128xf32>
    %515 = arith.mulf %504, %514 : vector<8x128xf32>
    %516 = arith.addf %513, %515 : vector<8x128xf32>
    %517 = math.tanh %516 : vector<8x128xf32>
    %cst_94 = arith.constant 1.000000e+00 : f32
    %518 = vector.broadcast %cst_94 : f32 to vector<8x128xf32>
    %519 = arith.subf %518, %512 : vector<8x128xf32>
    %520 = arith.mulf %519, %517 : vector<8x128xf32>
    %521 = arith.mulf %512, %491 : vector<8x128xf32>
    %522 = arith.addf %520, %521 : vector<8x128xf32>
    %c0_95 = arith.constant 0 : index
    %c0_96 = arith.constant 0 : index
    %523 = vector.load %arg9[%c0_95, %c0_96] : memref<128x128xf32, #tpu.memory_space<vmem>>, vector<128x128xf32>
    %cst_97 = arith.constant dense<0.000000e+00> : vector<8x128xf32>
    %524 = tpu.matmul %522, %523, %cst_97 {dimension_numbers = #tpu.dot_dimension_numbers<[1], [0], [0], [1], [0, 0, 1, 1], [], []>} : vector<8x128xf32>, vector<128x128xf32>, vector<8x128xf32> -> vector<8x128xf32>
    %c0_98 = arith.constant 0 : index
    %c0_99 = arith.constant 0 : index
    %525 = vector.load %arg10[%c0_98, %c0_99] : memref<1x128xf32, #tpu.memory_space<vmem>>, vector<1x128xf32>
    %526 = vector.broadcast %525 : vector<1x128xf32> to vector<8x128xf32>
    %527 = arith.addf %524, %526 : vector<8x128xf32>
    %528 = arith.negf %527 : vector<8x128xf32>
    %529 = math.exp %528 : vector<8x128xf32>
    %cst_100 = arith.constant 1.000000e+00 : f32
    %530 = vector.broadcast %cst_100 : f32 to vector<8x128xf32>
    %531 = arith.addf %530, %529 : vector<8x128xf32>
    %532 = arith.divf %530, %531 : vector<8x128xf32>
    %c0_101 = arith.constant 0 : index
    %c0_102 = arith.constant 0 : index
    %533 = vector.load %arg11[%c0_101, %c0_102] : memref<8x128xf32, #tpu.memory_space<vmem>>, vector<8x128xf32>
    tpu.vector_store %arg11[%c0_101, %c0_102], %532 {strides = array<i32>} : memref<8x128xf32, #tpu.memory_space<vmem>>, vector<8x128xf32>,
    return
  }
}

</mosaic_0001>

<bundles_post_ra>
// kernel: discriminator_pallas.1
= control target key start
LH: loop header
LB: loop body
LE: loop exit
PB: predicated region body
PF: predicated region fallthrough
CT: control target
= control target key end

     0   :  { %s4665_s1 = inlined_call_operand.vmem [shape: bf16[128,384], index: 1, kind: input, shape index: {}]   ;;  %s4666_s2 = inlined_call_operand.vmem [shape: bf16[128,384], index: 2, kind: input, shape index: {}]   ;;  %s4667_s0 = inlined_call_operand.vmem [shape: bf16[64,128], index: 0, kind: input, shape index: {}]   ;;  %s4668_s4 = inlined_call_operand.vmem [shape: f32[1,384], index: 4, kind: input, shape index: {}]   ;;  %s4669_s3 = inlined_call_operand.vmem [shape: f32[1,384], index: 3, kind: input, shape index: {}]   ;;  %s4670_s5 = inlined_call_operand.vmem [shape: bf16[128,384], index: 5, kind: input, shape index: {}]   ;;  %s4671_s6 = inlined_call_operand.vmem [shape: bf16[128,384], index: 6, kind: input, shape index: {}]   ;;  %s4672_s8 = inlined_call_operand.vmem [shape: f32[1,384], index: 8, kind: input, shape index: {}]   ;;  %s4673_s7 = inlined_call_operand.vmem [shape: f32[1,384], index: 7, kind: input, shape index: {}]   ;;  %s4674_s10 = inlined_call_operand.vmem [shape: f32[1,128], index: 10, kind: input, shape index: {}]   ;;  %s4675_s9 = inlined_call_operand.vmem [shape: f32[128,128], index: 9, kind: input, shape index: {}]   ;;  %s4676_s11 = inlined_call_operand.vmem [shape: f32[8,128], index: 11, kind: output, shape index: {}]  }
   0x1   :  { %v2493_v0 = vld [vmem:[%s4665_s1 + $0xa8] sm:$0xf]  ;;  %v2850_v1 = vld [vmem:[%s4665_s1 + $0xb0] sm:$0xf0]  ;;  %v2481_v5 = vld [vmem:[%s4665_s1 + $0x90] sm:$0xf] }
   0x2   :  { %v2589_v2 = vld [vmem:[%s4666_s2 + $0xa8] sm:$0xf]  ;;  %v2494_v3 = vor.u32 %v2850_v1, %v2493_v0  ;;  %v2874_v4 = vld [vmem:[%s4666_s2 + $0xb0] sm:$0xf0]  ;;  %v2847_v6 = vld [vmem:[%s4665_s1 + $0x98] sm:$0xf0] }
   0x3   :  { %v3169_v7 = vor.u32 %v2874_v4, %v2589_v2  ;;  %v2577_v8 = vld [vmem:[%s4666_s2 + $0x90] sm:$0xf]  ;;  %v2871_v9 = vld [vmem:[%s4666_s2 + $0x98] sm:$0xf0]  ;;  %v2482_v10 = vor.u32 %v2847_v6, %v2481_v5  ;;  %v2469_v12 = vld [vmem:[%s4665_s1 + $0x78] sm:$0xf] }
   0x4   :  { %239 = vmatpush.bf16.msra.mxu0 %v2494_v3  ;;  %v3178_v11 = vor.u32 %v2871_v9, %v2577_v8  ;;  %v2844_v13 = vld [vmem:[%s4665_s1 + $0x80] sm:$0xf0]  ;;  %v2565_v14 = vld [vmem:[%s4666_s2 + $0x78] sm:$0xf]  ;;  %v2457_v18 = vld [vmem:[%s4665_s1 + $0x60] sm:$0xf] }
   0x5   :  { %494 = vmatpush.bf16.msra.mxu3 %v3169_v7  ;;  %v2868_v15 = vld [vmem:[%s4666_s2 + $0x80] sm:$0xf0]  ;;  %v2470_v16 = vor.u32 %v2844_v13, %v2469_v12  ;;  %v2841_v19 = vld [vmem:[%s4665_s1 + $0x68] sm:$0xf0]  ;;  %v2553_v20 = vld [vmem:[%s4666_s2 + $0x60] sm:$0xf] }
   0x6   :  { %v3193_v17 = vor.u32 %v2868_v15, %v2565_v14  ;;  %v2865_v21 = vld [vmem:[%s4666_s2 + $0x68] sm:$0xf0]  ;;  %v2458_v22 = vor.u32 %v2841_v19, %v2457_v18  ;;  %v2445_v24 = vld [vmem:[%s4665_s1 + $0x48] sm:$0xf]  ;;  %v2838_v25 = vld [vmem:[%s4665_s1 + $0x50] sm:$0xf0] }
   0x7   :  { %v3208_v23 = vor.u32 %v2865_v21, %v2553_v20  ;;  %v2541_v26 = vld [vmem:[%s4666_s2 + $0x48] sm:$0xf]  ;;  %v2862_v27 = vld [vmem:[%s4666_s2 + $0x50] sm:$0xf0]  ;;  %v2849_v28 = vld [vmem:[%s4665_s1 + $0xac] sm:$0xf]  ;;  %v2446_v33 = vor.u32 %v2838_v25, %v2445_v24 }
   0x8   :  { %240 = vmatpush.bf16.msra.mxu0 %v2482_v10  ;;  %v2495_v29 = vld [vmem:[%s4665_s1 + $0xb4] sm:$0xf0]  ;;  %v2846_v31 = vld [vmem:[%s4665_s1 + $0x94] sm:$0xf]  ;;  %v2483_v32 = vld [vmem:[%s4665_s1 + $0x9c] sm:$0xf0]  ;;  %v3235_v34 = vor.u32 %v2862_v27, %v2541_v26 }
   0x9   :  { %495 = vmatpush.bf16.msra.mxu3 %v3178_v11  ;;  %v2498_v30 = vor.u32 %v2849_v28, %v2495_v29  ;;  %v2433_v35 = vld [vmem:[%s4665_s1 + $0x30] sm:$0xf]  ;;  %v2835_v36 = vld [vmem:[%s4665_s1 + $0x38] sm:$0xf0]  ;;  %v2486_v38 = vor.u32 %v2846_v31, %v2483_v32  ;;  %v2471_v41 = vld [vmem:[%s4665_s1 + $0x84] sm:$0xf0] }
   0xa   :  { %v2529_v37 = vld [vmem:[%s4666_s2 + $0x30] sm:$0xf]  ;;  %v2859_v39 = vld [vmem:[%s4666_s2 + $0x38] sm:$0xf0]  ;;  %v2434_v42 = vor.u32 %v2835_v36, %v2433_v35  ;;  %v2421_v43 = vld [vmem:[%s4665_s1 + $0x18] sm:$0xf] }
   0xb   :  { %268 = vmatpush.bf16.msra.mxu1 %v2498_v30  ;;  %v2843_v40 = vld [vmem:[%s4665_s1 + $0x7c] sm:$0xf]  ;;  %v2832_v44 = vld [vmem:[%s4665_s1 + $0x20] sm:$0xf0]  ;;  %v3262_v45 = vor.u32 %v2859_v39, %v2529_v37  ;;  %v2517_v46 = vld [vmem:[%s4666_s2 + $0x18] sm:$0xf] }
   0xc   :  { %241 = vmatpush.bf16.msra.mxu0 %v2470_v16  ;;  %v2856_v47 = vld [vmem:[%s4666_s2 + $0x20] sm:$0xf0]  ;;  %v2474_v48 = vor.u32 %v2843_v40, %v2471_v41  ;;  %v2459_v50 = vld [vmem:[%s4665_s1 + $0x6c] sm:$0xf0]  ;;  %v2851_v52 = vld [vmem:[%s4665_s1 + $0xb8] sm:$0xf0]  ;;  %v2422_v54 = vor.u32 %v2832_v44, %v2421_v43 }
   0xd   :  { %496 = vmatpush.bf16.msra.mxu3 %v3193_v17  ;;  %v2840_v49 = vld [vmem:[%s4665_s1 + $0x64] sm:$0xf]  ;;  %v2501_v51 = vld [vmem:[%s4665_s1 + $0xb0] sm:$0xf]  ;;  %v2409_v55 = vld [vmem:[%s4665_s1] sm:$0xf]  ;;  %v3292_v58 = vor.u32 %v2856_v47, %v2517_v46 }
   0xe   :  { %v2502_v53 = vor.u32 %v2851_v52, %v2501_v51  ;;  %v2829_v56 = vld [vmem:[%s4665_s1 + $0x8] sm:$0xf0]  ;;  %v2505_v57 = vld [vmem:[%s4666_s2] sm:$0xf]  ;;  %v2591_v61 = vld [vmem:[%s4666_s2 + $0xb4] sm:$0xf0]  ;;  %v2462_v62 = vor.u32 %v2840_v49, %v2459_v50 }
   0xf   :  { %269 = vmatpush.bf16.msra.mxu1 %v2486_v38  ;;  %v2853_v59 = vld [vmem:[%s4666_s2 + $0x8] sm:$0xf0]  ;;  %v2597_v63 = vld [vmem:[%s4666_s2 + $0xb0] sm:$0xf]  ;;  %v2875_v0 = vld [vmem:[%s4666_s2 + $0xb8] sm:$0xf0]  ;;  %v2410_v5 = vor.u32 %v2829_v56, %v2409_v55 }
  0x10   :  { %242 = vmatpush.bf16.msra.mxu0 %v2458_v22  ;;  %v2873_v60 = vld [vmem:[%s4666_s2 + $0xac] sm:$0xf]  ;;  %297 = vmatpush.bf16.msra.mxu2 %v2502_v53  ;;  %v2489_v1 = vld [vmem:[%s4665_s1 + $0x98] sm:$0xf]  ;;  %v2848_v4 = vld [vmem:[%s4665_s1 + $0xa0] sm:$0xf0]  ;;  %v3322_v8 = vor.u32 %v2853_v59, %v2505_v57  ;;  %v3329_v10 = vor.u32 %v2875_v0, %v2597_v63 }
  0x11   :  { %497 = vmatpush.bf16.msra.mxu3 %v3208_v23  ;;  %v2837_v2 = vld [vmem:[%s4665_s1 + $0x4c] sm:$0xf]  ;;  %v2447_v3 = vld [vmem:[%s4665_s1 + $0x54] sm:$0xf0]  ;;  %v2490_v6 = vor.u32 %v2848_v4, %v2489_v1  ;;  %v3327_v9 = vld [vmem:[%s4667_s0] sm:$0xff]  ;;  %v3337_v14 = vor.u32 %v2873_v60, %v2591_v61  ;;  %v4677_v38 = vmov 0  }
  0x12   :  { %v2870_v12 = vld [vmem:[%s4666_s2 + $0x94] sm:$0xf]  ;;  %v2585_v13 = vld [vmem:[%s4666_s2 + $0x98] sm:$0xf]  ;;  %v2872_v15 = vld [vmem:[%s4666_s2 + $0xa0] sm:$0xf0]  ;;  %v2450_v16 = vor.u32 %v2837_v2, %v2447_v3 }
  0x13   :  { %270 = vmatpush.bf16.msra.mxu1 %v2474_v48  ;;  %v2477_v18 = vld [vmem:[%s4665_s1 + $0x80] sm:$0xf]  ;;  %v2845_v19 = vld [vmem:[%s4665_s1 + $0x88] sm:$0xf0]  ;;  %v2834_v21 = vld [vmem:[%s4665_s1 + $0x34] sm:$0xf]  ;;  %v3362_v26 = vor.u32 %v2872_v15, %v2585_v13 }
  0x14   :  { %243 = vmatpush.bf16.msra.mxu0 %v2446_v33  ;;  %298 = vmatpush.bf16.msra.mxu2 %v2490_v6  ;;  %v2579_v20 = vld [vmem:[%s4666_s2 + $0x9c] sm:$0xf0]  ;;  %v2478_v24 = vor.u32 %v2845_v19, %v2477_v18  ;;  %v2867_v25 = vld [vmem:[%s4666_s2 + $0x7c] sm:$0xf]  ;;  %v2869_v29 = vld [vmem:[%s4666_s2 + $0x88] sm:$0xf0] }
  0x15   :  { %498 = vmatpush.bf16.msra.mxu3 %v3235_v34  ;;  %v2435_v22 = vld [vmem:[%s4665_s1 + $0x3c] sm:$0xf0]  ;;  %v3368_v28 = vor.u32 %v2870_v12, %v2579_v20  ;;  %v2465_v31 = vld [vmem:[%s4665_s1 + $0x68] sm:$0xf]  ;;  %v2842_v32 = vld [vmem:[%s4665_s1 + $0x70] sm:$0xf0] }
  0x16   :  { %v2573_v27 = vld [vmem:[%s4666_s2 + $0x80] sm:$0xf]  ;;  %v2438_v30 = vor.u32 %v2834_v21, %v2435_v22  ;;  %v2567_v33 = vld [vmem:[%s4666_s2 + $0x84] sm:$0xf0]  ;;  %v2831_v35 = vld [vmem:[%s4665_s1 + $0x1c] sm:$0xf]  ;;  %v2466_v37 = vor.u32 %v2842_v32, %v2465_v31 }
  0x17   :  { %271 = vmatpush.bf16.msra.mxu1 %v2462_v62  ;;  %v2423_v36 = vld [vmem:[%s4665_s1 + $0x24] sm:$0xf0]  ;;  %v2453_v39 = vld [vmem:[%s4665_s1 + $0x50] sm:$0xf]  ;;  %v2839_v40 = vld [vmem:[%s4665_s1 + $0x58] sm:$0xf0]  ;;  %v3397_v41 = vor.u32 %v2869_v29, %v2573_v27 }
  0x18   :  { %244 = vmatpush.bf16.msra.mxu0 %v2434_v42  ;;  %299 = vmatpush.bf16.msra.mxu2 %v2478_v24  ;;  %v3400_v42 = vor.u32 %v2867_v25, %v2567_v33  ;;  %v2864_v43 = vld [vmem:[%s4666_s2 + $0x64] sm:$0xf]  ;;  %v2561_v44 = vld [vmem:[%s4666_s2 + $0x68] sm:$0xf]  ;;  %v2866_v46 = vld [vmem:[%s4666_s2 + $0x70] sm:$0xf0]  ;;  %v2426_v47 = vor.u32 %v2831_v35, %v2423_v36  ;;  %v2454_v51 = vor.u32 %v2839_v40, %v2453_v39 }
  0x19   :  { %499 = vmatpush.bf16.msra.mxu3 %v3262_v45  ;;  %v2555_v48 = vld [vmem:[%s4666_s2 + $0x6c] sm:$0xf0]  ;;  %v2828_v49 = vld [vmem:[%s4665_s1 + $0x4] sm:$0xf]  ;;  %v2441_v52 = vld [vmem:[%s4665_s1 + $0x38] sm:$0xf] }
  0x1a   :  { %v2411_v50 = vld [vmem:[%s4665_s1 + $0xc] sm:$0xf0]  ;;  %v2836_v53 = vld [vmem:[%s4665_s1 + $0x40] sm:$0xf0]  ;;  %v3430_v55 = vor.u32 %v2864_v43, %v2555_v48  ;;  %v2863_v59 = vld [vmem:[%s4666_s2 + $0x58] sm:$0xf0] }
  0x1b   :  { %272 = vmatpush.bf16.msra.mxu1 %v2450_v16  ;;  %v2414_v56 = vor.u32 %v2828_v49, %v2411_v50  ;;  %v2549_v57 = vld [vmem:[%s4666_s2 + $0x50] sm:$0xf]  ;;  %v2861_v60 = vld [vmem:[%s4666_s2 + $0x4c] sm:$0xf]  ;;  %v2543_v61 = vld [vmem:[%s4666_s2 + $0x54] sm:$0xf0]  ;;  %v2442_v62 = vor.u32 %v2836_v53, %v2441_v52 }
  0x1c   :  { %245 = vmatpush.bf16.msra.mxu0 %v2422_v54  ;;  %300 = vmatpush.bf16.msra.mxu2 %v2466_v37  ;;  %v3427_v54 = vor.u32 %v2866_v46, %v2561_v44  ;;  %v2429_v63 = vld [vmem:[%s4665_s1 + $0x20] sm:$0xf]  ;;  %v2833_v0 = vld [vmem:[%s4665_s1 + $0x28] sm:$0xf0]  ;;  %v3451_v1 = vor.u32 %v2863_v59, %v2549_v57  ;;  %v3454_v2 = vor.u32 %v2861_v60, %v2543_v61  ;;  %v2537_v3 = vld [vmem:[%s4666_s2 + $0x38] sm:$0xf] }
  0x1d   :  { %500 = vmatpush.bf16.msra.mxu3 %v3292_v58  ;;  %v2860_v4 = vld [vmem:[%s4666_s2 + $0x40] sm:$0xf0]  ;;  %v2858_v6 = vld [vmem:[%s4666_s2 + $0x34] sm:$0xf]  ;;  %v2531_v12 = vld [vmem:[%s4666_s2 + $0x3c] sm:$0xf0]  ;;  %v2430_v13 = vor.u32 %v2833_v0, %v2429_v63 }
  0x1e   :  { %v3474_v15 = vor.u32 %v2860_v4, %v2537_v3  ;;  %v3477_v16 = vor.u32 %v2858_v6, %v2531_v12  ;;  %v2855_v18 = vld [vmem:[%s4666_s2 + $0x1c] sm:$0xf]  ;;  %v2417_v19 = vld [vmem:[%s4665_s1 + $0x8] sm:$0xf]  ;;  %v2830_v20 = vld [vmem:[%s4665_s1 + $0x10] sm:$0xf0] }
  0x1f   :  { %273 = vmatpush.bf16.msra.mxu1 %v2438_v30  ;;  %v2519_v21 = vld [vmem:[%s4666_s2 + $0x24] sm:$0xf0]  ;;  %v2525_v22 = vld [vmem:[%s4666_s2 + $0x20] sm:$0xf]  ;;  %v2857_v24 = vld [vmem:[%s4666_s2 + $0x28] sm:$0xf0]  ;;  %v2418_v25 = vor.u32 %v2830_v20, %v2417_v19 }
  0x20   :  { %246 = vmatpush.bf16.msra.mxu0 %v2410_v5  ;;  %301 = vmatpush.bf16.msra.mxu2 %v2454_v51  ;;  %v2825_v5 = vld [vmem:[%s4667_s0 + $0x8] sm:$0xff]  ;;  %v3499_v27 = vor.u32 %v2857_v24, %v2525_v22  ;;  %v3502_v29 = vor.u32 %v2855_v18, %v2519_v21  ;;  %v2854_v31 = vld [vmem:[%s4666_s2 + $0x10] sm:$0xf0]  ;;  %v2852_v32 = vld [vmem:[%s4666_s2 + $0x4] sm:$0xf] }
  0x21   :  { %501 = vmatpush.bf16.msra.mxu3 %v3322_v8  ;;  %v2513_v30 = vld [vmem:[%s4666_s2 + $0x8] sm:$0xf]  ;;  %v2507_v33 = vld [vmem:[%s4666_s2 + $0xc] sm:$0xf0]  ;;  %v358_v40 = vld [vmem:[%s4668_s4] sm:$0x7] }
  0x22   :  { %v3519_v35 = vor.u32 %v2854_v31, %v2513_v30  ;;  %v3522_v36 = vor.u32 %v2852_v32, %v2507_v33  ;;  %v2826_v37 = vld [vmem:[%s4667_s0 + $0x10] sm:$0xff]  ;;  %v79_v44 = vld [vmem:[%s4669_s3] sm:$0x7]  ;;  %v3619_v3 = vperm.slane %v358_v40, 1 }
  0x23   :  { %247 = vmatmul.bf16.vlgmr.msra.gmra.mxu0 %v3327_v9  ;;  %274 = vmatpush.bf16.msra.mxu1 %v2426_v47  ;;  %v3603_v47 = vperm.slane %v358_v40, 0  ;;  %v3605_v48 = vperm.slane %v79_v44, 0  ;;  %v3614_v61 = vperm.slane %v79_v44, 1 }
  0x24   :  { %520 = vmatpush.bf16.msrb.mxu0 %v3329_v10  ;;  %502 = vmatmul.bf16.vlgmr.msra.gmra.mxu3 %v4677_v38 }
  0x25   :  { %507 = vmatpush.bf16.msrb.mxu3 %v3337_v14  ;;  %302 = vmatpush.bf16.msra.mxu2 %v2442_v62 }
  0x27   :  { %275 = vmatpush.bf16.msra.mxu1 %v2414_v56 }
  0x28   :  { %521 = vmatpush.bf16.msrb.mxu0 %v3362_v26 }
  0x29   :  { %508 = vmatpush.bf16.msrb.mxu3 %v3368_v28  ;;  %303 = vmatpush.bf16.msra.mxu2 %v2430_v13 }
  0x2a   :  { %276 = vmatmul.bf16.vlgmr.msra.gmra.mxu1 %v3327_v9 }
  0x2b   :  { %582 = vmatpush.bf16.msrb.mxu1 %v3169_v7 }
  0x2c   :  { %522 = vmatpush.bf16.msrb.mxu0 %v3397_v41 }
  0x2d   :  { %509 = vmatpush.bf16.msrb.mxu3 %v3400_v42  ;;  %304 = vmatpush.bf16.msra.mxu2 %v2418_v25 }
  0x2f   :  { %583 = vmatpush.bf16.msrb.mxu1 %v3178_v11 }
  0x30   :  { %523 = vmatpush.bf16.msrb.mxu0 %v3427_v54  ;;  %305 = vmatmul.bf16.vlgmr.msra.gmra.mxu2 %v3327_v9  ;;  %v2827_v9 = vld [vmem:[%s4667_s0 + $0x18] sm:$0xff] }
  0x31   :  { %510 = vmatpush.bf16.msrb.mxu3 %v3430_v55  ;;  %595 = vmatpush.bf16.msrb.mxu2 %v3337_v14 }
  0x33   :  { %252 = vmatmul.bf16.gmra.mxu0 %v2825_v5  ;;  %584 = vmatpush.bf16.msrb.mxu1 %v3193_v17 }
  0x34   :  { %524 = vmatpush.bf16.msrb.mxu0 %v3451_v1 }
  0x35   :  { %511 = vmatpush.bf16.msrb.mxu3 %v3454_v2  ;;  %596 = vmatpush.bf16.msrb.mxu2 %v3368_v28 }
  0x37   :  { %585 = vmatpush.bf16.msrb.mxu1 %v3208_v23 }
  0x38   :  { %525 = vmatpush.bf16.msrb.mxu0 %v3474_v15 }
  0x39   :  { %512 = vmatpush.bf16.msrb.mxu3 %v3477_v16  ;;  %597 = vmatpush.bf16.msrb.mxu2 %v3400_v42 }
  0x3a   :  { %281 = vmatmul.bf16.gmra.mxu1 %v2825_v5 }
  0x3b   :  { %586 = vmatpush.bf16.msrb.mxu1 %v3235_v34 }
  0x3c   :  { %526 = vmatpush.bf16.msrb.mxu0 %v3499_v27 }
  0x3d   :  { %513 = vmatpush.bf16.msrb.mxu3 %v3502_v29  ;;  %598 = vmatpush.bf16.msrb.mxu2 %v3430_v55 }
  0x3f   :  { %587 = vmatpush.bf16.msrb.mxu1 %v3262_v45 }
  0x40   :  { %527 = vmatpush.bf16.msrb.mxu0 %v3519_v35  ;;  %310 = vmatmul.bf16.gmra.mxu2 %v2825_v5 }
  0x41   :  { %514 = vmatpush.bf16.msrb.mxu3 %v3522_v36  ;;  %599 = vmatpush.bf16.msrb.mxu2 %v3454_v2 }
  0x43   :  { %257 = vmatmul.bf16.gmra.mxu0 %v2826_v37  ;;  %588 = vmatpush.bf16.msrb.mxu1 %v3292_v58 }
  0x44   :  { %670 = vmatpush.bf16.msra.mxu0 %v3169_v7  ;;  %515 = vmatmul.bf16.vlgmr.msrb.gmra.mxu3 %v4677_v38 }
  0x45   :  { %608 = vmatpush.bf16.msra.mxu3 %v3329_v10  ;;  %600 = vmatpush.bf16.msrb.mxu2 %v3477_v16 }
  0x47   :  { %589 = vmatpush.bf16.msrb.mxu1 %v3322_v8 }
  0x48   :  { %671 = vmatpush.bf16.msra.mxu0 %v3178_v11 }
  0x49   :  { %609 = vmatpush.bf16.msra.mxu3 %v3362_v26  ;;  %601 = vmatpush.bf16.msrb.mxu2 %v3502_v29 }
  0x4a   :  { %286 = vmatmul.bf16.gmra.mxu1 %v2826_v37 }
  0x4b   :  { %683 = vmatpush.bf16.msra.mxu1 %v3337_v14 }
  0x4c   :  { %672 = vmatpush.bf16.msra.mxu0 %v3193_v17 }
  0x4d   :  { %610 = vmatpush.bf16.msra.mxu3 %v3397_v41  ;;  %602 = vmatpush.bf16.msrb.mxu2 %v3522_v36 }
  0x4f   :  { %684 = vmatpush.bf16.msra.mxu1 %v3368_v28 }
  0x50   :  { %673 = vmatpush.bf16.msra.mxu0 %v3208_v23  ;;  %315 = vmatmul.bf16.gmra.mxu2 %v2826_v37 }
  0x51   :  { %611 = vmatpush.bf16.msra.mxu3 %v3427_v54  ;;  %696 = vmatpush.bf16.msra.mxu2 %v3329_v10 }
  0x53   :  { %262 = vmatmul.bf16.gmra.mxu0 %v2827_v9  ;;  %685 = vmatpush.bf16.msra.mxu1 %v3400_v42 }
  0x54   :  { %674 = vmatpush.bf16.msra.mxu0 %v3235_v34 }
  0x55   :  { %612 = vmatpush.bf16.msra.mxu3 %v3451_v1  ;;  %697 = vmatpush.bf16.msra.mxu2 %v3362_v26 }
  0x57   :  { %686 = vmatpush.bf16.msra.mxu1 %v3430_v55 }
  0x58   :  { %675 = vmatpush.bf16.msra.mxu0 %v3262_v45 }
  0x59   :  { %613 = vmatpush.bf16.msra.mxu3 %v3474_v15  ;;  %698 = vmatpush.bf16.msra.mxu2 %v3397_v41 }
  0x5a   :  { %291 = vmatmul.bf16.gmra.mxu1 %v2827_v9 }
  0x5b   :  { %687 = vmatpush.bf16.msra.mxu1 %v3454_v2 }
  0x5c   :  { %676 = vmatpush.bf16.msra.mxu0 %v3292_v58 }
  0x5d   :  { %614 = vmatpush.bf16.msra.mxu3 %v3499_v27  ;;  %699 = vmatpush.bf16.msra.mxu2 %v3427_v54 }
  0x5f   :  { %688 = vmatpush.bf16.msra.mxu1 %v3477_v16 }
  0x60   :  { %677 = vmatpush.bf16.msra.mxu0 %v3322_v8  ;;  %320 = vmatmul.bf16.gmra.mxu2 %v2827_v9  ;;  %v3630_v9 = vperm.slane %v79_v44, 2 }
  0x61   :  { %615 = vmatpush.bf16.msra.mxu3 %v3519_v35  ;;  %700 = vmatpush.bf16.msra.mxu2 %v3451_v1 }
  0x63   :  { %528 = vmatmul.bf16.vlgmr.msrb.gmra.mxu0 %v4677_v38  ;;  %689 = vmatpush.bf16.msra.mxu1 %v3502_v29 }
  0x64   :  { %771 = vmatpush.bf16.msrb.mxu0 %v3337_v14 }
  0x65   :  { %758 = vmatpush.bf16.msrb.mxu3 %v3169_v7  ;;  %701 = vmatpush.bf16.msra.mxu2 %v3474_v15 }
  0x67   :  { %690 = vmatpush.bf16.msra.mxu1 %v3522_v36 }
  0x68   :  { %772 = vmatpush.bf16.msrb.mxu0 %v3368_v28 }
  0x69   :  { %759 = vmatpush.bf16.msrb.mxu3 %v3178_v11  ;;  %702 = vmatpush.bf16.msra.mxu2 %v3499_v27 }
  0x6c   :  { %773 = vmatpush.bf16.msrb.mxu0 %v3400_v42 }
  0x6d   :  { %760 = vmatpush.bf16.msrb.mxu3 %v3193_v17  ;;  %703 = vmatpush.bf16.msra.mxu2 %v3519_v35 }
  0x70   :  { %774 = vmatpush.bf16.msrb.mxu0 %v3430_v55 }
  0x71   :  { %761 = vmatpush.bf16.msrb.mxu3 %v3208_v23 }
  0x74   :  { %775 = vmatpush.bf16.msrb.mxu0 %v3454_v2 }
  0x75   :  { %762 = vmatpush.bf16.msrb.mxu3 %v3235_v34 }
  0x78   :  { %776 = vmatpush.bf16.msrb.mxu0 %v3477_v16 }
  0x79   :  { %763 = vmatpush.bf16.msrb.mxu3 %v3262_v45 }
  0x7c   :  { %777 = vmatpush.bf16.msrb.mxu0 %v3502_v29 }
  0x7d   :  { %764 = vmatpush.bf16.msrb.mxu3 %v3292_v58 }
  0x80   :  { %778 = vmatpush.bf16.msrb.mxu0 %v3522_v36 }
  0x81   :  { %765 = vmatpush.bf16.msrb.mxu3 %v3322_v8 }
  0xa0   :  { %v248_v39 = vpop.f32.mrf.mxu0 }
  0xa1   :  { %v249_v50 = vadd.f32 %v248_v39, %v3605_v48 }
  0xa7   :  { %v503_v43 = vpop.f32.mrf.mxu3  ;;  %v277_v63 = vpop.f32.mrf.mxu1 }
  0xa8   :  { %v3601_v46 = vpop.f32.mrf.mxu0  ;;  %v504_v49 = vadd.f32 %v503_v43, %v3603_v47  ;;  %v278_v5 = vadd.f32 %v277_v63, %v3614_v61 }
  0xaa   :  { %v533_v53 = vadd.f32 %v504_v49, %v249_v50 }
  0xac   :  { %v2599_v57 = vmul.f32 -1.442695, %v533_v53 }
  0xae   :  { %2926 = vpow2.f32 %v2599_v57 }
  0xaf   :  { %v505_v51 = vpop.f32.mrf.mxu3 }
  0xb0   :  { %v253_v52 = vpop.f32.mrf.mxu0 }
  0xb1   :  { %v3610_v56 = vadd.f32 %v253_v52, %v3605_v48 }
  0xb3   :  { %v306_v6 = vpop.f32.mrf.mxu2 }
  0xb4   :  { %v2927_v60 = vpop.eup %2926 }
  0xb5   :  { %v537_v4 = vadd.f32 1.0, %v2927_v60 }
  0xb7   :  { %2928 = vrcp.f32 %v537_v4  ;;  %v549_v57 = vand.u32 2147483648, %v537_v4  ;;  %vm543_vm1 = vweird.f32 %v537_v4  ;;  %v547_v63 = vand.u32 2147483647, %v537_v4 }
  0xb8   :  { %v3612_v59 = vpop.f32.mrf.mxu0 }
  0xb9   :  { %vm548_vm3 = vcmp.eq.f32.partialorder %v547_v63, 8.507059e+37 }
  0xbb   :  { %v3625_v24 = vpop.f32.mrf.mxu2 }
  0xbd   :  { %v2929_v21 = vpop.eup %2928 }
  0xbe   :  { %v539_v25 = vmul.f32 %v2929_v21, %v537_v4  ;;  %vm544_vm0 = vweird.f32 %v2929_v21 }
  0xbf   :  { %vm545_vm2 = vmor %vm543_vm1, %vm544_vm0 }
  0xc0   :  { %v258_v62 = vpop.f32.mrf.mxu0  ;;  %v540_v37 = vsub.f32 1.0, %v539_v25 }
  0xc1   :  { %v3617_v0 = vadd.f32 %v258_v62, %v3605_v48  ;;  %v3637_v62 = vperm.slane %v358_v40, 2 }
  0xc2   :  { %v541_v49 = vmul.f32 %v2929_v21, %v540_v37 }
  0xc3   :  { %v311_v39 = vpop.f32.mrf.mxu2 }
  0xc4   :  { %v3633_v43 = vadd.f32 %v311_v39, %v3630_v9  ;;  %v542_v53 = vadd.f32 %v2929_v21, %v541_v49 }
  0xc6   :  { %v546_v44 = vsel %vm545_vm2, %v2929_v21, %v542_v53 }
  0xc7   :  { %v516_v12 = vpop.f32.mrf.mxu3 }
  0xc8   :  { %v517_v13 = vadd.f32 %v516_v12, %v3619_v3  ;;  %v3623_v19 = vpop.f32.mrf.mxu0 }
  0xca   :  { %v553_v18 = vadd.f32 %v517_v13, %v278_v5 }
  0xcb   :  { %v3639_v5 = vpop.f32.mrf.mxu2 }
  0xcc   :  { %v2600_v20 = vmul.f32 -1.442695, %v553_v18  ;;  %v550_v18 = vor.u32 1.1754944e-38, %v549_v57 }
  0xce   :  { %2930 = vpow2.f32 %v2600_v20  ;;  %v307_v20 = vadd.f32 %v306_v6, %v3630_v9  ;;  %v551_v25 = vsel %vm548_vm3, %v550_v18, %v546_v44 }
  0xcf   :  { %v518_v22 = vpop.f32.mrf.mxu3 }
  0xd0   :  { %v263_v30 = vpop.f32.mrf.mxu0 }
  0xd1   :  { %v3628_v32 = vadd.f32 %v263_v30, %v3605_v48 }
  0xd3   :  { %4679 = vst [vmem:[#allocation3_spill] sm:$0xff] %v3628_v32  ;;  %v316_v39 = vpop.f32.mrf.mxu2 }
  0xd4   :  { %v2931_v31 = vpop.eup %2930  ;;  %v3644_v21 = vadd.f32 %v316_v39, %v3630_v9 }
  0xd5   :  { %v557_v33 = vadd.f32 1.0, %v2931_v31 }
  0xd7   :  { %2932 = vrcp.f32 %v557_v33  ;;  %vm563_vm4 = vweird.f32 %v557_v33  ;;  %v569_v31 = vand.u32 2147483648, %v557_v33  ;;  %v567_v37 = vand.u32 2147483647, %v557_v33 }
  0xd8   :  { %v3635_v50 = vpop.f32.mrf.mxu0 }
  0xd9   :  { %4680 = vst [vmem:[#allocation4_spill] sm:$0xff] %v3635_v50  ;;  %vm568_vm7 = vcmp.eq.f32.partialorder %v567_v37, 8.507059e+37 }
  0xdb   :  { %v3646_v63 = vpop.f32.mrf.mxu2 }
  0xdc   :  { %4681 = vst [vmem:[#allocation5_spill] sm:$0xff] %v3646_v63 }
  0xdd   :  { %v2933_v51 = vpop.eup %2932 }
  0xde   :  { %v559_v52 = vmul.f32 %v2933_v51, %v557_v33  ;;  %vm564_vm5 = vweird.f32 %v2933_v51 }
  0xdf   :  { %vm565_vm6 = vmor %vm563_vm4, %vm564_vm5 }
  0xe0   :  { %v560_v60 = vsub.f32 1.0, %v559_v52  ;;  %v529_v13 = vpop.f32.mrf.mxu0  ;;  %v570_v52 = vor.u32 1.1754944e-38, %v569_v31 }
  0xe1   :  { %v530_v22 = vadd.f32 %v529_v13, %v3637_v62 }
  0xe2   :  { %v561_v12 = vmul.f32 %v2933_v51, %v560_v60 }
  0xe3   :  { %v573_v40 = vmul.f32 %v551_v25, %v530_v22 }
  0xe4   :  { %v562_v30 = vadd.f32 %v2933_v51, %v561_v12 }
  0xe5   :  { %v574_v4 = vadd.f32 %v573_v40, %v307_v20  ;;  %v279_v20 = vpop.f32.mrf.mxu1 }
  0xe6   :  { %v566_v49 = vsel %vm565_vm6, %v2933_v51, %v562_v30  ;;  %v321_v51 = vpop.f32.mrf.mxu2 }
  0xe7   :  { %2934 = vtanh.f32 %v574_v4  ;;  %v571_v53 = vsel %vm568_vm7, %v570_v52, %v566_v49  ;;  %v3654_v18 = vadd.f32 %v321_v51, %v3630_v9  ;;  %v251_v49 = vadd.f32 %v3601_v46, %v3605_v48 }
  0xe8   :  { %v531_v6 = vpop.f32.mrf.mxu0  ;;  %v576_v57 = vsub.f32 1.0, %v571_v53  ;;  %v578_v12 = vmul.f32 0.0, %v571_v53 }
  0xe9   :  { %4682 = vst [vmem:[#allocation6_spill] sm:$0xff] %v3654_v18 }
  0xed   :  { %v2935_v60 = vpop.eup %2934  ;;  %v3679_v22 = vpop.f32.mrf.mxu1 }
  0xee   :  { %v577_v44 = vmul.f32 %v2935_v60, %v576_v57  ;;  %v3691_v4 = vpop.f32.mrf.mxu2  ;;  %v280_v60 = vadd.f32 %v279_v20, %v3614_v61 }
  0xef   :  { %4685 = vst [vmem:[#allocation9_spill] sm:$0xff] %v3691_v4 }
  0xf0   :  { %v3648_v13 = vadd.f32 %v578_v12, %v577_v44 }
  0xf2   :  { %v581_v33 = vpack.c.bf16 %v3648_v13, %v3648_v13 }
  0xf4   :  { %590 = vmatmul.bf16.vlgmr.msrb.gmra.mxu1 %v581_v33  ;;  %603 = vmatmul.bf16.vlgmr.msrb.gmra.mxu2 %v581_v33 }
  0xf5   :  { %616 = vmatmul.bf16.vlgmr.msra.gmra.mxu3 %v581_v33  ;;  %784 = vmatpush.bf16.msrb.mxu1 %v3329_v10  ;;  %v3681_v25 = vpop.f32.mrf.mxu1 }
  0xf6   :  { %846 = vmatpush.bf16.msrb.mxu2 %v3169_v7  ;;  %859 = vmatpush.bf16.msra.mxu3 %v3337_v14 }
  0xf9   :  { %785 = vmatpush.bf16.msrb.mxu1 %v3362_v26 }
  0xfa   :  { %847 = vmatpush.bf16.msrb.mxu2 %v3178_v11  ;;  %860 = vmatpush.bf16.msra.mxu3 %v3368_v28 }
  0xfd   :  { %786 = vmatpush.bf16.msrb.mxu1 %v3397_v41  ;;  %v3683_v30 = vpop.f32.mrf.mxu1 }
  0xfe   :  { %848 = vmatpush.bf16.msrb.mxu2 %v3193_v17  ;;  %861 = vmatpush.bf16.msra.mxu3 %v3400_v42 }
 0x101   :  { %787 = vmatpush.bf16.msrb.mxu1 %v3427_v54 }
 0x102   :  { %849 = vmatpush.bf16.msrb.mxu2 %v3208_v23  ;;  %862 = vmatpush.bf16.msra.mxu3 %v3430_v55 }
 0x105   :  { %788 = vmatpush.bf16.msrb.mxu1 %v3451_v1  ;;  %v3685_v40 = vpop.f32.mrf.mxu1 }
 0x106   :  { %850 = vmatpush.bf16.msrb.mxu2 %v3235_v34  ;;  %863 = vmatpush.bf16.msra.mxu3 %v3454_v2 }
 0x109   :  { %789 = vmatpush.bf16.msrb.mxu1 %v3474_v15 }
 0x10a   :  { %851 = vmatpush.bf16.msrb.mxu2 %v3262_v45  ;;  %864 = vmatpush.bf16.msra.mxu3 %v3477_v16 }
 0x10d   :  { %790 = vmatpush.bf16.msrb.mxu1 %v3499_v27  ;;  %v3687_v31 = vpop.f32.mrf.mxu1 }
 0x10e   :  { %852 = vmatpush.bf16.msrb.mxu2 %v3292_v58  ;;  %865 = vmatpush.bf16.msra.mxu3 %v3502_v29  ;;  %4683 = vst [vmem:[#allocation7_spill] sm:$0xff] %v3687_v31 }
 0x111   :  { %791 = vmatpush.bf16.msrb.mxu1 %v3519_v35 }
 0x112   :  { %853 = vmatpush.bf16.msrb.mxu2 %v3322_v8  ;;  %866 = vmatpush.bf16.msra.mxu3 %v3522_v36 }
 0x115   :  { %v3689_v37 = vpop.f32.mrf.mxu1 }
 0x116   :  { %4684 = vst [vmem:[#allocation8_spill] sm:$0xff] %v3689_v37 }
 0x171   :  { %v591_v39 = vpop.f32.mrf.mxu1 }
 0x172   :  { %v592_v52 = vadd.f32 %v591_v39, %v3603_v47 }
 0x174   :  { %v621_v6 = vadd.f32 %v592_v52, %v251_v49 }
 0x176   :  { %v2601_v53 = vmul.f32 -1.442695, %v621_v6 }
 0x177   :  { %v604_v57 = vpop.f32.mrf.mxu2 }
 0x178   :  { %2936 = vpow2.f32 %v2601_v53  ;;  %v605_v44 = vadd.f32 %v604_v57, %v3619_v3  ;;  %v617_v12 = vpop.f32.mrf.mxu3 }
 0x179   :  { %v593_v33 = vpop.f32.mrf.mxu1 }
 0x17a   :  { %v641_v51 = vadd.f32 %v605_v44, %v280_v60  ;;  %v309_v44 = vadd.f32 %v3625_v24, %v3630_v9 }
 0x17c   :  { %v2602_v38 = vmul.f32 -1.442695, %v641_v51 }
 0x17e   :  { %v2937_v50 = vpop.eup %2936  ;;  %2938 = vpow2.f32 %v2602_v38 }
 0x17f   :  { %v625_v4 = vadd.f32 1.0, %v2937_v50  ;;  %v606_v37 = vpop.f32.mrf.mxu2 }
 0x180   :  { %v619_v18 = vpop.f32.mrf.mxu3 }
 0x181   :  { %2940 = vrcp.f32 %v625_v4  ;;  %v637_v20 = vand.u32 2147483648, %v625_v4  ;;  %v635_v57 = vand.u32 2147483647, %v625_v4  ;;  %vm631_vm9 = vweird.f32 %v625_v4 }
 0x182   :  { %v618_v18 = vadd.f32 %v617_v12, %v3637_v62 }
 0x183   :  { %v638_v38 = vor.u32 1.1754944e-38, %v637_v20  ;;  %vm636_vm11 = vcmp.eq.f32.partialorder %v635_v57, 8.507059e+37 }
 0x184   :  { %v2939_v46 = vpop.eup %2938 }
 0x185   :  { %v645_v39 = vadd.f32 1.0, %v2939_v46 }
 0x187   :  { %v2941_v49 = vpop.eup %2940  ;;  %2942 = vrcp.f32 %v645_v39  ;;  %v655_v31 = vand.u32 2147483647, %v645_v39  ;;  %vm651_vm13 = vweird.f32 %v645_v39 }
 0x188   :  { %v627_v52 = vmul.f32 %v2941_v49, %v625_v4  ;;  %vm632_vm8 = vweird.f32 %v2941_v49 }
 0x189   :  { %vm633_vm10 = vmor %vm631_vm9, %vm632_vm8  ;;  %vm656_vm15 = vcmp.eq.f32.partialorder %v655_v31, 8.507059e+37  ;;  %v283_v31 = vadd.f32 %v3679_v22, %v3614_v61 }
 0x18a   :  { %v628_v6 = vsub.f32 1.0, %v627_v52  ;;  %v657_v52 = vand.u32 2147483648, %v645_v39 }
 0x18c   :  { %v629_v53 = vmul.f32 %v2941_v49, %v628_v6  ;;  %v658_v4 = vor.u32 1.1754944e-38, %v657_v52 }
 0x18d   :  { %v2943_v32 = vpop.eup %2942 }
 0x18e   :  { %v647_v33 = vmul.f32 %v2943_v32, %v645_v39  ;;  %v630_v60 = vadd.f32 %v2941_v49, %v629_v53  ;;  %vm652_vm12 = vweird.f32 %v2943_v32 }
 0x18f   :  { %vm653_vm14 = vmor %vm651_vm13, %vm652_vm12 }
 0x190   :  { %v648_v50 = vsub.f32 1.0, %v647_v33  ;;  %v634_v37 = vsel %vm633_vm10, %v2941_v49, %v630_v60 }
 0x191   :  { %v639_v51 = vsel %vm636_vm11, %v638_v38, %v634_v37 }
 0x192   :  { %v649_v46 = vmul.f32 %v2943_v32, %v648_v50  ;;  %v661_v6 = vmul.f32 %v639_v51, %v618_v18 }
 0x194   :  { %v650_v63 = vadd.f32 %v2943_v32, %v649_v46  ;;  %v662_v53 = vadd.f32 %v661_v6, %v309_v44 }
 0x196   :  { %v654_v20 = vsel %vm653_vm14, %v2943_v32, %v650_v63  ;;  %2944 = vtanh.f32 %v662_v53 }
 0x197   :  { %v659_v12 = vsel %vm656_vm15, %v658_v4, %v654_v20 }
 0x198   :  { %v664_v49 = vsub.f32 1.0, %v659_v12  ;;  %v666_v24 = vmul.f32 %v659_v12, %v3648_v13 }
 0x19c   :  { %v2945_v57 = vpop.eup %2944 }
 0x19d   :  { %v665_v33 = vmul.f32 %v2945_v57, %v664_v49 }
 0x19f   :  { %v3702_v60 = vadd.f32 %v666_v24, %v665_v33 }
 0x1a1   :  { %v669_v38 = vpack.c.bf16 %v3702_v60, %v3702_v60 }
 0x1a3   :  { %678 = vmatmul.bf16.vlgmr.msra.gmra.mxu0 %v669_v38  ;;  %691 = vmatmul.bf16.vlgmr.msra.gmra.mxu1 %v669_v38 }
 0x1a4   :  { %704 = vmatmul.bf16.vlgmr.msra.gmra.mxu2 %v669_v38  ;;  %872 = vmatpush.bf16.msra.mxu0 %v3329_v10 }
 0x1a5   :  { %934 = vmatpush.bf16.msra.mxu1 %v3169_v7  ;;  %947 = vmatpush.bf16.msra.mxu2 %v3337_v14 }
 0x1a8   :  { %873 = vmatpush.bf16.msra.mxu0 %v3362_v26 }
 0x1a9   :  { %935 = vmatpush.bf16.msra.mxu1 %v3178_v11  ;;  %948 = vmatpush.bf16.msra.mxu2 %v3368_v28 }
 0x1ac   :  { %874 = vmatpush.bf16.msra.mxu0 %v3397_v41 }
 0x1ad   :  { %936 = vmatpush.bf16.msra.mxu1 %v3193_v17  ;;  %949 = vmatpush.bf16.msra.mxu2 %v3400_v42 }
 0x1b0   :  { %875 = vmatpush.bf16.msra.mxu0 %v3427_v54 }
 0x1b1   :  { %937 = vmatpush.bf16.msra.mxu1 %v3208_v23  ;;  %950 = vmatpush.bf16.msra.mxu2 %v3430_v55 }
 0x1b4   :  { %876 = vmatpush.bf16.msra.mxu0 %v3451_v1 }
 0x1b5   :  { %938 = vmatpush.bf16.msra.mxu1 %v3235_v34  ;;  %951 = vmatpush.bf16.msra.mxu2 %v3454_v2 }
 0x1b8   :  { %877 = vmatpush.bf16.msra.mxu0 %v3474_v15 }
 0x1b9   :  { %939 = vmatpush.bf16.msra.mxu1 %v3262_v45  ;;  %952 = vmatpush.bf16.msra.mxu2 %v3477_v16 }
 0x1bc   :  { %878 = vmatpush.bf16.msra.mxu0 %v3499_v27 }
 0x1bd   :  { %940 = vmatpush.bf16.msra.mxu1 %v3292_v58  ;;  %953 = vmatpush.bf16.msra.mxu2 %v3502_v29 }
 0x1c0   :  { %879 = vmatpush.bf16.msra.mxu0 %v3519_v35 }
 0x1c1   :  { %941 = vmatpush.bf16.msra.mxu1 %v3322_v8  ;;  %954 = vmatpush.bf16.msra.mxu2 %v3522_v36 }
 0x220   :  { %v679_v32 = vpop.f32.mrf.mxu0  ;;  %v692_v63 = vpop.f32.mrf.mxu1 }
 0x221   :  { %v680_v39 = vadd.f32 %v679_v32, %v3603_v47  ;;  %v693_v50 = vadd.f32 %v692_v63, %v3619_v3 }
 0x223   :  { %v709_v18 = vadd.f32 %v680_v39, %v3610_v56  ;;  %v729_v37 = vadd.f32 %v693_v50, %v283_v31 }
 0x225   :  { %v2603_v44 = vmul.f32 -1.442695, %v709_v18  ;;  %v2604_v51 = vmul.f32 -1.442695, %v729_v37 }
 0x227   :  { %2946 = vpow2.f32 %v2603_v44  ;;  %v705_v46 = vpop.f32.mrf.mxu2 }
 0x228   :  { %2948 = vpow2.f32 %v2604_v51  ;;  %v681_v52 = vpop.f32.mrf.mxu0  ;;  %v694_v6 = vpop.f32.mrf.mxu1  ;;  %v706_v37 = vadd.f32 %v705_v46, %v3637_v62 }
 0x22d   :  { %v2947_v53 = vpop.eup %2946 }
 0x22e   :  { %v2949_v4 = vpop.eup %2948  ;;  %v713_v20 = vadd.f32 1.0, %v2947_v53 }
 0x22f   :  { %v733_v12 = vadd.f32 1.0, %v2949_v4  ;;  %v707_v49 = vpop.f32.mrf.mxu2 }
 0x230   :  { %2950 = vrcp.f32 %v713_v20  ;;  %v725_v32 = vand.u32 2147483648, %v713_v20  ;;  %v723_v31 = vand.u32 2147483647, %v713_v20  ;;  %vm719_vm1 = vweird.f32 %v713_v20 }
 0x231   :  { %2952 = vrcp.f32 %v733_v12  ;;  %v745_v6 = vand.u32 2147483648, %v733_v12  ;;  %vm739_vm5 = vweird.f32 %v733_v12  ;;  %v743_v4 = vand.u32 2147483647, %v733_v12 }
 0x232   :  { %v726_v18 = vor.u32 1.1754944e-38, %v725_v32  ;;  %vm724_vm3 = vcmp.eq.f32.partialorder %v723_v31, 8.507059e+37 }
 0x233   :  { %vm744_vm7 = vcmp.eq.f32.partialorder %v743_v4, 8.507059e+37 }
 0x236   :  { %v2951_v22 = vpop.eup %2950 }
 0x237   :  { %v2953_v57 = vpop.eup %2952  ;;  %v715_v33 = vmul.f32 %v2951_v22, %v713_v20  ;;  %vm720_vm0 = vweird.f32 %v2951_v22 }
 0x238   :  { %v735_v24 = vmul.f32 %v2953_v57, %v733_v12  ;;  %vm721_vm2 = vmor %vm719_vm1, %vm720_vm0  ;;  %vm740_vm4 = vweird.f32 %v2953_v57  ;;  %v285_v12 = vadd.f32 %v3681_v25, %v3614_v61 }
 0x239   :  { %v716_v56 = vsub.f32 1.0, %v715_v33  ;;  %vm741_vm6 = vmor %vm739_vm5, %vm740_vm4 }
 0x23a   :  { %v736_v38 = vsub.f32 1.0, %v735_v24  ;;  %v746_v24 = vor.u32 1.1754944e-38, %v745_v6 }
 0x23b   :  { %v717_v63 = vmul.f32 %v2951_v22, %v716_v56 }
 0x23c   :  { %v737_v39 = vmul.f32 %v2953_v57, %v736_v38 }
 0x23d   :  { %v718_v50 = vadd.f32 %v2951_v22, %v717_v63 }
 0x23e   :  { %v738_v52 = vadd.f32 %v2953_v57, %v737_v39 }
 0x23f   :  { %v722_v44 = vsel %vm721_vm2, %v2951_v22, %v718_v50 }
 0x240   :  { %v727_v51 = vsel %vm724_vm3, %v726_v18, %v722_v44  ;;  %v742_v33 = vsel %vm741_vm6, %v2953_v57, %v738_v52 }
 0x241   :  { %v749_v53 = vmul.f32 %v727_v51, %v706_v37  ;;  %v747_v20 = vsel %vm744_vm7, %v746_v24, %v742_v33  ;;  %v256_v37 = vadd.f32 %v3612_v59, %v3605_v48 }
 0x242   :  { %v752_v56 = vsub.f32 1.0, %v747_v20  ;;  %v754_v22 = vmul.f32 %v747_v20, %v3702_v60 }
 0x243   :  { %v750_v49 = vadd.f32 %v749_v53, %v3633_v43 }
 0x245   :  { %2954 = vtanh.f32 %v750_v49 }
 0x24b   :  { %v2955_v38 = vpop.eup %2954 }
 0x24c   :  { %v753_v46 = vmul.f32 %v2955_v38, %v752_v56 }
 0x24e   :  { %v3738_v32 = vadd.f32 %v754_v22, %v753_v46 }
 0x250   :  { %v757_v63 = vpack.c.bf16 %v3738_v32, %v3738_v32 }
 0x252   :  { %766 = vmatmul.bf16.vlgmr.msrb.gmra.mxu3 %v757_v63  ;;  %779 = vmatmul.bf16.vlgmr.msrb.gmra.mxu0 %v757_v63 }
 0x253   :  { %792 = vmatmul.bf16.vlgmr.msrb.gmra.mxu1 %v757_v63  ;;  %960 = vmatpush.bf16.msrb.mxu3 %v3329_v10 }
 0x254   :  { %1022 = vmatpush.bf16.msrb.mxu0 %v3169_v7  ;;  %1035 = vmatpush.bf16.msrb.mxu1 %v3337_v14 }
 0x257   :  { %961 = vmatpush.bf16.msrb.mxu3 %v3362_v26 }
 0x258   :  { %1023 = vmatpush.bf16.msrb.mxu0 %v3178_v11  ;;  %1036 = vmatpush.bf16.msrb.mxu1 %v3368_v28 }
 0x25b   :  { %962 = vmatpush.bf16.msrb.mxu3 %v3397_v41 }
 0x25c   :  { %1024 = vmatpush.bf16.msrb.mxu0 %v3193_v17  ;;  %1037 = vmatpush.bf16.msrb.mxu1 %v3400_v42 }
 0x25f   :  { %963 = vmatpush.bf16.msrb.mxu3 %v3427_v54 }
 0x260   :  { %1025 = vmatpush.bf16.msrb.mxu0 %v3208_v23  ;;  %1038 = vmatpush.bf16.msrb.mxu1 %v3430_v55 }
 0x263   :  { %964 = vmatpush.bf16.msrb.mxu3 %v3451_v1 }
 0x264   :  { %1026 = vmatpush.bf16.msrb.mxu0 %v3235_v34  ;;  %1039 = vmatpush.bf16.msrb.mxu1 %v3454_v2 }
 0x267   :  { %965 = vmatpush.bf16.msrb.mxu3 %v3474_v15 }
 0x268   :  { %1027 = vmatpush.bf16.msrb.mxu0 %v3262_v45  ;;  %1040 = vmatpush.bf16.msrb.mxu1 %v3477_v16 }
 0x26b   :  { %966 = vmatpush.bf16.msrb.mxu3 %v3499_v27 }
 0x26c   :  { %1028 = vmatpush.bf16.msrb.mxu0 %v3292_v58  ;;  %1041 = vmatpush.bf16.msrb.mxu1 %v3502_v29 }
 0x26f   :  { %967 = vmatpush.bf16.msrb.mxu3 %v3519_v35 }
 0x270   :  { %1029 = vmatpush.bf16.msrb.mxu0 %v3322_v8  ;;  %1042 = vmatpush.bf16.msrb.mxu1 %v3522_v36 }
 0x2cf   :  { %v780_v43 = vpop.f32.mrf.mxu0 }
 0x2d0   :  { %v781_v57 = vadd.f32 %v780_v43, %v3619_v3  ;;  %v793_v31 = vpop.f32.mrf.mxu1 }
 0x2d2   :  { %v817_v39 = vadd.f32 %v781_v57, %v285_v12 }
 0x2d4   :  { %v2606_v50 = vmul.f32 -1.442695, %v817_v39 }
 0x2d5   :  { %v767_v18 = vpop.f32.mrf.mxu3 }
 0x2d6   :  { %2956 = vpow2.f32 %v2606_v50  ;;  %v768_v44 = vadd.f32 %v767_v18, %v3603_v47  ;;  %v794_v18 = vadd.f32 %v793_v31, %v3637_v62 }
 0x2d7   :  { %v782_v51 = vpop.f32.mrf.mxu0 }
 0x2d8   :  { %v797_v52 = vadd.f32 %v768_v44, %v256_v37  ;;  %v795_v6 = vpop.f32.mrf.mxu1 }
 0x2da   :  { %v2605_v53 = vmul.f32 -1.442695, %v797_v52  ;;  %v314_v52 = vadd.f32 %v3639_v5, %v3630_v9 }
 0x2dc   :  { %v2957_v4 = vpop.eup %2956  ;;  %2958 = vpow2.f32 %v2605_v53 }
 0x2dd   :  { %v821_v49 = vadd.f32 1.0, %v2957_v4  ;;  %v769_v25 = vpop.f32.mrf.mxu3 }
 0x2df   :  { %2960 = vrcp.f32 %v821_v49  ;;  %v833_v6 = vand.u32 2147483648, %v821_v49  ;;  %vm827_vm13 = vweird.f32 %v821_v49  ;;  %v831_v4 = vand.u32 2147483647, %v821_v49 }
 0x2e1   :  { %vm832_vm15 = vcmp.eq.f32.partialorder %v831_v4, 8.507059e+37 }
 0x2e2   :  { %v2959_v33 = vpop.eup %2958 }
 0x2e3   :  { %v801_v24 = vadd.f32 1.0, %v2959_v33 }
 0x2e5   :  { %2962 = vrcp.f32 %v801_v24  ;;  %v2961_v20 = vpop.eup %2960  ;;  %v813_v63 = vand.u32 2147483648, %v801_v24  ;;  %v811_v12 = vand.u32 2147483647, %v801_v24  ;;  %vm807_vm9 = vweird.f32 %v801_v24 }
 0x2e6   :  { %v823_v56 = vmul.f32 %v2961_v20, %v821_v49  ;;  %vm828_vm12 = vweird.f32 %v2961_v20 }
 0x2e7   :  { %v814_v50 = vor.u32 1.1754944e-38, %v813_v63  ;;  %vm812_vm11 = vcmp.eq.f32.partialorder %v811_v12, 8.507059e+37  ;;  %vm829_vm14 = vmor %vm827_vm13, %vm828_vm12 }
 0x2e8   :  { %v824_v59 = vsub.f32 1.0, %v823_v56 }
 0x2ea   :  { %v825_v57 = vmul.f32 %v2961_v20, %v824_v59 }
 0x2eb   :  { %v2963_v38 = vpop.eup %2962 }
 0x2ec   :  { %v803_v46 = vmul.f32 %v2963_v38, %v801_v24  ;;  %vm808_vm8 = vweird.f32 %v2963_v38  ;;  %v826_v51 = vadd.f32 %v2961_v20, %v825_v57  ;;  %v834_v24 = vor.u32 1.1754944e-38, %v833_v6 }
 0x2ed   :  { %vm809_vm10 = vmor %vm807_vm9, %vm808_vm8 }
 0x2ee   :  { %v804_v22 = vsub.f32 1.0, %v803_v46  ;;  %v830_v33 = vsel %vm829_vm14, %v2961_v20, %v826_v51 }
 0x2ef   :  { %v835_v56 = vsel %vm832_vm15, %v834_v24, %v830_v33 }
 0x2f0   :  { %v805_v43 = vmul.f32 %v2963_v38, %v804_v22  ;;  %v840_v31 = vsub.f32 1.0, %v835_v56  ;;  %v842_v59 = vmul.f32 %v835_v56, %v3738_v32 }
 0x2f2   :  { %v806_v39 = vadd.f32 %v2963_v38, %v805_v43 }
 0x2f4   :  { %v810_v37 = vsel %vm809_vm10, %v2963_v38, %v806_v39 }
 0x2f5   :  { %v815_v44 = vsel %vm812_vm11, %v814_v50, %v810_v37 }
 0x2f6   :  { %v837_v53 = vmul.f32 %v815_v44, %v794_v18 }
 0x2f8   :  { %v838_v25 = vadd.f32 %v837_v53, %v314_v52 }
 0x2fa   :  { %2964 = vtanh.f32 %v838_v25 }
 0x300   :  { %v2965_v38 = vpop.eup %2964 }
 0x301   :  { %v841_v46 = vmul.f32 %v2965_v38, %v840_v31 }
 0x303   :  { %v3776_v22 = vadd.f32 %v842_v59, %v841_v46 }
 0x305   :  { %v845_v5 = vpack.c.bf16 %v3776_v22, %v3776_v22 }
 0x307   :  { %854 = vmatmul.bf16.vlgmr.msrb.gmra.mxu2 %v845_v5  ;;  %867 = vmatmul.bf16.vlgmr.msra.gmra.mxu3 %v845_v5 }
 0x308   :  { %880 = vmatmul.bf16.vlgmr.msra.gmra.mxu0 %v845_v5  ;;  %1048 = vmatpush.bf16.msrb.mxu2 %v3329_v10 }
 0x309   :  { %1110 = vmatpush.bf16.msra.mxu3 %v3169_v7  ;;  %1123 = vmatpush.bf16.msra.mxu0 %v3337_v14 }
 0x30c   :  { %1049 = vmatpush.bf16.msrb.mxu2 %v3362_v26 }
 0x30d   :  { %1111 = vmatpush.bf16.msra.mxu3 %v3178_v11  ;;  %1124 = vmatpush.bf16.msra.mxu0 %v3368_v28 }
 0x310   :  { %1050 = vmatpush.bf16.msrb.mxu2 %v3397_v41 }
 0x311   :  { %1112 = vmatpush.bf16.msra.mxu3 %v3193_v17  ;;  %1125 = vmatpush.bf16.msra.mxu0 %v3400_v42 }
 0x314   :  { %1051 = vmatpush.bf16.msrb.mxu2 %v3427_v54 }
 0x315   :  { %1113 = vmatpush.bf16.msra.mxu3 %v3208_v23  ;;  %1126 = vmatpush.bf16.msra.mxu0 %v3430_v55  ;;  %v288_v23 = vadd.f32 %v3683_v30, %v3614_v61 }
 0x318   :  { %1052 = vmatpush.bf16.msrb.mxu2 %v3451_v1 }
 0x319   :  { %1114 = vmatpush.bf16.msra.mxu3 %v3235_v34  ;;  %1127 = vmatpush.bf16.msra.mxu0 %v3454_v2 }
 0x31c   :  { %1053 = vmatpush.bf16.msrb.mxu2 %v3474_v15 }
 0x31d   :  { %1115 = vmatpush.bf16.msra.mxu3 %v3262_v45  ;;  %1128 = vmatpush.bf16.msra.mxu0 %v3477_v16 }
 0x320   :  { %1054 = vmatpush.bf16.msrb.mxu2 %v3499_v27 }
 0x321   :  { %1116 = vmatpush.bf16.msra.mxu3 %v3292_v58  ;;  %1129 = vmatpush.bf16.msra.mxu0 %v3502_v29 }
 0x324   :  { %1055 = vmatpush.bf16.msrb.mxu2 %v3519_v35 }
 0x325   :  { %1117 = vmatpush.bf16.msra.mxu3 %v3322_v8  ;;  %1130 = vmatpush.bf16.msra.mxu0 %v3522_v36 }
 0x385   :  { %v881_v7 = vpop.f32.mrf.mxu0 }
 0x386   :  { %v882_v51 = vadd.f32 %v881_v7, %v3637_v62 }
 0x38a   :  { %v855_v11 = vpop.f32.mrf.mxu2  ;;  %v868_v17 = vpop.f32.mrf.mxu3 }
 0x38b   :  { %v856_v34 = vadd.f32 %v855_v11, %v3603_v47  ;;  %v869_v45 = vadd.f32 %v868_v17, %v3619_v3 }
 0x38d   :  { %v885_v58 = vadd.f32 %v856_v34, %v3617_v0  ;;  %v905_v14 = vadd.f32 %v869_v45, %v288_v23  ;;  %v883_v28 = vpop.f32.mrf.mxu0  ;;  %v261_v23 = vadd.f32 %v3623_v19, %v3605_v48  ;;  %v2895_v19 = vld [vmem:[%s4670_s5 + $0x98] sm:$0xf0]  ;;  %v290_v34 = vadd.f32 %v3685_v40, %v3614_v61  ;;  %v2665_v40 = vld [vmem:[%s4670_s5 + $0x60] sm:$0xf] }
 0x38f   :  { %v2607_v42 = vmul.f32 -1.442695, %v885_v58  ;;  %v2608_v55 = vmul.f32 -1.442695, %v905_v14 }
 0x391   :  { %2966 = vpow2.f32 %v2607_v42 }
 0x392   :  { %2968 = vpow2.f32 %v2608_v55  ;;  %v857_v8 = vpop.f32.mrf.mxu2  ;;  %v870_v2 = vpop.f32.mrf.mxu3  ;;  %v2677_v55 = vld [vmem:[%s4670_s5 + $0x78] sm:$0xf] }
 0x393   :  { %v2892_v8 = vld [vmem:[%s4670_s5 + $0x80] sm:$0xf0] }
 0x397   :  { %v2967_v16 = vpop.eup %2966 }
 0x398   :  { %v2969_v29 = vpop.eup %2968  ;;  %v889_v36 = vadd.f32 1.0, %v2967_v16  ;;  %v2678_v16 = vor.u32 %v2892_v8, %v2677_v55 }
 0x399   :  { %v909_v49 = vadd.f32 1.0, %v2969_v29  ;;  %v2889_v29 = vld [vmem:[%s4670_s5 + $0x68] sm:$0xf0] }
 0x39a   :  { %2970 = vrcp.f32 %v889_v36  ;;  %v901_v0 = vand.u32 2147483648, %v889_v36  ;;  %v899_v50 = vand.u32 2147483647, %v889_v36  ;;  %vm895_vm1 = vweird.f32 %v889_v36 }
 0x39b   :  { %2972 = vrcp.f32 %v909_v49  ;;  %v921_v25 = vand.u32 2147483648, %v909_v49  ;;  %vm915_vm5 = vweird.f32 %v909_v49  ;;  %v919_v33 = vand.u32 2147483647, %v909_v49 }
 0x39c   :  { %v902_v44 = vor.u32 1.1754944e-38, %v901_v0  ;;  %vm900_vm3 = vcmp.eq.f32.partialorder %v899_v50, 8.507059e+37  ;;  %v2883_v50 = vld [vmem:[%s4670_s5 + $0x38] sm:$0xf0] }
 0x39d   :  { %v922_v31 = vor.u32 1.1754944e-38, %v921_v25  ;;  %vm920_vm7 = vcmp.eq.f32.partialorder %v919_v33, 8.507059e+37  ;;  %v2617_v33 = vld [vmem:[%s4670_s5] sm:$0xf] }
 0x3a0   :  { %v2971_v30 = vpop.eup %2970 }
 0x3a1   :  { %v2973_v20 = vpop.eup %2972  ;;  %v891_v63 = vmul.f32 %v2971_v30, %v889_v36  ;;  %vm896_vm0 = vweird.f32 %v2971_v30 }
 0x3a2   :  { %v911_v43 = vmul.f32 %v2973_v20, %v909_v49  ;;  %vm897_vm2 = vmor %vm895_vm1, %vm896_vm0  ;;  %vm916_vm4 = vweird.f32 %v2973_v20  ;;  %v2666_v49 = vor.u32 %v2889_v29, %v2665_v40  ;;  %v3893_v40 = vpack.c.bf16 %v3776_v22, %v3738_v32  ;;  %v2785_v32 = vld [vmem:[%s4671_s6 + $0x90] sm:$0xf] }
 0x3a3   :  { %v892_v12 = vsub.f32 1.0, %v891_v63  ;;  %vm917_vm6 = vmor %vm915_vm5, %vm916_vm4 }
 0x3a4   :  { %v912_v57 = vsub.f32 1.0, %v911_v43  ;;  %v2653_v43 = vld [vmem:[%s4670_s5 + $0x48] sm:$0xf] }
 0x3a5   :  { %v893_v39 = vmul.f32 %v2971_v30, %v892_v12  ;;  %v2886_v12 = vld [vmem:[%s4670_s5 + $0x50] sm:$0xf0] }
 0x3a6   :  { %v913_v18 = vmul.f32 %v2973_v20, %v912_v57  ;;  %v2654_v57 = vor.u32 %v2886_v12, %v2653_v43  ;;  %v4687_v12 = vld [vmem:[#allocation7_spill] sm:$0xff] }
 0x3a7   :  { %v894_v37 = vadd.f32 %v2971_v30, %v893_v39  ;;  %v2641_v39 = vld [vmem:[%s4670_s5 + $0x30] sm:$0xf] }
 0x3a8   :  { %v914_v53 = vadd.f32 %v2973_v20, %v913_v18 }
 0x3a9   :  { %v898_v52 = vsel %vm897_vm2, %v2971_v30, %v894_v37  ;;  %v2642_v37 = vor.u32 %v2883_v50, %v2641_v39  ;;  %v2761_v50 = vld [vmem:[%s4671_s6 + $0x60] sm:$0xf] }
 0x3aa   :  { %v903_v6 = vsel %vm900_vm3, %v902_v44, %v898_v52  ;;  %v918_v56 = vsel %vm917_vm6, %v2973_v20, %v914_v53  ;;  %v2880_v52 = vld [vmem:[%s4670_s5 + $0x20] sm:$0xf0] }
 0x3ab   :  { %v925_v4 = vmul.f32 %v903_v6, %v882_v51  ;;  %v923_v38 = vsel %vm920_vm7, %v922_v31, %v918_v56  ;;  %v2629_v51 = vld [vmem:[%s4670_s5 + $0x18] sm:$0xf] }
 0x3ac   :  { %v928_v46 = vsub.f32 1.0, %v923_v38  ;;  %v930_v7 = vmul.f32 %v923_v38, %v3776_v22  ;;  %v2919_v22 = vld [vmem:[%s4671_s6 + $0x98] sm:$0xf0] }
 0x3ad   :  { %v926_v24 = vadd.f32 %v925_v4, %v3644_v21  ;;  %v2630_v4 = vor.u32 %v2880_v52, %v2629_v51  ;;  %v2703_v51 = vld [vmem:[%s4670_s5 + $0xb4] sm:$0xf0]  ;;  %v2709_v52 = vld [vmem:[%s4670_s5 + $0xb0] sm:$0xf] }
 0x3af   :  { %2974 = vtanh.f32 %v926_v24  ;;  %v2877_v24 = vld [vmem:[%s4670_s5 + $0x8] sm:$0xf0] }
 0x3b5   :  { %v2975_v59 = vpop.eup %2974 }
 0x3b6   :  { %v929_v5 = vmul.f32 %v2975_v59, %v928_v46 }
 0x3b8   :  { %v3812_v11 = vadd.f32 %v930_v7, %v929_v5  ;;  %v2618_v5 = vor.u32 %v2877_v24, %v2617_v33  ;;  %v2899_v33 = vld [vmem:[%s4670_s5 + $0xb8] sm:$0xf0] }
 0x3b9   :  { %v2710_v24 = vor.u32 %v2899_v33, %v2709_v52  ;;  %v2643_v33 = vld [vmem:[%s4670_s5 + $0x3c] sm:$0xf0] }
 0x3ba   :  { %v933_v17 = vpack.c.bf16 %v3812_v11, %v3812_v11 }
 0x3bc   :  { %942 = vmatmul.bf16.vlgmr.msra.gmra.mxu1 %v933_v17  ;;  %955 = vmatmul.bf16.vlgmr.msra.gmra.mxu2 %v933_v17 }
 0x3bd   :  { %968 = vmatmul.bf16.vlgmr.msrb.gmra.mxu3 %v933_v17  ;;  %1136 = vmatpush.bf16.msra.mxu1 %v3329_v10 }
 0x3c1   :  { %1137 = vmatpush.bf16.msra.mxu1 %v3362_v26  ;;  %v2701_v26 = vld [vmem:[%s4670_s5 + $0xa8] sm:$0xf] }
 0x3c5   :  { %1138 = vmatpush.bf16.msra.mxu1 %v3397_v41  ;;  %v2898_v41 = vld [vmem:[%s4670_s5 + $0xb0] sm:$0xf0] }
 0x3c9   :  { %1139 = vmatpush.bf16.msra.mxu1 %v3427_v54 }
 0x3cd   :  { %1140 = vmatpush.bf16.msra.mxu1 %v3451_v1  ;;  %v2702_v1 = vor.u32 %v2898_v41, %v2701_v26 }
 0x3cf   :  { %1377 = vmatpush.bf16.msra.mxu2 %v2702_v1 }
 0x3d1   :  { %1141 = vmatpush.bf16.msra.mxu1 %v3474_v15 }
 0x3d5   :  { %1142 = vmatpush.bf16.msra.mxu1 %v3499_v27 }
 0x3d9   :  { %1143 = vmatpush.bf16.msra.mxu1 %v3519_v35  ;;  %v2689_v35 = vld [vmem:[%s4670_s5 + $0x90] sm:$0xf] }
 0x3da   :  { %v2690_v14 = vor.u32 %v2895_v19, %v2689_v35 }
 0x3dc   :  { %1378 = vmatpush.bf16.msra.mxu2 %v2690_v14 }
 0x3e0   :  { %1379 = vmatpush.bf16.msra.mxu2 %v2678_v16  ;;  %v3888_v16 = vpack.c.bf16 %v3702_v60, %v3648_v13  ;;  %v2922_v13 = vld [vmem:[%s4671_s6 + $0xb0] sm:$0xf0] }
 0x3e4   :  { %1380 = vmatpush.bf16.msra.mxu2 %v2666_v49  ;;  %v2773_v49 = vld [vmem:[%s4671_s6 + $0x78] sm:$0xf] }
 0x3e8   :  { %1381 = vmatpush.bf16.msra.mxu2 %v2654_v57 }
 0x3ec   :  { %1382 = vmatpush.bf16.msra.mxu2 %v2642_v37 }
 0x3f0   :  { %1383 = vmatpush.bf16.msra.mxu2 %v2630_v4 }
 0x3f4   :  { %1384 = vmatpush.bf16.msra.mxu2 %v2618_v5  ;;  %v2691_v5 = vld [vmem:[%s4670_s5 + $0x9c] sm:$0xf0] }
 0x439   :  { %v943_v21 = vpop.f32.mrf.mxu1 }
 0x43a   :  { %v944_v10 = vadd.f32 %v943_v21, %v3603_v47 }
 0x43c   :  { %v973_v54 = vadd.f32 %v944_v10, %v261_v23  ;;  %v4686_v10 = vld [vmem:[#allocation5_spill] sm:$0xff] }
 0x43d   :  { %v319_v26 = vadd.f32 %v4686_v10, %v3630_v9  ;;  %v2896_v10 = vld [vmem:[%s4670_s5 + $0xa0] sm:$0xf0] }
 0x43e   :  { %v2609_v15 = vmul.f32 -1.442695, %v973_v54 }
 0x43f   :  { %v956_v27 = vpop.f32.mrf.mxu2 }
 0x440   :  { %2976 = vpow2.f32 %v2609_v15  ;;  %v957_v45 = vadd.f32 %v956_v27, %v3619_v3  ;;  %v969_v58 = vpop.f32.mrf.mxu3 }
 0x441   :  { %v945_v28 = vpop.f32.mrf.mxu1  ;;  %v970_v21 = vadd.f32 %v969_v58, %v3637_v62 }
 0x442   :  { %v993_v42 = vadd.f32 %v957_v45, %v290_v34 }
 0x444   :  { %v2610_v2 = vmul.f32 -1.442695, %v993_v42 }
 0x446   :  { %v2977_v36 = vpop.eup %2976  ;;  %2978 = vpow2.f32 %v2610_v2 }
 0x447   :  { %v977_v30 = vadd.f32 1.0, %v2977_v36  ;;  %v958_v20 = vpop.f32.mrf.mxu2  ;;  %v2797_v36 = vld [vmem:[%s4671_s6 + $0xa8] sm:$0xf] }
 0x448   :  { %v971_v63 = vpop.f32.mrf.mxu3  ;;  %v3907_v60 = vor.u32 %v2922_v13, %v2797_v36 }
 0x449   :  { %2980 = vrcp.f32 %v977_v30  ;;  %v989_v25 = vand.u32 2147483648, %v977_v30  ;;  %v987_v31 = vand.u32 2147483647, %v977_v30  ;;  %vm983_vm9 = vweird.f32 %v977_v30 }
 0x44b   :  { %v990_v7 = vor.u32 1.1754944e-38, %v989_v25  ;;  %vm988_vm11 = vcmp.eq.f32.partialorder %v987_v31, 8.507059e+37 }
 0x44c   :  { %v2979_v0 = vpop.eup %2978 }
 0x44d   :  { %v997_v18 = vadd.f32 1.0, %v2979_v0  ;;  %v293_v0 = vadd.f32 %v4687_v12, %v3614_v61  ;;  %v2890_v12 = vld [vmem:[%s4670_s5 + $0x70] sm:$0xf0] }
 0x44f   :  { %v2981_v44 = vpop.eup %2980  ;;  %2982 = vrcp.f32 %v997_v18  ;;  %v1009_v1 = vand.u32 2147483648, %v997_v18  ;;  %v1007_v27 = vand.u32 2147483647, %v997_v18  ;;  %vm1003_vm13 = vweird.f32 %v997_v18 }
 0x450   :  { %v979_v6 = vmul.f32 %v2981_v44, %v977_v30  ;;  %vm984_vm8 = vweird.f32 %v2981_v44  ;;  %v2916_v30 = vld [vmem:[%s4671_s6 + $0x80] sm:$0xf0] }
 0x451   :  { %vm985_vm10 = vmor %vm983_vm9, %vm984_vm8  ;;  %v1010_v34 = vor.u32 1.1754944e-38, %v1009_v1  ;;  %vm1008_vm15 = vcmp.eq.f32.partialorder %v1007_v27, 8.507059e+37  ;;  %v3925_v20 = vor.u32 %v2916_v30, %v2773_v49  ;;  %v2737_v1 = vld [vmem:[%s4671_s6 + $0x30] sm:$0xf] }
 0x452   :  { %v980_v53 = vsub.f32 1.0, %v979_v6  ;;  %v4688_v6 = vld [vmem:[#allocation3_spill] sm:$0xff] }
 0x454   :  { %v981_v56 = vmul.f32 %v2981_v44, %v980_v53 }
 0x455   :  { %v2983_v38 = vpop.eup %2982 }
 0x456   :  { %v999_v46 = vmul.f32 %v2983_v38, %v997_v18  ;;  %v982_v59 = vadd.f32 %v2981_v44, %v981_v56  ;;  %vm1004_vm12 = vweird.f32 %v2983_v38  ;;  %v2913_v18 = vld [vmem:[%s4671_s6 + $0x68] sm:$0xf0] }
 0x457   :  { %vm1005_vm14 = vmor %vm1003_vm13, %vm1004_vm12  ;;  %v3938_v37 = vor.u32 %v2913_v18, %v2761_v50  ;;  %v2885_v50 = vld [vmem:[%s4670_s5 + $0x4c] sm:$0xf] }
 0x458   :  { %v1000_v17 = vsub.f32 1.0, %v999_v46  ;;  %v986_v23 = vsel %vm985_vm10, %v2981_v44, %v982_v59  ;;  %v2897_v44 = vld [vmem:[%s4670_s5 + $0xac] sm:$0xf]  ;;  %v2910_v46 = vld [vmem:[%s4671_s6 + $0x50] sm:$0xf0] }
 0x459   :  { %v991_v41 = vsel %vm988_vm11, %v990_v7, %v986_v23  ;;  %v2706_v25 = vor.u32 %v2897_v44, %v2703_v51  ;;  %v2894_v59 = vld [vmem:[%s4670_s5 + $0x94] sm:$0xf]  ;;  %v2697_v23 = vld [vmem:[%s4670_s5 + $0x98] sm:$0xf]  ;;  %v2661_v51 = vld [vmem:[%s4670_s5 + $0x50] sm:$0xf] }
 0x45a   :  { %v1001_v54 = vmul.f32 %v2983_v38, %v1000_v17  ;;  %v1013_v15 = vmul.f32 %v991_v41, %v970_v21  ;;  %v2694_v21 = vor.u32 %v2894_v59, %v2691_v5  ;;  %v2655_v44 = vld [vmem:[%s4670_s5 + $0x54] sm:$0xf0] }
 0x45b   :  { %1406 = vmatpush.bf16.msrb.mxu3 %v2706_v25  ;;  %v2658_v52 = vor.u32 %v2885_v50, %v2655_v44  ;;  %v2882_v25 = vld [vmem:[%s4670_s5 + $0x34] sm:$0xf] }
 0x45c   :  { %v1002_v35 = vadd.f32 %v2983_v38, %v1001_v54  ;;  %v1014_v19 = vadd.f32 %v1013_v15, %v319_v26  ;;  %v2698_v54 = vor.u32 %v2896_v10, %v2697_v23  ;;  %v2907_v15 = vld [vmem:[%s4671_s6 + $0x38] sm:$0xf0]  ;;  %v2631_v23 = vld [vmem:[%s4670_s5 + $0x24] sm:$0xf0] }
 0x45d   :  { %v3983_v27 = vor.u32 %v2907_v15, %v2737_v1 }
 0x45e   :  { %v1006_v45 = vsel %vm1005_vm14, %v2983_v38, %v1002_v35  ;;  %2984 = vtanh.f32 %v1014_v19  ;;  %v2749_v38 = vld [vmem:[%s4671_s6 + $0x48] sm:$0xf]  ;;  %v2891_v35 = vld [vmem:[%s4670_s5 + $0x7c] sm:$0xf] }
 0x45f   :  { %v1011_v58 = vsel %vm1008_vm15, %v1010_v34, %v1006_v45  ;;  %v3968_v17 = vor.u32 %v2910_v46, %v2749_v38  ;;  %1407 = vmatpush.bf16.msrb.mxu3 %v2694_v21  ;;  %v2679_v19 = vld [vmem:[%s4670_s5 + $0x84] sm:$0xf0]  ;;  %v2685_v34 = vld [vmem:[%s4670_s5 + $0x80] sm:$0xf]  ;;  %v2646_v38 = vor.u32 %v2882_v25, %v2643_v33  ;;  %v2884_v46 = vld [vmem:[%s4670_s5 + $0x40] sm:$0xf0] }
 0x460   :  { %v1016_v14 = vsub.f32 1.0, %v1011_v58  ;;  %v1018_v55 = vmul.f32 %v1011_v58, %v3812_v11  ;;  %v2682_v45 = vor.u32 %v2891_v35, %v2679_v19  ;;  %v2893_v58 = vld [vmem:[%s4670_s5 + $0x88] sm:$0xf0]  ;;  %v2879_v21 = vld [vmem:[%s4670_s5 + $0x1c] sm:$0xf] }
 0x461   :  { %v2634_v15 = vor.u32 %v2879_v21, %v2631_v23  ;;  %v2921_v25 = vld [vmem:[%s4671_s6 + $0xac] sm:$0xf]  ;;  %v2912_v21 = vld [vmem:[%s4671_s6 + $0x64] sm:$0xf]  ;;  %v2763_v23 = vld [vmem:[%s4671_s6 + $0x6c] sm:$0xf0] }
 0x463   :  { %1408 = vmatpush.bf16.msrb.mxu3 %v2682_v45 }
 0x464   :  { %v2985_v28 = vpop.eup %2984 }
 0x465   :  { %v1017_v42 = vmul.f32 %v2985_v28, %v1016_v14  ;;  %v2686_v14 = vor.u32 %v2893_v58, %v2685_v34 }
 0x467   :  { %v3882_v8 = vadd.f32 %v1018_v55, %v1017_v42  ;;  %v2725_v42 = vld [vmem:[%s4671_s6 + $0x18] sm:$0xf]  ;;  %v2904_v55 = vld [vmem:[%s4671_s6 + $0x20] sm:$0xf0] }
 0x468   :  { %v4006_v13 = vor.u32 %v2904_v55, %v2725_v42  ;;  %v2619_v42 = vld [vmem:[%s4670_s5 + $0xc] sm:$0xf0]  ;;  %v2625_v55 = vld [vmem:[%s4670_s5 + $0x8] sm:$0xf] }
 0x469   :  { %v1021_v2 = vpack.c.bf16 %v3882_v8, %v3882_v8  ;;  %v3898_v29 = vpack.c.bf16 %v3882_v8, %v3812_v11  ;;  %v3916_v11 = vor.u32 %v2919_v22, %v2785_v32  ;;  %v2888_v32 = vld [vmem:[%s4670_s5 + $0x64] sm:$0xf]  ;;  %v2667_v22 = vld [vmem:[%s4670_s5 + $0x6c] sm:$0xf0] }
 0x46b   :  { %1030 = vmatmul.bf16.vlgmr.msrb.gmra.mxu0 %v1021_v2  ;;  %1043 = vmatmul.bf16.vlgmr.msrb.gmra.mxu1 %v1021_v2 }
 0x46c   :  { %1056 = vmatmul.bf16.vlgmr.msrb.gmra.mxu2 %v1021_v2  ;;  %1632 = vmatpush.bf16.msrb.mxu1 %v3907_v60 }
 0x46d   :  { %1435 = vmatpush.bf16.msrb.mxu0 %v2710_v24  ;;  %v2649_v24 = vld [vmem:[%s4670_s5 + $0x38] sm:$0xf] }
 0x46e   :  { %v2650_v5 = vor.u32 %v2884_v46, %v2649_v24  ;;  %v2915_v46 = vld [vmem:[%s4671_s6 + $0x7c] sm:$0xf] }
 0x470   :  { %1633 = vmatpush.bf16.msrb.mxu1 %v3916_v11 }
 0x471   :  { %1436 = vmatpush.bf16.msrb.mxu0 %v2698_v54  ;;  %v2881_v54 = vld [vmem:[%s4670_s5 + $0x28] sm:$0xf0] }
 0x474   :  { %1634 = vmatpush.bf16.msrb.mxu1 %v3925_v20 }
 0x475   :  { %1437 = vmatpush.bf16.msrb.mxu0 %v2686_v14 }
 0x478   :  { %1635 = vmatpush.bf16.msrb.mxu1 %v3938_v37 }
 0x47c   :  { %1385 = vmatmul.bf16.vlgmr.msra.gmra.mxu2 %v3888_v16  ;;  %1636 = vmatpush.bf16.msrb.mxu1 %v3968_v17 }
 0x480   :  { %1637 = vmatpush.bf16.msrb.mxu1 %v3983_v27 }
 0x484   :  { %1638 = vmatpush.bf16.msrb.mxu1 %v4006_v13 }
 0x48c   :  { %1390 = vmatmul.bf16.gmra.mxu2 %v3893_v40 }
 0x49c   :  { %1395 = vmatmul.bf16.gmra.mxu2 %v3898_v29 }
 0x4e8   :  { %v1031_v63 = vpop.f32.mrf.mxu0  ;;  %v1044_v43 = vpop.f32.mrf.mxu1 }
 0x4e9   :  { %v1032_v57 = vadd.f32 %v1031_v63, %v3603_v47  ;;  %v1045_v39 = vadd.f32 %v1044_v43, %v3619_v3  ;;  %v2670_v63 = vor.u32 %v2888_v32, %v2667_v22  ;;  %v2673_v43 = vld [vmem:[%s4670_s5 + $0x68] sm:$0xf]  ;;  %v2878_v22 = vld [vmem:[%s4670_s5 + $0x10] sm:$0xf0] }
 0x4eb   :  { %v1061_v53 = vadd.f32 %v1032_v57, %v4688_v6  ;;  %v1081_v4 = vadd.f32 %v1045_v39, %v293_v0  ;;  %1409 = vmatpush.bf16.msrb.mxu3 %v2670_v63  ;;  %v2713_v0 = vld [vmem:[%s4671_s6] sm:$0xf]  ;;  %v2674_v57 = vor.u32 %v2890_v12, %v2673_v43  ;;  %v2901_v39 = vld [vmem:[%s4671_s6 + $0x8] sm:$0xf0]  ;;  %v2887_v6 = vld [vmem:[%s4670_s5 + $0x58] sm:$0xf0]  ;;  %v2626_v43 = vor.u32 %v2878_v22, %v2625_v55 }
 0x4ec   :  { %v4034_v18 = vor.u32 %v2901_v39, %v2713_v0  ;;  %v2805_v22 = vld [vmem:[%s4671_s6 + $0xb0] sm:$0xf] }
 0x4ed   :  { %v2611_v56 = vmul.f32 -1.442695, %v1061_v53  ;;  %v2612_v31 = vmul.f32 -1.442695, %v1081_v4  ;;  %1438 = vmatpush.bf16.msrb.mxu0 %v2674_v57  ;;  %v2662_v53 = vor.u32 %v2887_v6, %v2661_v51 }
 0x4ee   :  { %1639 = vmatpush.bf16.msrb.mxu1 %v4034_v18 }
 0x4ef   :  { %2986 = vpow2.f32 %v2611_v56  ;;  %v3966_v7 = vpop.f32.mrf.mxu2  ;;  %1410 = vmatpush.bf16.msrb.mxu3 %v2658_v52 }
 0x4f0   :  { %2988 = vpow2.f32 %v2612_v31  ;;  %v1033_v26 = vpop.f32.mrf.mxu0  ;;  %v1046_v41 = vpop.f32.mrf.mxu1 }
 0x4f1   :  { %1439 = vmatpush.bf16.msrb.mxu0 %v2662_v53  ;;  %v2637_v41 = vld [vmem:[%s4670_s5 + $0x20] sm:$0xf] }
 0x4f2   :  { %v2638_v45 = vor.u32 %v2881_v54, %v2637_v41  ;;  %v2751_v41 = vld [vmem:[%s4671_s6 + $0x54] sm:$0xf0] }
 0x4f3   :  { %1411 = vmatpush.bf16.msrb.mxu3 %v2646_v38 }
 0x4f5   :  { %v2987_v28 = vpop.eup %2986  ;;  %1440 = vmatpush.bf16.msrb.mxu0 %v2650_v5 }
 0x4f6   :  { %v2989_v2 = vpop.eup %2988  ;;  %v4004_v36 = vadd.f32 1.0, %v2987_v28  ;;  %v2876_v28 = vld [vmem:[%s4670_s5 + $0x4] sm:$0xf] }
 0x4f7   :  { %v4014_v49 = vadd.f32 1.0, %v2989_v2  ;;  %v1059_v30 = vpop.f32.mrf.mxu2  ;;  %1412 = vmatpush.bf16.msrb.mxu3 %v2634_v15  ;;  %v1058_v2 = vadd.f32 %v3966_v7, %v3637_v62  ;;  %v2622_v32 = vor.u32 %v2876_v28, %v2619_v42  ;;  %v4689_v7 = vld [vmem:[#allocation6_spill] sm:$0xff]  ;;  %v2739_v15 = vld [vmem:[%s4671_s6 + $0x3c] sm:$0xf0]  ;;  %v4691_v42 = vld [vmem:[#allocation8_spill] sm:$0xff] }
 0x4f8   :  { %2990 = vrcp.f32 %v4004_v36  ;;  %v1077_v26 = vand.u32 2147483648, %v4004_v36  ;;  %v1075_v19 = vand.u32 2147483647, %v4004_v36  ;;  %vm1071_vm1 = vweird.f32 %v4004_v36 }
 0x4f9   :  { %2992 = vrcp.f32 %v4014_v49  ;;  %1441 = vmatpush.bf16.msrb.mxu0 %v2638_v45  ;;  %v1097_v12 = vand.u32 2147483648, %v4014_v49  ;;  %vm1091_vm5 = vweird.f32 %v4014_v49  ;;  %v1095_v57 = vand.u32 2147483647, %v4014_v49  ;;  %v2727_v45 = vld [vmem:[%s4671_s6 + $0x24] sm:$0xf0] }
 0x4fa   :  { %v1078_v14 = vor.u32 1.1754944e-38, %v1077_v26  ;;  %vm1076_vm3 = vcmp.eq.f32.partialorder %v1075_v19, 8.507059e+37  ;;  %v2909_v26 = vld [vmem:[%s4671_s6 + $0x4c] sm:$0xf]  ;;  %v295_v55 = vadd.f32 %v4691_v42, %v3614_v61  ;;  %v2920_v61 = vld [vmem:[%s4671_s6 + $0xa0] sm:$0xf0] }
 0x4fb   :  { %1413 = vmatpush.bf16.msrb.mxu3 %v2622_v32  ;;  %v1098_v44 = vor.u32 1.1754944e-38, %v1097_v12  ;;  %vm1096_vm7 = vcmp.eq.f32.partialorder %v1095_v57, 8.507059e+37  ;;  %v4147_v54 = vor.u32 %v2909_v26, %v2751_v41  ;;  %v2905_v42 = vld [vmem:[%s4671_s6 + $0x28] sm:$0xf0] }
 0x4fd   :  { %1442 = vmatpush.bf16.msrb.mxu0 %v2626_v43 }
 0x4fe   :  { %v2991_v4 = vpop.eup %2990 }
 0x4ff   :  { %v2993_v56 = vpop.eup %2992  ;;  %v1067_v31 = vmul.f32 %v2991_v4, %v4004_v36  ;;  %vm1072_vm0 = vweird.f32 %v2991_v4 }
 0x500   :  { %v1087_v59 = vmul.f32 %v2993_v56, %v4014_v49  ;;  %vm1073_vm2 = vmor %vm1071_vm1, %vm1072_vm0  ;;  %vm1092_vm4 = vweird.f32 %v2993_v56  ;;  %v2799_v49 = vld [vmem:[%s4671_s6 + $0xb4] sm:$0xf0] }
 0x501   :  { %v1068_v10 = vsub.f32 1.0, %v1067_v31  ;;  %vm1093_vm6 = vmor %vm1091_vm5, %vm1092_vm4  ;;  %v2918_v31 = vld [vmem:[%s4671_s6 + $0x94] sm:$0xf] }
 0x502   :  { %v1088_v1 = vsub.f32 1.0, %v1087_v59  ;;  %v2775_v59 = vld [vmem:[%s4671_s6 + $0x84] sm:$0xf0] }
 0x503   :  { %v1069_v35 = vmul.f32 %v2991_v4, %v1068_v10  ;;  %v4125_v5 = vor.u32 %v2915_v46, %v2775_v59  ;;  %v4136_v10 = vor.u32 %v2912_v21, %v2763_v23  ;;  %v2757_v21 = vld [vmem:[%s4671_s6 + $0x50] sm:$0xf]  ;;  %v2911_v23 = vld [vmem:[%s4671_s6 + $0x58] sm:$0xf0] }
 0x504   :  { %v1089_v34 = vmul.f32 %v2993_v56, %v1088_v1  ;;  %v2906_v1 = vld [vmem:[%s4671_s6 + $0x34] sm:$0xf]  ;;  %v4267_v41 = vor.u32 %v2911_v23, %v2757_v21 }
 0x505   :  { %v1070_v58 = vadd.f32 %v2991_v4, %v1069_v35  ;;  %v4690_v35 = vmov 0   ;;  %v4161_v19 = vor.u32 %v2906_v1, %v2739_v15 }
 0x506   :  { %v1090_v63 = vadd.f32 %v2993_v56, %v1089_v34  ;;  %v2903_v34 = vld [vmem:[%s4671_s6 + $0x1c] sm:$0xf] }
 0x507   :  { %v1074_v36 = vsel %vm1073_vm2, %v2991_v4, %v1070_v58  ;;  %v2900_v58 = vld [vmem:[%s4671_s6 + $0x4] sm:$0xf] }
 0x508   :  { %v1079_v30 = vsel %vm1076_vm3, %v1078_v14, %v1074_v36  ;;  %v1094_v50 = vsel %vm1093_vm6, %v2993_v56, %v1090_v63  ;;  %v4104_v56 = vor.u32 %v2921_v25, %v2799_v49  ;;  %v2715_v14 = vld [vmem:[%s4671_s6 + $0xc] sm:$0xf0] }
 0x509   :  { %v1101_v0 = vmul.f32 %v1079_v30, %v1058_v2  ;;  %v1099_v51 = vsel %vm1096_vm7, %v1098_v44, %v1094_v50  ;;  %v4183_v28 = vor.u32 %v2900_v58, %v2715_v14  ;;  %v2793_v30 = vld [vmem:[%s4671_s6 + $0x98] sm:$0xf]  ;;  %v2917_v50 = vld [vmem:[%s4671_s6 + $0x88] sm:$0xf0]  ;;  %v2733_v58 = vld [vmem:[%s4671_s6 + $0x20] sm:$0xf] }
 0x50a   :  { %v1104_v52 = vsub.f32 1.0, %v1099_v51  ;;  %v1106_v4 = vmul.f32 %v1099_v51, %v3882_v8  ;;  %v2787_v8 = vld [vmem:[%s4671_s6 + $0x9c] sm:$0xf0]  ;;  %v4222_v12 = vor.u32 %v2920_v61, %v2793_v30  ;;  %v2902_v30 = vld [vmem:[%s4671_s6 + $0x10] sm:$0xf0] }
 0x50b   :  { %v1102_v39 = vadd.f32 %v1101_v0, %v4689_v7  ;;  %v4114_v38 = vor.u32 %v2918_v31, %v2787_v8  ;;  %v4692_v0 = vld [vmem:[#allocation4_spill] sm:$0xff]  ;;  %v2914_v8 = vld [vmem:[%s4671_s6 + $0x70] sm:$0xf0] }
 0x50c   :  { %v266_v57 = vadd.f32 %v4692_v0, %v3605_v48  ;;  %v2769_v31 = vld [vmem:[%s4671_s6 + $0x68] sm:$0xf] }
 0x50d   :  { %2994 = vtanh.f32 %v1102_v39  ;;  %v2781_v39 = vld [vmem:[%s4671_s6 + $0x80] sm:$0xf]  ;;  %v4254_v46 = vor.u32 %v2914_v8, %v2769_v31 }
 0x513   :  { %v2995_v6 = vpop.eup %2994 }
 0x514   :  { %v1105_v53 = vmul.f32 %v2995_v6, %v1104_v52  ;;  %v4236_v6 = vor.u32 %v2917_v50, %v2781_v39 }
 0x516   :  { %v4100_v33 = vadd.f32 %v1106_v4, %v1105_v53 }
 0x518   :  { %v1109_v24 = vpack.c.bf16 %v4100_v33, %v4100_v33 }
 0x51a   :  { %1118 = vmatmul.bf16.vlgmr.msra.gmra.mxu3 %v1109_v24  ;;  %1131 = vmatmul.bf16.vlgmr.msra.gmra.mxu0 %v1109_v24 }
 0x51b   :  { %1144 = vmatmul.bf16.vlgmr.msra.gmra.mxu1 %v1109_v24  ;;  %1719 = vmatpush.bf16.msra.mxu3 %v3907_v60 }
 0x51c   :  { %1645 = vmatpush.bf16.msra.mxu1 %v4104_v56  ;;  %1732 = vmatpush.bf16.msra.mxu0 %v4104_v56 }
 0x51f   :  { %1720 = vmatpush.bf16.msra.mxu3 %v3916_v11 }
 0x520   :  { %1646 = vmatpush.bf16.msra.mxu1 %v4114_v38  ;;  %1733 = vmatpush.bf16.msra.mxu0 %v4114_v38 }
 0x523   :  { %1721 = vmatpush.bf16.msra.mxu3 %v3925_v20 }
 0x524   :  { %1647 = vmatpush.bf16.msra.mxu1 %v4125_v5  ;;  %1734 = vmatpush.bf16.msra.mxu0 %v4125_v5 }
 0x527   :  { %1722 = vmatpush.bf16.msra.mxu3 %v3938_v37 }
 0x528   :  { %1648 = vmatpush.bf16.msra.mxu1 %v4136_v10  ;;  %1735 = vmatpush.bf16.msra.mxu0 %v4136_v10 }
 0x52a   :  { %1414 = vmatmul.bf16.vlgmr.msrb.gmra.mxu3 %v3888_v16  ;;  %1443 = vmatmul.bf16.vlgmr.msrb.gmra.mxu0 %v3888_v16  ;;  %v4172_v16 = vor.u32 %v2903_v34, %v2727_v45  ;;  %v2745_v34 = vld [vmem:[%s4671_s6 + $0x38] sm:$0xf]  ;;  %v2908_v45 = vld [vmem:[%s4671_s6 + $0x40] sm:$0xf0] }
 0x52b   :  { %1640 = vmatmul.bf16.vlgmr.msrb.gmra.mxu1 %v4690_v35  ;;  %1723 = vmatpush.bf16.msra.mxu3 %v3968_v17 }
 0x52c   :  { %1649 = vmatpush.bf16.msra.mxu1 %v4147_v54  ;;  %1736 = vmatpush.bf16.msra.mxu0 %v4147_v54 }
 0x52f   :  { %1724 = vmatpush.bf16.msra.mxu3 %v3983_v27 }
 0x530   :  { %1650 = vmatpush.bf16.msra.mxu1 %v4161_v19  ;;  %1737 = vmatpush.bf16.msra.mxu0 %v4161_v19 }
 0x533   :  { %1725 = vmatpush.bf16.msra.mxu3 %v4006_v13 }
 0x534   :  { %1651 = vmatpush.bf16.msra.mxu1 %v4172_v16  ;;  %1738 = vmatpush.bf16.msra.mxu0 %v4172_v16 }
 0x537   :  { %1726 = vmatpush.bf16.msra.mxu3 %v4034_v18 }
 0x538   :  { %1652 = vmatpush.bf16.msra.mxu1 %v4183_v28  ;;  %1739 = vmatpush.bf16.msra.mxu0 %v4183_v28 }
 0x53a   :  { %1419 = vmatmul.bf16.gmra.mxu3 %v3893_v40  ;;  %1448 = vmatmul.bf16.gmra.mxu0 %v3893_v40 }
 0x53b   :  { %1819 = vmatpush.bf16.msrb.mxu3 %v4104_v56  ;;  %1653 = vmatmul.bf16.vlgmr.msra.gmra.mxu1 %v4690_v35 }
 0x53f   :  { %1820 = vmatpush.bf16.msrb.mxu3 %v4114_v38 }
 0x543   :  { %1821 = vmatpush.bf16.msrb.mxu3 %v4125_v5 }
 0x547   :  { %1822 = vmatpush.bf16.msrb.mxu3 %v4136_v10 }
 0x54a   :  { %1424 = vmatmul.bf16.gmra.mxu3 %v3898_v29  ;;  %1453 = vmatmul.bf16.gmra.mxu0 %v3898_v29  ;;  %v2923_v29 = vld [vmem:[%s4671_s6 + $0xb8] sm:$0xf0] }
 0x54b   :  { %1823 = vmatpush.bf16.msrb.mxu3 %v4147_v54  ;;  %v4216_v63 = vor.u32 %v2923_v29, %v2805_v22  ;;  %v2721_v29 = vld [vmem:[%s4671_s6 + $0x8] sm:$0xf] }
 0x54d   :  { %1658 = vmatpush.bf16.msrb.mxu2 %v4216_v63  ;;  %1745 = vmatpush.bf16.msrb.mxu1 %v4216_v63 }
 0x54e   :  { %1832 = vmatpush.bf16.msrb.mxu0 %v4216_v63 }
 0x54f   :  { %1824 = vmatpush.bf16.msrb.mxu3 %v4161_v19 }
 0x551   :  { %1659 = vmatpush.bf16.msrb.mxu2 %v4222_v12  ;;  %1746 = vmatpush.bf16.msrb.mxu1 %v4222_v12 }
 0x552   :  { %1833 = vmatpush.bf16.msrb.mxu0 %v4222_v12 }
 0x553   :  { %1825 = vmatpush.bf16.msrb.mxu3 %v4172_v16 }
 0x555   :  { %1660 = vmatpush.bf16.msrb.mxu2 %v4236_v6  ;;  %1747 = vmatpush.bf16.msrb.mxu1 %v4236_v6 }
 0x556   :  { %1834 = vmatpush.bf16.msrb.mxu0 %v4236_v6 }
 0x557   :  { %1826 = vmatpush.bf16.msrb.mxu3 %v4183_v28 }
 0x559   :  { %1661 = vmatpush.bf16.msrb.mxu2 %v4254_v46  ;;  %1748 = vmatpush.bf16.msrb.mxu1 %v4254_v46 }
 0x55a   :  { %1835 = vmatpush.bf16.msrb.mxu0 %v4254_v46 }
 0x55d   :  { %1662 = vmatpush.bf16.msrb.mxu2 %v4267_v41  ;;  %1749 = vmatpush.bf16.msrb.mxu1 %v4267_v41 }
 0x55e   :  { %1836 = vmatpush.bf16.msrb.mxu0 %v4267_v41 }
 0x597   :  { %v1132_v40 = vpop.f32.mrf.mxu0 }
 0x598   :  { %v1133_v2 = vadd.f32 %v1132_v40, %v3619_v3  ;;  %v4205_v36 = vpop.f32.mrf.mxu1  ;;  %v4283_v40 = vor.u32 %v2908_v45, %v2745_v34  ;;  %v1241_v34 = vld [vmem:[%s4673_s7] sm:$0x7] }
 0x599   :  { %v1146_v50 = vadd.f32 %v4205_v36, %v3637_v62 }
 0x59a   :  { %v1169_v32 = vadd.f32 %v1133_v2, %v295_v55  ;;  %1663 = vmatpush.bf16.msrb.mxu2 %v4283_v40  ;;  %1750 = vmatpush.bf16.msrb.mxu1 %v4283_v40 }
 0x59b   :  { %1837 = vmatpush.bf16.msrb.mxu0 %v4283_v40 }
 0x59c   :  { %v2614_v3 = vmul.f32 -1.442695, %v1169_v32  ;;  %v4289_v32 = vor.u32 %v2905_v42, %v2733_v58 }
 0x59d   :  { %v1119_v43 = vpop.f32.mrf.mxu3 }
 0x59e   :  { %2996 = vpow2.f32 %v2614_v3  ;;  %v1120_v7 = vadd.f32 %v1119_v43, %v3603_v47  ;;  %1664 = vmatpush.bf16.msrb.mxu2 %v4289_v32  ;;  %1751 = vmatpush.bf16.msrb.mxu1 %v4289_v32 }
 0x59f   :  { %v1134_v44 = vpop.f32.mrf.mxu0  ;;  %1838 = vmatpush.bf16.msrb.mxu0 %v4289_v32 }
 0x5a0   :  { %v1149_v51 = vadd.f32 %v1120_v7, %v266_v57  ;;  %v1147_v52 = vpop.f32.mrf.mxu1  ;;  %v4303_v7 = vor.u32 %v2902_v30, %v2721_v29  ;;  %v4366_v29 = vperm.slane %v1241_v34, 1 }
 0x5a2   :  { %v2613_v47 = vmul.f32 -1.442695, %v1149_v51  ;;  %1665 = vmatpush.bf16.msrb.mxu2 %v4303_v7  ;;  %1752 = vmatpush.bf16.msrb.mxu1 %v4303_v7 }
 0x5a3   :  { %1839 = vmatpush.bf16.msrb.mxu0 %v4303_v7 }
 0x5a4   :  { %v2997_v48 = vpop.eup %2996  ;;  %2998 = vpow2.f32 %v2613_v47  ;;  %v4693_v47 = vld [vmem:[#allocation9_spill] sm:$0xff] }
 0x5a5   :  { %v4240_v53 = vadd.f32 1.0, %v2997_v48  ;;  %v1121_v4 = vpop.f32.mrf.mxu3  ;;  %v324_v48 = vadd.f32 %v4693_v47, %v3630_v9 }
 0x5a6   :  { %1806 = vmatpush.bf16.msra.mxu2 %v3907_v60  ;;  %1893 = vmatpush.bf16.msra.mxu1 %v3907_v60 }
 0x5a7   :  { %3000 = vrcp.f32 %v4240_v53  ;;  %v1185_v4 = vand.u32 2147483648, %v4240_v53  ;;  %vm1179_vm13 = vweird.f32 %v4240_v53  ;;  %v1183_v62 = vand.u32 2147483647, %v4240_v53 }
 0x5a8   :  { %v4246_v25 = vpop.f32.mrf.mxu1 }
 0x5a9   :  { %v1186_v31 = vor.u32 1.1754944e-38, %v1185_v4  ;;  %vm1184_vm15 = vcmp.eq.f32.partialorder %v1183_v62, 8.507059e+37 }
 0x5aa   :  { %v2999_v49 = vpop.eup %2998  ;;  %1807 = vmatpush.bf16.msra.mxu2 %v3916_v11  ;;  %1894 = vmatpush.bf16.msra.mxu1 %v3916_v11 }
 0x5ab   :  { %v1153_v24 = vadd.f32 1.0, %v2999_v49 }
 0x5ad   :  { %3002 = vrcp.f32 %v1153_v24  ;;  %v4256_v59 = vpop.eup %3000  ;;  %v1165_v22 = vand.u32 2147483648, %v1153_v24  ;;  %v1163_v3 = vand.u32 2147483647, %v1153_v24  ;;  %vm1159_vm9 = vweird.f32 %v1153_v24  ;;  %v1415_v30 = vpop.f32.mrf.mxu3 }
 0x5ae   :  { %v1175_v1 = vmul.f32 %v4256_v59, %v4240_v53  ;;  %vm1180_vm12 = vweird.f32 %v4256_v59  ;;  %1808 = vmatpush.bf16.msra.mxu2 %v3925_v20  ;;  %1895 = vmatpush.bf16.msra.mxu1 %v3925_v20 }
 0x5af   :  { %v1166_v39 = vor.u32 1.1754944e-38, %v1165_v22  ;;  %vm1164_vm11 = vcmp.eq.f32.partialorder %v1163_v3, 8.507059e+37  ;;  %vm1181_vm14 = vmor %vm1179_vm13, %vm1180_vm12 }
 0x5b0   :  { %v1643_v26 = vpop.f32.mrf.mxu1  ;;  %v1176_v55 = vsub.f32 1.0, %v1175_v1 }
 0x5b2   :  { %v1177_v0 = vmul.f32 %v4256_v59, %v1176_v55  ;;  %1809 = vmatpush.bf16.msra.mxu2 %v3938_v37  ;;  %1896 = vmatpush.bf16.msra.mxu1 %v3938_v37 }
 0x5b3   :  { %v3003_v15 = vpop.eup %3002 }
 0x5b4   :  { %v1155_v14 = vmul.f32 %v3003_v15, %v1153_v24  ;;  %vm1160_vm8 = vweird.f32 %v3003_v15  ;;  %v1178_v52 = vadd.f32 %v4256_v59, %v1177_v0 }
 0x5b5   :  { %vm1161_vm10 = vmor %vm1159_vm9, %vm1160_vm8 }
 0x5b6   :  { %v1156_v2 = vsub.f32 1.0, %v1155_v14  ;;  %v1182_v9 = vsel %vm1181_vm14, %v4256_v59, %v1178_v52  ;;  %1810 = vmatpush.bf16.msra.mxu2 %v3968_v17  ;;  %1897 = vmatpush.bf16.msra.mxu1 %v3968_v17  ;;  %v4359_v14 = vperm.slane %v1241_v34, 0 }
 0x5b7   :  { %v1187_v8 = vsel %vm1184_vm15, %v1186_v31, %v1182_v9 }
 0x5b8   :  { %v1157_v61 = vmul.f32 %v3003_v15, %v1156_v2  ;;  %v4299_v43 = vpop.f32.mrf.mxu1  ;;  %v1192_v53 = vsub.f32 1.0, %v1187_v8  ;;  %v1194_v26 = vmul.f32 %v1187_v8, %v4100_v33 }
 0x5ba   :  { %v1158_v57 = vadd.f32 %v3003_v15, %v1157_v61  ;;  %1811 = vmatpush.bf16.msra.mxu2 %v3983_v27  ;;  %1898 = vmatpush.bf16.msra.mxu1 %v3983_v27 }
 0x5bc   :  { %v1162_v44 = vsel %vm1161_vm10, %v3003_v15, %v1158_v57  ;;  %v1416_v57 = vadd.f32 %v1415_v30, %v4366_v29 }
 0x5bd   :  { %v1167_v51 = vsel %vm1164_vm11, %v1166_v39, %v1162_v44 }
 0x5be   :  { %v1189_v49 = vmul.f32 %v1167_v51, %v1146_v50  ;;  %1812 = vmatpush.bf16.msra.mxu2 %v4006_v13  ;;  %1899 = vmatpush.bf16.msra.mxu1 %v4006_v13 }
 0x5c0   :  { %v1190_v36 = vadd.f32 %v1189_v49, %v324_v48  ;;  %v1656_v24 = vpop.f32.mrf.mxu1 }
 0x5c2   :  { %3004 = vtanh.f32 %v1190_v36  ;;  %1813 = vmatpush.bf16.msra.mxu2 %v4034_v18  ;;  %1900 = vmatpush.bf16.msra.mxu1 %v4034_v18 }
 0x5c8   :  { %v3005_v21 = vpop.eup %3004 }
 0x5c9   :  { %v1193_v23 = vmul.f32 %v3005_v21, %v1192_v53 }
 0x5cb   :  { %v1195_v1 = vadd.f32 %v1194_v26, %v1193_v23 }
 0x5cd   :  { %v1208_v59 = vpack.c.bf16 %v1195_v1, %v4100_v33  ;;  %v1386_v33 = vpop.f32.mrf.mxu2 }
 0x5ce   :  { %v1387_v55 = vadd.f32 %v1386_v33, %v4359_v14 }
 0x5cf   :  { %1400 = vmatmul.bf16.gmra.mxu2 %v1208_v59  ;;  %1429 = vmatmul.bf16.gmra.mxu3 %v1208_v59 }
 0x5d0   :  { %1458 = vmatmul.bf16.gmra.mxu0 %v1208_v59  ;;  %v4383_v59 = vperm.slane %v1241_v34, 2 }
 0x5d5   :  { %v4347_v15 = vpop.f32.mrf.mxu2 }
 0x5dd   :  { %v4357_v58 = vpop.f32.mrf.mxu2 }
 0x5df   :  { %1666 = vmatmul.bf16.vlgmr.msrb.gmra.mxu2 %v4690_v35  ;;  %v1496_v35 = vld [vmem:[%s4672_s8] sm:$0x7] }
 0x5e0   :  { %1906 = vmatpush.bf16.msrb.mxu2 %v4104_v56  ;;  %v4355_v45 = vperm.slane %v1496_v35, 0  ;;  %v4364_v2 = vperm.slane %v1496_v35, 1  ;;  %v4381_v23 = vperm.slane %v1496_v35, 2 }
 0x5e2   :  { %v1642_v42 = vadd.f32 %v4246_v25, %v4355_v45  ;;  %v1655_v3 = vadd.f32 %v4299_v43, %v4364_v2 }
 0x5e4   :  { %1907 = vmatpush.bf16.msrb.mxu2 %v4114_v38  ;;  %v1671_v22 = vadd.f32 %v1642_v42, %v1387_v55  ;;  %v1691_v39 = vadd.f32 %v1655_v3, %v1416_v57  ;;  %v1444_v42 = vpop.f32.mrf.mxu0 }
 0x5e5   :  { %v4368_v61 = vpop.f32.mrf.mxu2  ;;  %v1445_v57 = vadd.f32 %v1444_v42, %v4383_v59 }
 0x5e6   :  { %v2807_v0 = vmul.f32 -1.442695, %v1671_v22  ;;  %v2808_v50 = vmul.f32 -1.442695, %v1691_v39 }
 0x5e8   :  { %1908 = vmatpush.bf16.msrb.mxu2 %v4125_v5  ;;  %3006 = vpow2.f32 %v2807_v0 }
 0x5e9   :  { %3008 = vpow2.f32 %v2808_v50 }
 0x5ec   :  { %1909 = vmatpush.bf16.msrb.mxu2 %v4136_v10 }
 0x5ed   :  { %v4373_v25 = vpop.f32.mrf.mxu2 }
 0x5ee   :  { %v3007_v44 = vpop.eup %3006 }
 0x5ef   :  { %v1675_v51 = vadd.f32 1.0, %v3007_v44  ;;  %v3009_v52 = vpop.eup %3008 }
 0x5f0   :  { %1910 = vmatpush.bf16.msrb.mxu2 %v4147_v54  ;;  %v1695_v48 = vadd.f32 1.0, %v3009_v52 }
 0x5f1   :  { %3010 = vrcp.f32 %v1675_v51  ;;  %v1687_v21 = vand.u32 2147483648, %v1675_v51  ;;  %vm1681_vm1 = vweird.f32 %v1675_v51  ;;  %v1685_v26 = vand.u32 2147483647, %v1675_v51 }
 0x5f2   :  { %3012 = vrcp.f32 %v1695_v48  ;;  %v1707_v39 = vand.u32 2147483648, %v1695_v48  ;;  %vm1701_vm5 = vweird.f32 %v1695_v48  ;;  %v1705_v50 = vand.u32 2147483647, %v1695_v48 }
 0x5f3   :  { %v1688_v22 = vor.u32 1.1754944e-38, %v1687_v21  ;;  %vm1686_vm3 = vcmp.eq.f32.partialorder %v1685_v26, 8.507059e+37 }
 0x5f4   :  { %1911 = vmatpush.bf16.msrb.mxu2 %v4161_v19  ;;  %vm1706_vm7 = vcmp.eq.f32.partialorder %v1705_v50, 8.507059e+37 }
 0x5f5   :  { %v4375_v47 = vpop.f32.mrf.mxu2 }
 0x5f7   :  { %v3011_v4 = vpop.eup %3010 }
 0x5f8   :  { %1912 = vmatpush.bf16.msrb.mxu2 %v4172_v16  ;;  %v1677_v49 = vmul.f32 %v3011_v4, %v1675_v51  ;;  %v3013_v62 = vpop.eup %3012  ;;  %vm1682_vm0 = vweird.f32 %v3011_v4  ;;  %v1708_v51 = vor.u32 1.1754944e-38, %v1707_v39 }
 0x5f9   :  { %v1697_v24 = vmul.f32 %v3013_v62, %v1695_v48  ;;  %vm1683_vm2 = vmor %vm1681_vm1, %vm1682_vm0  ;;  %vm1702_vm4 = vweird.f32 %v3013_v62  ;;  %v1446_v48 = vpop.f32.mrf.mxu0 }
 0x5fa   :  { %v1678_v36 = vsub.f32 1.0, %v1677_v49  ;;  %vm1703_vm6 = vmor %vm1701_vm5, %vm1702_vm4 }
 0x5fb   :  { %v1698_v8 = vsub.f32 1.0, %v1697_v24 }
 0x5fc   :  { %1913 = vmatpush.bf16.msrb.mxu2 %v4183_v28  ;;  %v1679_v9 = vmul.f32 %v3011_v4, %v1678_v36 }
 0x5fd   :  { %v1699_v1 = vmul.f32 %v3013_v62, %v1698_v8 }
 0x5fe   :  { %v1680_v53 = vadd.f32 %v3011_v4, %v1679_v9 }
 0x5ff   :  { %v1700_v0 = vadd.f32 %v3013_v62, %v1699_v1 }
 0x600   :  { %v1684_v33 = vsel %vm1683_vm2, %v3011_v4, %v1680_v53 }
 0x601   :  { %v1689_v3 = vsel %vm1686_vm3, %v1688_v22, %v1684_v33  ;;  %v1704_v34 = vsel %vm1703_vm6, %v3013_v62, %v1700_v0  ;;  %v1417_v62 = vpop.f32.mrf.mxu3  ;;  %v4415_v21 = vpop.f32.mrf.mxu0 }
 0x602   :  { %v1709_v4 = vsel %vm1706_vm7, %v1708_v51, %v1704_v34  ;;  %v1418_v50 = vadd.f32 %v1417_v62, %v4366_v29 }
 0x603   :  { %v1714_v49 = vsub.f32 1.0, %v1709_v4  ;;  %v1716_v9 = vmul.f32 0.0, %v1709_v4 }
 0x609   :  { %v4417_v26 = vpop.f32.mrf.mxu3  ;;  %v4419_v1 = vpop.f32.mrf.mxu0 }
 0x611   :  { %v4421_v33 = vpop.f32.mrf.mxu3  ;;  %v4423_v42 = vpop.f32.mrf.mxu0 }
 0x619   :  { %v4427_v22 = vpop.f32.mrf.mxu0 }
 0x61a   :  { %4696 = vst [vmem:[#allocation3_spill] sm:$0xff] %v4427_v22 }
 0x652   :  { %v4377_v43 = vpop.f32.mrf.mxu2 }
 0x653   :  { %4694 = vst [vmem:[#allocation5_spill] sm:$0xff] %v4377_v43 }
 0x65a   :  { %v4379_v31 = vpop.f32.mrf.mxu2 }
 0x65b   :  { %4695 = vst [vmem:[#allocation7_spill] sm:$0xff] %v4379_v31 }
 0x662   :  { %v1667_v55 = vpop.f32.mrf.mxu2 }
 0x663   :  { %v1668_v30 = vadd.f32 %v1667_v55, %v4381_v23  ;;  %v4425_v55 = vpop.f32.mrf.mxu3 }
 0x665   :  { %v1711_v35 = vmul.f32 %v1689_v3, %v1668_v30  ;;  %v4431_v3 = vpop.f32.mrf.mxu0 }
 0x666   :  { %4697 = vst [vmem:[#allocation6_spill] sm:$0xff] %v4431_v3 }
 0x667   :  { %v1712_v44 = vadd.f32 %v1711_v35, %v1445_v57 }
 0x669   :  { %3014 = vtanh.f32 %v1712_v44 }
 0x66a   :  { %v1669_v52 = vpop.f32.mrf.mxu2 }
 0x66b   :  { %v4429_v30 = vpop.f32.mrf.mxu3 }
 0x66d   :  { %v4435_v57 = vpop.f32.mrf.mxu0 }
 0x66e   :  { %4699 = vst [vmem:[#allocation4_spill] sm:$0xff] %v4435_v57 }
 0x66f   :  { %v3015_v36 = vpop.eup %3014 }
 0x670   :  { %v1715_v24 = vmul.f32 %v3015_v36, %v1714_v49  ;;  %v1389_v49 = vadd.f32 %v4347_v15, %v4359_v14 }
 0x672   :  { %v4387_v8 = vadd.f32 %v1716_v9, %v1715_v24 }
 0x673   :  { %v4433_v0 = vpop.f32.mrf.mxu3 }
 0x674   :  { %v1718_v53 = vpack.c.bf16 %v4387_v8, %v4387_v8  ;;  %4698 = vst [vmem:[#allocation8_spill] sm:$0xff] %v4433_v0 }
 0x676   :  { %1727 = vmatmul.bf16.vlgmr.msra.gmra.mxu3 %v1718_v53  ;;  %1740 = vmatmul.bf16.vlgmr.msra.gmra.mxu0 %v1718_v53 }
 0x677   :  { %1753 = vmatmul.bf16.vlgmr.msrb.gmra.mxu1 %v1718_v53  ;;  %1919 = vmatpush.bf16.msra.mxu3 %v4216_v63 }
 0x678   :  { %1980 = vmatpush.bf16.msra.mxu0 %v3907_v60  ;;  %1993 = vmatpush.bf16.msrb.mxu1 %v4104_v56 }
 0x67b   :  { %1920 = vmatpush.bf16.msra.mxu3 %v4222_v12  ;;  %v4437_v35 = vpop.f32.mrf.mxu3 }
 0x67c   :  { %1981 = vmatpush.bf16.msra.mxu0 %v3916_v11  ;;  %1994 = vmatpush.bf16.msrb.mxu1 %v4114_v38  ;;  %4700 = vst [vmem:[#allocation9_spill] sm:$0xff] %v4437_v35 }
 0x67f   :  { %1921 = vmatpush.bf16.msra.mxu3 %v4236_v6 }
 0x680   :  { %1982 = vmatpush.bf16.msra.mxu0 %v3925_v20  ;;  %1995 = vmatpush.bf16.msrb.mxu1 %v4125_v5 }
 0x683   :  { %1922 = vmatpush.bf16.msra.mxu3 %v4254_v46 }
 0x684   :  { %1983 = vmatpush.bf16.msra.mxu0 %v3938_v37  ;;  %1996 = vmatpush.bf16.msrb.mxu1 %v4136_v10 }
 0x687   :  { %1923 = vmatpush.bf16.msra.mxu3 %v4267_v41 }
 0x688   :  { %1984 = vmatpush.bf16.msra.mxu0 %v3968_v17  ;;  %1997 = vmatpush.bf16.msrb.mxu1 %v4147_v54 }
 0x68b   :  { %1924 = vmatpush.bf16.msra.mxu3 %v4283_v40 }
 0x68c   :  { %1985 = vmatpush.bf16.msra.mxu0 %v3983_v27  ;;  %1998 = vmatpush.bf16.msrb.mxu1 %v4161_v19 }
 0x68f   :  { %1925 = vmatpush.bf16.msra.mxu3 %v4289_v32 }
 0x690   :  { %1986 = vmatpush.bf16.msra.mxu0 %v4006_v13  ;;  %1999 = vmatpush.bf16.msrb.mxu1 %v4172_v16 }
 0x693   :  { %1926 = vmatpush.bf16.msra.mxu3 %v4303_v7 }
 0x694   :  { %1987 = vmatpush.bf16.msra.mxu0 %v4034_v18  ;;  %2000 = vmatpush.bf16.msrb.mxu1 %v4183_v28 }
 0x6f3   :  { %v1741_v39 = vpop.f32.mrf.mxu0 }
 0x6f4   :  { %v1742_v44 = vadd.f32 %v1741_v39, %v4364_v2  ;;  %v1754_v34 = vpop.f32.mrf.mxu1 }
 0x6f6   :  { %v1778_v51 = vadd.f32 %v1742_v44, %v1418_v50 }
 0x6f8   :  { %v2810_v52 = vmul.f32 -1.442695, %v1778_v51 }
 0x6f9   :  { %v1728_v4 = vpop.f32.mrf.mxu3 }
 0x6fa   :  { %3016 = vpow2.f32 %v2810_v52  ;;  %v1729_v36 = vadd.f32 %v1728_v4, %v4355_v45 }
 0x6fb   :  { %v1743_v24 = vpop.f32.mrf.mxu0 }
 0x6fc   :  { %v1758_v9 = vadd.f32 %v1729_v36, %v1389_v49  ;;  %v1756_v53 = vpop.f32.mrf.mxu1 }
 0x6fe   :  { %v2809_v57 = vmul.f32 -1.442695, %v1758_v9 }
 0x700   :  { %v3017_v35 = vpop.eup %3016  ;;  %3018 = vpow2.f32 %v2809_v57 }
 0x701   :  { %v1782_v31 = vadd.f32 1.0, %v3017_v35  ;;  %v1730_v62 = vpop.f32.mrf.mxu3  ;;  %v1755_v35 = vadd.f32 %v1754_v34, %v4381_v23 }
 0x703   :  { %3020 = vrcp.f32 %v1782_v31  ;;  %vm1788_vm13 = vweird.f32 %v1782_v31 }
 0x706   :  { %v3019_v39 = vpop.eup %3018 }
 0x707   :  { %v1762_v3 = vadd.f32 1.0, %v3019_v39  ;;  %v1447_v39 = vadd.f32 %v1446_v48, %v4383_v59 }
 0x709   :  { %3022 = vrcp.f32 %v1762_v3  ;;  %v3021_v50 = vpop.eup %3020  ;;  %v1774_v43 = vand.u32 2147483648, %v1762_v3  ;;  %v1772_v49 = vand.u32 2147483647, %v1762_v3  ;;  %vm1768_vm9 = vweird.f32 %v1762_v3 }
 0x70a   :  { %v1784_v44 = vmul.f32 %v3021_v50, %v1782_v31  ;;  %vm1789_vm12 = vweird.f32 %v3021_v50 }
 0x70b   :  { %v1775_v57 = vor.u32 1.1754944e-38, %v1774_v43  ;;  %vm1773_vm11 = vcmp.eq.f32.partialorder %v1772_v49, 8.507059e+37  ;;  %vm1790_vm14 = vmor %vm1788_vm13, %vm1789_vm12 }
 0x70c   :  { %v1785_v15 = vsub.f32 1.0, %v1784_v44  ;;  %v1794_v44 = vand.u32 2147483648, %v1782_v31 }
 0x70e   :  { %v1786_v36 = vmul.f32 %v3021_v50, %v1785_v15 }
 0x70f   :  { %v3023_v51 = vpop.eup %3022 }
 0x710   :  { %v1764_v0 = vmul.f32 %v3023_v51, %v1762_v3  ;;  %vm1769_vm8 = vweird.f32 %v3023_v51  ;;  %v1787_v53 = vadd.f32 %v3021_v50, %v1786_v36 }
 0x711   :  { %vm1770_vm10 = vmor %vm1768_vm9, %vm1769_vm8 }
 0x712   :  { %v1765_v52 = vsub.f32 1.0, %v1764_v0  ;;  %v1791_v15 = vsel %vm1790_vm14, %v3021_v50, %v1787_v53  ;;  %v1392_v50 = vadd.f32 %v4357_v58, %v4359_v14 }
 0x714   :  { %v1766_v4 = vmul.f32 %v3023_v51, %v1765_v52  ;;  %v1792_v52 = vand.u32 2147483647, %v1782_v31 }
 0x716   :  { %v1767_v24 = vadd.f32 %v3023_v51, %v1766_v4  ;;  %v1795_v4 = vor.u32 1.1754944e-38, %v1794_v44  ;;  %vm1793_vm15 = vcmp.eq.f32.partialorder %v1792_v52, 8.507059e+37 }
 0x718   :  { %v1771_v9 = vsel %vm1770_vm10, %v3023_v51, %v1767_v24  ;;  %v1796_v43 = vsel %vm1793_vm15, %v1795_v4, %v1791_v15  ;;  %v1421_v24 = vadd.f32 %v4417_v26, %v4366_v29 }
 0x719   :  { %v1776_v62 = vsel %vm1773_vm11, %v1775_v57, %v1771_v9  ;;  %v1801_v3 = vsub.f32 1.0, %v1796_v43  ;;  %v1803_v49 = vmul.f32 %v1796_v43, %v4387_v8 }
 0x71a   :  { %v1798_v0 = vmul.f32 %v1776_v62, %v1755_v35 }
 0x71c   :  { %v1799_v22 = vadd.f32 %v1798_v0, %v1447_v39 }
 0x71e   :  { %3024 = vtanh.f32 %v1799_v22 }
 0x724   :  { %v3025_v34 = vpop.eup %3024 }
 0x725   :  { %v1802_v51 = vmul.f32 %v3025_v34, %v1801_v3 }
 0x727   :  { %v4447_v36 = vadd.f32 %v1803_v49, %v1802_v51 }
 0x729   :  { %v1805_v48 = vpack.c.bf16 %v4447_v36, %v4447_v36 }
 0x72b   :  { %1814 = vmatmul.bf16.vlgmr.msra.gmra.mxu2 %v1805_v48  ;;  %1827 = vmatmul.bf16.vlgmr.msrb.gmra.mxu3 %v1805_v48 }
 0x72c   :  { %1840 = vmatmul.bf16.vlgmr.msrb.gmra.mxu0 %v1805_v48  ;;  %2006 = vmatpush.bf16.msra.mxu2 %v4216_v63 }
 0x72d   :  { %2067 = vmatpush.bf16.msrb.mxu3 %v3907_v60  ;;  %2080 = vmatpush.bf16.msrb.mxu0 %v4104_v56 }
 0x730   :  { %2007 = vmatpush.bf16.msra.mxu2 %v4222_v12 }
 0x731   :  { %2068 = vmatpush.bf16.msrb.mxu3 %v3916_v11  ;;  %2081 = vmatpush.bf16.msrb.mxu0 %v4114_v38 }
 0x734   :  { %2008 = vmatpush.bf16.msra.mxu2 %v4236_v6 }
 0x735   :  { %2069 = vmatpush.bf16.msrb.mxu3 %v3925_v20  ;;  %2082 = vmatpush.bf16.msrb.mxu0 %v4125_v5 }
 0x738   :  { %2009 = vmatpush.bf16.msra.mxu2 %v4254_v46 }
 0x739   :  { %2070 = vmatpush.bf16.msrb.mxu3 %v3938_v37  ;;  %2083 = vmatpush.bf16.msrb.mxu0 %v4136_v10 }
 0x73c   :  { %2010 = vmatpush.bf16.msra.mxu2 %v4267_v41 }
 0x73d   :  { %2071 = vmatpush.bf16.msrb.mxu3 %v3968_v17  ;;  %2084 = vmatpush.bf16.msrb.mxu0 %v4147_v54 }
 0x740   :  { %2011 = vmatpush.bf16.msra.mxu2 %v4283_v40 }
 0x741   :  { %2072 = vmatpush.bf16.msrb.mxu3 %v3983_v27  ;;  %2085 = vmatpush.bf16.msrb.mxu0 %v4161_v19 }
 0x744   :  { %2012 = vmatpush.bf16.msra.mxu2 %v4289_v32 }
 0x745   :  { %2073 = vmatpush.bf16.msrb.mxu3 %v4006_v13  ;;  %2086 = vmatpush.bf16.msrb.mxu0 %v4172_v16 }
 0x748   :  { %2013 = vmatpush.bf16.msra.mxu2 %v4303_v7 }
 0x749   :  { %2074 = vmatpush.bf16.msrb.mxu3 %v4034_v18  ;;  %2087 = vmatpush.bf16.msrb.mxu0 %v4183_v28 }
 0x7a9   :  { %v1841_v31 = vpop.f32.mrf.mxu0 }
 0x7ae   :  { %v1815_v8 = vpop.f32.mrf.mxu2  ;;  %v1828_v22 = vpop.f32.mrf.mxu3 }
 0x7af   :  { %v1816_v57 = vadd.f32 %v1815_v8, %v4355_v45  ;;  %v1829_v35 = vadd.f32 %v1828_v22, %v4364_v2 }
 0x7b1   :  { %v1845_v9 = vadd.f32 %v1816_v57, %v1392_v50  ;;  %v1865_v53 = vadd.f32 %v1829_v35, %v1421_v24  ;;  %v1843_v62 = vpop.f32.mrf.mxu0 }
 0x7b3   :  { %v2811_v39 = vmul.f32 -1.442695, %v1845_v9  ;;  %v2812_v44 = vmul.f32 -1.442695, %v1865_v53  ;;  %v1842_v9 = vadd.f32 %v1841_v31, %v4381_v23 }
 0x7b5   :  { %3026 = vpow2.f32 %v2811_v39 }
 0x7b6   :  { %3028 = vpow2.f32 %v2812_v44  ;;  %v1817_v0 = vpop.f32.mrf.mxu2  ;;  %v1830_v52 = vpop.f32.mrf.mxu3  ;;  %v1450_v44 = vadd.f32 %v4415_v21, %v4383_v59 }
 0x7bb   :  { %v3027_v15 = vpop.eup %3026 }
 0x7bc   :  { %v3029_v4 = vpop.eup %3028  ;;  %v1849_v43 = vadd.f32 1.0, %v3027_v15 }
 0x7bd   :  { %v1869_v58 = vadd.f32 1.0, %v3029_v4 }
 0x7be   :  { %3030 = vrcp.f32 %v1849_v43  ;;  %v1861_v48 = vand.u32 2147483648, %v1849_v43  ;;  %v1859_v50 = vand.u32 2147483647, %v1849_v43  ;;  %vm1855_vm1 = vweird.f32 %v1849_v43 }
 0x7bf   :  { %3032 = vrcp.f32 %v1869_v58  ;;  %v1881_v52 = vand.u32 2147483648, %v1869_v58  ;;  %vm1875_vm5 = vweird.f32 %v1869_v58  ;;  %v1879_v15 = vand.u32 2147483647, %v1869_v58 }
 0x7c0   :  { %v1862_v35 = vor.u32 1.1754944e-38, %v1861_v48  ;;  %vm1860_vm3 = vcmp.eq.f32.partialorder %v1859_v50, 8.507059e+37 }
 0x7c1   :  { %vm1880_vm7 = vcmp.eq.f32.partialorder %v1879_v15, 8.507059e+37 }
 0x7c4   :  { %v3031_v26 = vpop.eup %3030 }
 0x7c5   :  { %v3033_v3 = vpop.eup %3032  ;;  %v1851_v34 = vmul.f32 %v3031_v26, %v1849_v43  ;;  %vm1856_vm0 = vweird.f32 %v3031_v26  ;;  %v1882_v43 = vor.u32 1.1754944e-38, %v1881_v52 }
 0x7c6   :  { %v1871_v51 = vmul.f32 %v3033_v3, %v1869_v58  ;;  %vm1857_vm2 = vmor %vm1855_vm1, %vm1856_vm0  ;;  %vm1876_vm4 = vweird.f32 %v3033_v3  ;;  %v1394_v58 = vadd.f32 %v4368_v61, %v4359_v14 }
 0x7c7   :  { %v1852_v49 = vsub.f32 1.0, %v1851_v34  ;;  %vm1877_vm6 = vmor %vm1875_vm5, %vm1876_vm4 }
 0x7c8   :  { %v1872_v8 = vsub.f32 1.0, %v1871_v51 }
 0x7c9   :  { %v1853_v22 = vmul.f32 %v3031_v26, %v1852_v49 }
 0x7ca   :  { %v1873_v24 = vmul.f32 %v3033_v3, %v1872_v8 }
 0x7cb   :  { %v1854_v57 = vadd.f32 %v3031_v26, %v1853_v22 }
 0x7cc   :  { %v1874_v39 = vadd.f32 %v3033_v3, %v1873_v24 }
 0x7cd   :  { %v1858_v53 = vsel %vm1857_vm2, %v3031_v26, %v1854_v57  ;;  %v1423_v57 = vadd.f32 %v4421_v33, %v4366_v29 }
 0x7ce   :  { %v1863_v62 = vsel %vm1860_vm3, %v1862_v35, %v1858_v53  ;;  %v1878_v34 = vsel %vm1877_vm6, %v3033_v3, %v1874_v39 }
 0x7cf   :  { %v1885_v0 = vmul.f32 %v1863_v62, %v1842_v9  ;;  %v1883_v51 = vsel %vm1880_vm7, %v1882_v43, %v1878_v34 }
 0x7d0   :  { %v1888_v31 = vsub.f32 1.0, %v1883_v51  ;;  %v1890_v48 = vmul.f32 %v1883_v51, %v4447_v36 }
 0x7d1   :  { %v1886_v4 = vadd.f32 %v1885_v0, %v1450_v44 }
 0x7d3   :  { %3034 = vtanh.f32 %v1886_v4 }
 0x7d9   :  { %v3035_v26 = vpop.eup %3034 }
 0x7da   :  { %v1889_v49 = vmul.f32 %v3035_v26, %v1888_v31 }
 0x7dc   :  { %v4485_v8 = vadd.f32 %v1890_v48, %v1889_v49 }
 0x7de   :  { %v1892_v21 = vpack.c.bf16 %v4485_v8, %v4485_v8 }
 0x7e0   :  { %1901 = vmatmul.bf16.vlgmr.msra.gmra.mxu1 %v1892_v21  ;;  %1914 = vmatmul.bf16.vlgmr.msrb.gmra.mxu2 %v1892_v21 }
 0x7e1   :  { %1927 = vmatmul.bf16.vlgmr.msra.gmra.mxu3 %v1892_v21  ;;  %2093 = vmatpush.bf16.msra.mxu1 %v4216_v63 }
 0x7e2   :  { %2154 = vmatpush.bf16.msrb.mxu2 %v3907_v60  ;;  %2167 = vmatpush.bf16.msra.mxu3 %v4104_v56 }
 0x7e5   :  { %2094 = vmatpush.bf16.msra.mxu1 %v4222_v12 }
 0x7e6   :  { %2155 = vmatpush.bf16.msrb.mxu2 %v3916_v11  ;;  %2168 = vmatpush.bf16.msra.mxu3 %v4114_v38 }
 0x7e9   :  { %2095 = vmatpush.bf16.msra.mxu1 %v4236_v6 }
 0x7ea   :  { %2156 = vmatpush.bf16.msrb.mxu2 %v3925_v20  ;;  %2169 = vmatpush.bf16.msra.mxu3 %v4125_v5 }
 0x7ed   :  { %2096 = vmatpush.bf16.msra.mxu1 %v4254_v46 }
 0x7ee   :  { %2157 = vmatpush.bf16.msrb.mxu2 %v3938_v37  ;;  %2170 = vmatpush.bf16.msra.mxu3 %v4136_v10 }
 0x7f1   :  { %2097 = vmatpush.bf16.msra.mxu1 %v4267_v41 }
 0x7f2   :  { %2158 = vmatpush.bf16.msrb.mxu2 %v3968_v17  ;;  %2171 = vmatpush.bf16.msra.mxu3 %v4147_v54 }
 0x7f5   :  { %2098 = vmatpush.bf16.msra.mxu1 %v4283_v40 }
 0x7f6   :  { %2159 = vmatpush.bf16.msrb.mxu2 %v3983_v27  ;;  %2172 = vmatpush.bf16.msra.mxu3 %v4161_v19 }
 0x7f9   :  { %2099 = vmatpush.bf16.msra.mxu1 %v4289_v32 }
 0x7fa   :  { %2160 = vmatpush.bf16.msrb.mxu2 %v4006_v13  ;;  %2173 = vmatpush.bf16.msra.mxu3 %v4172_v16 }
 0x7fd   :  { %2100 = vmatpush.bf16.msra.mxu1 %v4303_v7 }
 0x7fe   :  { %2161 = vmatpush.bf16.msrb.mxu2 %v4034_v18  ;;  %2174 = vmatpush.bf16.msra.mxu3 %v4183_v28 }
 0x85d   :  { %v1902_v36 = vpop.f32.mrf.mxu1 }
 0x85e   :  { %v1903_v3 = vadd.f32 %v1902_v36, %v4355_v45 }
 0x860   :  { %v1932_v22 = vadd.f32 %v1903_v3, %v1394_v58 }
 0x862   :  { %v2813_v50 = vmul.f32 -1.442695, %v1932_v22 }
 0x863   :  { %v1915_v24 = vpop.f32.mrf.mxu2 }
 0x864   :  { %3036 = vpow2.f32 %v2813_v50  ;;  %v1916_v35 = vadd.f32 %v1915_v24, %v4364_v2  ;;  %v1928_v9 = vpop.f32.mrf.mxu3  ;;  %v1452_v50 = vadd.f32 %v4419_v1, %v4383_v59 }
 0x865   :  { %v1904_v53 = vpop.f32.mrf.mxu1  ;;  %v1929_v3 = vadd.f32 %v1928_v9, %v4381_v23 }
 0x866   :  { %v1952_v62 = vadd.f32 %v1916_v35, %v1423_v57 }
 0x868   :  { %v2814_v39 = vmul.f32 -1.442695, %v1952_v62 }
 0x86a   :  { %v3037_v44 = vpop.eup %3036  ;;  %3038 = vpow2.f32 %v2814_v39 }
 0x86b   :  { %v1936_v0 = vadd.f32 1.0, %v3037_v44  ;;  %v1917_v52 = vpop.f32.mrf.mxu2 }
 0x86c   :  { %v1930_v61 = vpop.f32.mrf.mxu3 }
 0x86d   :  { %3040 = vrcp.f32 %v1936_v0  ;;  %v1948_v33 = vand.u32 2147483648, %v1936_v0  ;;  %v1946_v26 = vand.u32 2147483647, %v1936_v0  ;;  %vm1942_vm9 = vweird.f32 %v1936_v0 }
 0x86f   :  { %v1949_v36 = vor.u32 1.1754944e-38, %v1948_v33  ;;  %vm1947_vm11 = vcmp.eq.f32.partialorder %v1946_v26, 8.507059e+37 }
 0x870   :  { %v3039_v15 = vpop.eup %3038 }
 0x871   :  { %v1956_v4 = vadd.f32 1.0, %v3039_v15 }
 0x873   :  { %v3041_v34 = vpop.eup %3040  ;;  %3042 = vrcp.f32 %v1956_v4  ;;  %v1968_v35 = vand.u32 2147483648, %v1956_v4  ;;  %v1966_v62 = vand.u32 2147483647, %v1956_v4  ;;  %vm1962_vm13 = vweird.f32 %v1956_v4 }
 0x874   :  { %v1938_v43 = vmul.f32 %v3041_v34, %v1936_v0  ;;  %vm1943_vm8 = vweird.f32 %v3041_v34 }
 0x875   :  { %vm1944_vm10 = vmor %vm1942_vm9, %vm1943_vm8  ;;  %v1969_v0 = vor.u32 1.1754944e-38, %v1968_v35  ;;  %vm1967_vm15 = vcmp.eq.f32.partialorder %v1966_v62, 8.507059e+37 }
 0x876   :  { %v1939_v51 = vsub.f32 1.0, %v1938_v43 }
 0x878   :  { %v1940_v31 = vmul.f32 %v3041_v34, %v1939_v51 }
 0x879   :  { %v3043_v49 = vpop.eup %3042 }
 0x87a   :  { %v1958_v48 = vmul.f32 %v3043_v49, %v1956_v4  ;;  %v1941_v21 = vadd.f32 %v3041_v34, %v1940_v31  ;;  %vm1963_vm12 = vweird.f32 %v3043_v49 }
 0x87b   :  { %vm1964_vm14 = vmor %vm1962_vm13, %vm1963_vm12 }
 0x87c   :  { %v1959_v58 = vsub.f32 1.0, %v1958_v48  ;;  %v1945_v22 = vsel %vm1944_vm10, %v3041_v34, %v1941_v21 }
 0x87d   :  { %v1950_v24 = vsel %vm1947_vm11, %v1949_v36, %v1945_v22 }
 0x87e   :  { %v1960_v57 = vmul.f32 %v3043_v49, %v1959_v58  ;;  %v1972_v53 = vmul.f32 %v1950_v24, %v1929_v3 }
 0x880   :  { %v1961_v39 = vadd.f32 %v3043_v49, %v1960_v57  ;;  %v1973_v44 = vadd.f32 %v1972_v53, %v1452_v50  ;;  %v1455_v53 = vadd.f32 %v4423_v42, %v4383_v59 }
 0x882   :  { %v1965_v52 = vsel %vm1964_vm14, %v3043_v49, %v1961_v39  ;;  %3044 = vtanh.f32 %v1973_v44 }
 0x883   :  { %v1970_v9 = vsel %vm1967_vm15, %v1969_v0, %v1965_v52 }
 0x884   :  { %v1975_v61 = vsub.f32 1.0, %v1970_v9  ;;  %v1977_v1 = vmul.f32 %v1970_v9, %v4485_v8 }
 0x888   :  { %v3045_v15 = vpop.eup %3044 }
 0x889   :  { %v1976_v34 = vmul.f32 %v3045_v15, %v1975_v61 }
 0x88b   :  { %v4523_v43 = vadd.f32 %v1977_v1, %v1976_v34 }
 0x88d   :  { %v1979_v51 = vpack.c.bf16 %v4523_v43, %v4523_v43 }
 0x88f   :  { %1988 = vmatmul.bf16.vlgmr.msra.gmra.mxu0 %v1979_v51  ;;  %2001 = vmatmul.bf16.vlgmr.msrb.gmra.mxu1 %v1979_v51 }
 0x890   :  { %2014 = vmatmul.bf16.vlgmr.msra.gmra.mxu2 %v1979_v51  ;;  %2180 = vmatpush.bf16.msra.mxu0 %v4216_v63 }
 0x891   :  { %2241 = vmatpush.bf16.msrb.mxu1 %v3907_v60  ;;  %2254 = vmatpush.bf16.msra.mxu2 %v4104_v56 }
 0x894   :  { %2181 = vmatpush.bf16.msra.mxu0 %v4222_v12 }
 0x895   :  { %2242 = vmatpush.bf16.msrb.mxu1 %v3916_v11  ;;  %2255 = vmatpush.bf16.msra.mxu2 %v4114_v38 }
 0x898   :  { %2182 = vmatpush.bf16.msra.mxu0 %v4236_v6 }
 0x899   :  { %2243 = vmatpush.bf16.msrb.mxu1 %v3925_v20  ;;  %2256 = vmatpush.bf16.msra.mxu2 %v4125_v5  ;;  %v1397_v20 = vadd.f32 %v4373_v25, %v4359_v14 }
 0x89c   :  { %2183 = vmatpush.bf16.msra.mxu0 %v4254_v46 }
 0x89d   :  { %2244 = vmatpush.bf16.msrb.mxu1 %v3938_v37  ;;  %2257 = vmatpush.bf16.msra.mxu2 %v4136_v10  ;;  %v1426_v37 = vadd.f32 %v4425_v55, %v4366_v29 }
 0x8a0   :  { %2184 = vmatpush.bf16.msra.mxu0 %v4267_v41 }
 0x8a1   :  { %2245 = vmatpush.bf16.msrb.mxu1 %v3968_v17  ;;  %2258 = vmatpush.bf16.msra.mxu2 %v4147_v54 }
 0x8a4   :  { %2185 = vmatpush.bf16.msra.mxu0 %v4283_v40 }
 0x8a5   :  { %2246 = vmatpush.bf16.msrb.mxu1 %v3983_v27  ;;  %2259 = vmatpush.bf16.msra.mxu2 %v4161_v19 }
 0x8a8   :  { %2186 = vmatpush.bf16.msra.mxu0 %v4289_v32 }
 0x8a9   :  { %2247 = vmatpush.bf16.msrb.mxu1 %v4006_v13  ;;  %2260 = vmatpush.bf16.msra.mxu2 %v4172_v16 }
 0x8ac   :  { %2187 = vmatpush.bf16.msra.mxu0 %v4303_v7 }
 0x8ad   :  { %2248 = vmatpush.bf16.msrb.mxu1 %v4034_v18  ;;  %2261 = vmatpush.bf16.msra.mxu2 %v4183_v28 }
 0x90c   :  { %v1989_v60 = vpop.f32.mrf.mxu0  ;;  %v2002_v11 = vpop.f32.mrf.mxu1 }
 0x90d   :  { %v1990_v17 = vadd.f32 %v1989_v60, %v4355_v45  ;;  %v2003_v27 = vadd.f32 %v2002_v11, %v4364_v2  ;;  %v1428_v11 = vadd.f32 %v4429_v30, %v4366_v29 }
 0x90f   :  { %v2019_v13 = vadd.f32 %v1990_v17, %v1397_v20  ;;  %v2039_v56 = vadd.f32 %v2003_v27, %v1426_v37 }
 0x911   :  { %v2815_v38 = vmul.f32 -1.442695, %v2019_v13  ;;  %v2816_v5 = vmul.f32 -1.442695, %v2039_v56 }
 0x913   :  { %3046 = vpow2.f32 %v2815_v38  ;;  %v2015_v18 = vpop.f32.mrf.mxu2 }
 0x914   :  { %3048 = vpow2.f32 %v2816_v5  ;;  %v1991_v10 = vpop.f32.mrf.mxu0  ;;  %v2004_v54 = vpop.f32.mrf.mxu1  ;;  %v2016_v50 = vadd.f32 %v2015_v18, %v4381_v23 }
 0x919   :  { %v3047_v19 = vpop.eup %3046 }
 0x91a   :  { %v3049_v16 = vpop.eup %3048  ;;  %v2023_v28 = vadd.f32 1.0, %v3047_v19 }
 0x91b   :  { %v2043_v25 = vadd.f32 1.0, %v3049_v16  ;;  %v2017_v8 = vpop.f32.mrf.mxu2 }
 0x91c   :  { %3050 = vrcp.f32 %v2023_v28  ;;  %v2035_v48 = vand.u32 2147483648, %v2023_v28  ;;  %v2033_v36 = vand.u32 2147483647, %v2023_v28  ;;  %vm2029_vm1 = vweird.f32 %v2023_v28 }
 0x91d   :  { %3052 = vrcp.f32 %v2043_v25  ;;  %v2055_v62 = vand.u32 2147483648, %v2043_v25  ;;  %vm2049_vm5 = vweird.f32 %v2043_v25  ;;  %v2053_v44 = vand.u32 2147483647, %v2043_v25 }
 0x91e   :  { %v2036_v22 = vor.u32 1.1754944e-38, %v2035_v48  ;;  %vm2034_vm3 = vcmp.eq.f32.partialorder %v2033_v36, 8.507059e+37  ;;  %v4701_v48 = vld [vmem:[#allocation3_spill] sm:$0xff] }
 0x91f   :  { %v2056_v9 = vor.u32 1.1754944e-38, %v2055_v62  ;;  %vm2054_vm7 = vcmp.eq.f32.partialorder %v2053_v44, 8.507059e+37 }
 0x922   :  { %v3051_v55 = vpop.eup %3050 }
 0x923   :  { %v3053_v4 = vpop.eup %3052  ;;  %v2025_v33 = vmul.f32 %v3051_v55, %v2023_v28  ;;  %vm2030_vm0 = vweird.f32 %v3051_v55 }
 0x924   :  { %v2045_v31 = vmul.f32 %v3053_v4, %v2043_v25  ;;  %vm2031_vm2 = vmor %vm2029_vm1, %vm2030_vm0  ;;  %vm2050_vm4 = vweird.f32 %v3053_v4 }
 0x925   :  { %v2026_v26 = vsub.f32 1.0, %v2025_v33  ;;  %vm2051_vm6 = vmor %vm2049_vm5, %vm2050_vm4 }
 0x926   :  { %v2046_v49 = vsub.f32 1.0, %v2045_v31 }
 0x927   :  { %v2027_v21 = vmul.f32 %v3051_v55, %v2026_v26 }
 0x928   :  { %v2047_v58 = vmul.f32 %v3053_v4, %v2046_v49 }
 0x929   :  { %v2028_v3 = vadd.f32 %v3051_v55, %v2027_v21  ;;  %v1457_v21 = vadd.f32 %v4701_v48, %v4383_v59 }
 0x92a   :  { %v2048_v35 = vadd.f32 %v3053_v4, %v2047_v58 }
 0x92b   :  { %v2032_v24 = vsel %vm2031_vm2, %v3051_v55, %v2028_v3 }
 0x92c   :  { %v2037_v57 = vsel %vm2034_vm3, %v2036_v22, %v2032_v24  ;;  %v2052_v52 = vsel %vm2051_vm6, %v3053_v4, %v2048_v35 }
 0x92d   :  { %v2059_v39 = vmul.f32 %v2037_v57, %v2016_v50  ;;  %v2057_v61 = vsel %vm2054_vm7, %v2056_v9, %v2052_v52 }
 0x92e   :  { %v2062_v15 = vsub.f32 1.0, %v2057_v61  ;;  %v2064_v51 = vmul.f32 %v2057_v61, %v4523_v43 }
 0x92f   :  { %v2060_v0 = vadd.f32 %v2059_v39, %v1455_v53 }
 0x931   :  { %3054 = vtanh.f32 %v2060_v0 }
 0x937   :  { %v3055_v34 = vpop.eup %3054 }
 0x938   :  { %v2063_v1 = vmul.f32 %v3055_v34, %v2062_v15  ;;  %v4702_v15 = vld [vmem:[#allocation5_spill] sm:$0xff] }
 0x939   :  { %v1402_v34 = vadd.f32 %v4702_v15, %v4359_v14 }
 0x93a   :  { %v4561_v60 = vadd.f32 %v2064_v51, %v2063_v1  ;;  %v4703_v1 = vld [vmem:[#allocation8_spill] sm:$0xff] }
 0x93b   :  { %v1431_v51 = vadd.f32 %v4703_v1, %v4366_v29 }
 0x93c   :  { %v2066_v42 = vpack.c.bf16 %v4561_v60, %v4561_v60 }
 0x93e   :  { %2075 = vmatmul.bf16.vlgmr.msrb.gmra.mxu3 %v2066_v42  ;;  %2088 = vmatmul.bf16.vlgmr.msrb.gmra.mxu0 %v2066_v42 }
 0x93f   :  { %2101 = vmatmul.bf16.vlgmr.msra.gmra.mxu1 %v2066_v42  ;;  %2267 = vmatpush.bf16.msrb.mxu3 %v4216_v63 }
 0x943   :  { %2268 = vmatpush.bf16.msrb.mxu3 %v4222_v12 }
 0x947   :  { %2269 = vmatpush.bf16.msrb.mxu3 %v4236_v6 }
 0x94b   :  { %2270 = vmatpush.bf16.msrb.mxu3 %v4254_v46  ;;  %v1399_v46 = vadd.f32 %v4375_v47, %v4359_v14 }
 0x94f   :  { %2271 = vmatpush.bf16.msrb.mxu3 %v4267_v41 }
 0x953   :  { %2272 = vmatpush.bf16.msrb.mxu3 %v4283_v40 }
 0x957   :  { %2273 = vmatpush.bf16.msrb.mxu3 %v4289_v32 }
 0x95b   :  { %2274 = vmatpush.bf16.msrb.mxu3 %v4303_v7 }
 0x9bb   :  { %v2089_v43 = vpop.f32.mrf.mxu0 }
 0x9bc   :  { %v2090_v63 = vadd.f32 %v2089_v43, %v4364_v2  ;;  %v2102_v20 = vpop.f32.mrf.mxu1 }
 0x9bd   :  { %v2103_v33 = vadd.f32 %v2102_v20, %v4381_v23 }
 0x9be   :  { %v2126_v12 = vadd.f32 %v2090_v63, %v1428_v11 }
 0x9c0   :  { %v2818_v37 = vmul.f32 -1.442695, %v2126_v12 }
 0x9c1   :  { %v2076_v6 = vpop.f32.mrf.mxu3 }
 0x9c2   :  { %3056 = vpow2.f32 %v2818_v37  ;;  %v2077_v41 = vadd.f32 %v2076_v6, %v4355_v45 }
 0x9c3   :  { %v2091_v40 = vpop.f32.mrf.mxu0 }
 0x9c4   :  { %v2106_v32 = vadd.f32 %v2077_v41, %v1399_v46  ;;  %v2104_v17 = vpop.f32.mrf.mxu1 }
 0x9c6   :  { %v2817_v7 = vmul.f32 -1.442695, %v2106_v32 }
 0x9c8   :  { %v3057_v27 = vpop.eup %3056  ;;  %3058 = vpow2.f32 %v2817_v7 }
 0x9c9   :  { %v2130_v13 = vadd.f32 1.0, %v3057_v27  ;;  %v2078_v30 = vpop.f32.mrf.mxu3 }
 0x9cb   :  { %3060 = vrcp.f32 %v2130_v13  ;;  %v2142_v36 = vand.u32 2147483648, %v2130_v13  ;;  %vm2136_vm13 = vweird.f32 %v2130_v13  ;;  %v2140_v3 = vand.u32 2147483647, %v2130_v13 }
 0x9cd   :  { %v2143_v24 = vor.u32 1.1754944e-38, %v2142_v36  ;;  %vm2141_vm15 = vcmp.eq.f32.partialorder %v2140_v3, 8.507059e+37 }
 0x9ce   :  { %v3059_v56 = vpop.eup %3058 }
 0x9cf   :  { %v2110_v38 = vadd.f32 1.0, %v3059_v56 }
 0x9d1   :  { %3062 = vrcp.f32 %v2110_v38  ;;  %v3061_v5 = vpop.eup %3060  ;;  %v2122_v16 = vand.u32 2147483648, %v2110_v38  ;;  %v2120_v25 = vand.u32 2147483647, %v2110_v38  ;;  %vm2116_vm9 = vweird.f32 %v2110_v38 }
 0x9d2   :  { %v2132_v18 = vmul.f32 %v3061_v5, %v2130_v13  ;;  %vm2137_vm12 = vweird.f32 %v3061_v5 }
 0x9d3   :  { %v2123_v4 = vor.u32 1.1754944e-38, %v2122_v16  ;;  %vm2121_vm11 = vcmp.eq.f32.partialorder %v2120_v25, 8.507059e+37  ;;  %vm2138_vm14 = vmor %vm2136_vm13, %vm2137_vm12 }
 0x9d4   :  { %v2133_v47 = vsub.f32 1.0, %v2132_v18 }
 0x9d6   :  { %v2134_v8 = vmul.f32 %v3061_v5, %v2133_v47 }
 0x9d7   :  { %v3063_v10 = vpop.eup %3062 }
 0x9d8   :  { %v2112_v54 = vmul.f32 %v3063_v10, %v2110_v38  ;;  %vm2117_vm8 = vweird.f32 %v3063_v10  ;;  %v2135_v26 = vadd.f32 %v3061_v5, %v2134_v8  ;;  %v4704_v8 = vld [vmem:[#allocation6_spill] sm:$0xff] }
 0x9d9   :  { %vm2118_vm10 = vmor %vm2116_vm9, %vm2117_vm8 }
 0x9da   :  { %v2113_v19 = vsub.f32 1.0, %v2112_v54  ;;  %v2139_v50 = vsel %vm2138_vm14, %v3061_v5, %v2135_v26 }
 0x9db   :  { %v2144_v57 = vsel %vm2141_vm15, %v2143_v24, %v2139_v50 }
 0x9dc   :  { %v2114_v28 = vmul.f32 %v3063_v10, %v2113_v19  ;;  %v2149_v35 = vsub.f32 1.0, %v2144_v57  ;;  %v2151_v39 = vmul.f32 %v2144_v57, %v4561_v60  ;;  %v2342_v57 = vld [vmem:[%s4675_s9 + $0x78] sm:$0xff] }
 0x9dd   :  { %2347 = vmatpush.msrb.mxu0 %v2342_v57 }
 0x9de   :  { %v2115_v55 = vadd.f32 %v3063_v10, %v2114_v28 }
 0x9e0   :  { %v2119_v31 = vsel %vm2118_vm10, %v3063_v10, %v2115_v55  ;;  %v1460_v55 = vadd.f32 %v4704_v8, %v4383_v59 }
 0x9e1   :  { %v2124_v49 = vsel %vm2121_vm11, %v2123_v4, %v2119_v31 }
 0x9e2   :  { %v2146_v58 = vmul.f32 %v2124_v49, %v2103_v33 }
 0x9e4   :  { %v2147_v22 = vadd.f32 %v2146_v58, %v1457_v21 }
 0x9e6   :  { %3064 = vtanh.f32 %v2147_v22 }
 0x9ec   :  { %v3065_v53 = vpop.eup %3064 }
 0x9ed   :  { %v2150_v62 = vmul.f32 %v3065_v53, %v2149_v35  ;;  %v2341_v35 = vld [vmem:[%s4675_s9 + $0x70] sm:$0xff]  ;;  %v2340_v53 = vld [vmem:[%s4675_s9 + $0x68] sm:$0xff] }
 0x9ee   :  { %2348 = vmatpush.msrb.mxu0 %v2341_v35 }
 0x9ef   :  { %v4583_v44 = vadd.f32 %v2151_v39, %v2150_v62  ;;  %v2339_v62 = vld [vmem:[%s4675_s9 + $0x60] sm:$0xff]  ;;  %v2338_v39 = vld [vmem:[%s4675_s9 + $0x58] sm:$0xff] }
 0x9f0   :  { %2349 = vmatpush.msrb.mxu0 %v2340_v53 }
 0x9f1   :  { %v2153_v0 = vpack.c.bf16 %v4583_v44, %v4583_v44 }
 0x9f2   :  { %2350 = vmatpush.msrb.mxu0 %v2339_v62  ;;  %v2925_v62 = vld [vmem:[%s4674_s10] ss:$0 sm:$0xff] }
 0x9f3   :  { %2162 = vmatmul.bf16.vlgmr.msrb.gmra.mxu2 %v2153_v0  ;;  %2175 = vmatmul.bf16.vlgmr.msra.gmra.mxu3 %v2153_v0 }
 0x9f4   :  { %2188 = vmatmul.bf16.vlgmr.msra.gmra.mxu0 %v2153_v0  ;;  %v2336_v0 = vld [vmem:[%s4675_s9 + $0x48] sm:$0xff] }
 0x9f5   :  { %2351 = vmatpush.msrb.mxu0 %v2338_v39 }
 0xa71   :  { %v2189_v52 = vpop.f32.mrf.mxu0 }
 0xa72   :  { %v2190_v19 = vadd.f32 %v2189_v52, %v4381_v23 }
 0xa76   :  { %v2163_v9 = vpop.f32.mrf.mxu2  ;;  %v2176_v61 = vpop.f32.mrf.mxu3 }
 0xa77   :  { %v2164_v42 = vadd.f32 %v2163_v9, %v4355_v45  ;;  %v2177_v60 = vadd.f32 %v2176_v61, %v4364_v2  ;;  %v4705_v9 = vld [vmem:[#allocation7_spill] sm:$0xff] }
 0xa78   :  { %v1404_v61 = vadd.f32 %v4705_v9, %v4359_v14 }
 0xa79   :  { %v2193_v43 = vadd.f32 %v2164_v42, %v1402_v34  ;;  %v2213_v11 = vadd.f32 %v2177_v60, %v1431_v51  ;;  %v2191_v63 = vpop.f32.mrf.mxu0  ;;  %v2335_v34 = vld [vmem:[%s4675_s9 + $0x40] sm:$0xff]  ;;  %v2334_v51 = vld [vmem:[%s4675_s9 + $0x38] sm:$0xff]  ;;  %v2333_v60 = vld [vmem:[%s4675_s9 + $0x30] sm:$0xff] }
 0xa7b   :  { %v2819_v20 = vmul.f32 -1.442695, %v2193_v43  ;;  %v2820_v12 = vmul.f32 -1.442695, %v2213_v11 }
 0xa7d   :  { %3066 = vpow2.f32 %v2819_v20  ;;  %v2332_v20 = vld [vmem:[%s4675_s9 + $0x28] sm:$0xff] }
 0xa7e   :  { %3068 = vpow2.f32 %v2820_v12  ;;  %v2165_v37 = vpop.f32.mrf.mxu2  ;;  %v2178_v6 = vpop.f32.mrf.mxu3 }
 0xa7f   :  { %v2331_v6 = vld [vmem:[%s4675_s9 + $0x20] sm:$0xff] }
 0xa83   :  { %v3067_v46 = vpop.eup %3066 }
 0xa84   :  { %v3069_v41 = vpop.eup %3068  ;;  %v2197_v40 = vadd.f32 1.0, %v3067_v46 }
 0xa85   :  { %v2217_v32 = vadd.f32 1.0, %v3069_v41 }
 0xa86   :  { %3070 = vrcp.f32 %v2197_v40  ;;  %v2209_v56 = vand.u32 2147483648, %v2197_v40  ;;  %v2207_v18 = vand.u32 2147483647, %v2197_v40  ;;  %vm2203_vm1 = vweird.f32 %v2197_v40 }
 0xa87   :  { %3072 = vrcp.f32 %v2217_v32  ;;  %v2229_v33 = vand.u32 2147483648, %v2217_v32  ;;  %vm2223_vm5 = vweird.f32 %v2217_v32  ;;  %v2227_v31 = vand.u32 2147483647, %v2217_v32 }
 0xa88   :  { %v2210_v47 = vor.u32 1.1754944e-38, %v2209_v56  ;;  %vm2208_vm3 = vcmp.eq.f32.partialorder %v2207_v18, 8.507059e+37 }
 0xa89   :  { %v2230_v48 = vor.u32 1.1754944e-38, %v2229_v33  ;;  %vm2228_vm7 = vcmp.eq.f32.partialorder %v2227_v31, 8.507059e+37 }
 0xa8c   :  { %v3071_v17 = vpop.eup %3070 }
 0xa8d   :  { %v3073_v7 = vpop.eup %3072  ;;  %v2199_v27 = vmul.f32 %v3071_v17, %v2197_v40  ;;  %vm2204_vm0 = vweird.f32 %v3071_v17  ;;  %v2328_v40 = vld [vmem:[%s4675_s9 + $0x8] sm:$0xff] }
 0xa8e   :  { %v2219_v13 = vmul.f32 %v3073_v7, %v2217_v32  ;;  %vm2205_vm2 = vmor %vm2203_vm1, %vm2204_vm0  ;;  %vm2224_vm4 = vweird.f32 %v3073_v7 }
 0xa8f   :  { %v2200_v30 = vsub.f32 1.0, %v2199_v27  ;;  %vm2225_vm6 = vmor %vm2223_vm5, %vm2224_vm4  ;;  %v2327_v27 = vld [vmem:[%s4675_s9] sm:$0xff] }
 0xa90   :  { %v2220_v38 = vsub.f32 1.0, %v2219_v13 }
 0xa91   :  { %v2201_v5 = vmul.f32 %v3071_v17, %v2200_v30 }
 0xa92   :  { %v2221_v10 = vmul.f32 %v3073_v7, %v2220_v38 }
 0xa93   :  { %v2202_v54 = vadd.f32 %v3071_v17, %v2201_v5 }
 0xa94   :  { %v2222_v25 = vadd.f32 %v3073_v7, %v2221_v10 }
 0xa95   :  { %v2206_v16 = vsel %vm2205_vm2, %v3071_v17, %v2202_v54 }
 0xa96   :  { %v2211_v28 = vsel %vm2208_vm3, %v2210_v47, %v2206_v16  ;;  %v2226_v49 = vsel %vm2225_vm6, %v3073_v7, %v2222_v25 }
 0xa97   :  { %v2233_v4 = vmul.f32 %v2211_v28, %v2190_v19  ;;  %v2231_v21 = vsel %vm2228_vm7, %v2230_v48, %v2226_v49 }
 0xa98   :  { %v2236_v36 = vsub.f32 1.0, %v2231_v21  ;;  %v2238_v22 = vmul.f32 %v2231_v21, %v4583_v44  ;;  %v2337_v44 = vld [vmem:[%s4675_s9 + $0x50] sm:$0xff] }
 0xa99   :  { %v2234_v26 = vadd.f32 %v2233_v4, %v1460_v55  ;;  %2352 = vmatpush.msrb.mxu0 %v2337_v44  ;;  %v4707_v4 = vld [vmem:[#allocation4_spill] sm:$0xff] }
 0xa9a   :  { %v1462_v33 = vadd.f32 %v4707_v4, %v4383_v59 }
 0xa9b   :  { %3074 = vtanh.f32 %v2234_v26  ;;  %2353 = vmatpush.msrb.mxu0 %v2336_v0 }
 0xa9d   :  { %2354 = vmatpush.msrb.mxu0 %v2335_v34 }
 0xa9f   :  { %2355 = vmatpush.msrb.mxu0 %v2334_v51 }
 0xaa1   :  { %v3075_v58 = vpop.eup %3074  ;;  %2356 = vmatpush.msrb.mxu0 %v2333_v60 }
 0xaa2   :  { %v2237_v3 = vmul.f32 %v3075_v58, %v2236_v36 }
 0xaa3   :  { %2357 = vmatpush.msrb.mxu0 %v2332_v20 }
 0xaa4   :  { %v4597_v50 = vadd.f32 %v2238_v22, %v2237_v3 }
 0xaa5   :  { %2358 = vmatpush.msrb.mxu0 %v2331_v6 }
 0xaa6   :  { %v2240_v24 = vpack.c.bf16 %v4597_v50, %v4597_v50 }
 0xaa8   :  { %2249 = vmatmul.bf16.vlgmr.msrb.gmra.mxu1 %v2240_v24  ;;  %2262 = vmatmul.bf16.vlgmr.msra.gmra.mxu2 %v2240_v24 }
 0xaa9   :  { %2275 = vmatmul.bf16.vlgmr.msrb.gmra.mxu3 %v2240_v24 }
 0xb25   :  { %v2250_v52 = vpop.f32.mrf.mxu1 }
 0xb26   :  { %v2251_v15 = vadd.f32 %v2250_v52, %v4355_v45  ;;  %v4706_v45 = vld [vmem:[#allocation9_spill] sm:$0xff] }
 0xb27   :  { %v1433_v14 = vadd.f32 %v4706_v45, %v4366_v29  ;;  %v2330_v29 = vld [vmem:[%s4675_s9 + $0x18] sm:$0xff] }
 0xb28   :  { %v2280_v1 = vadd.f32 %v2251_v15, %v1404_v61  ;;  %2359 = vmatpush.msrb.mxu0 %v2330_v29 }
 0xb2a   :  { %v2821_v42 = vmul.f32 -1.442695, %v2280_v1 }
 0xb2b   :  { %v2263_v43 = vpop.f32.mrf.mxu2 }
 0xb2c   :  { %3076 = vpow2.f32 %v2821_v42  ;;  %v2264_v11 = vadd.f32 %v2263_v43, %v4364_v2  ;;  %v2276_v63 = vpop.f32.mrf.mxu3  ;;  %v2329_v2 = vld [vmem:[%s4675_s9 + $0x10] sm:$0xff] }
 0xb2d   :  { %v2252_v12 = vpop.f32.mrf.mxu1  ;;  %2360 = vmatpush.msrb.mxu0 %v2329_v2  ;;  %v2277_v8 = vadd.f32 %v2276_v63, %v4381_v23 }
 0xb2e   :  { %v2300_v37 = vadd.f32 %v2264_v11, %v1433_v14 }
 0xb2f   :  { %2361 = vmatpush.msrb.mxu0 %v2328_v40 }
 0xb30   :  { %v2822_v46 = vmul.f32 -1.442695, %v2300_v37 }
 0xb31   :  { %2362 = vmatpush.msrb.mxu0 %v2327_v27 }
 0xb32   :  { %v3077_v41 = vpop.eup %3076  ;;  %3078 = vpow2.f32 %v2822_v46 }
 0xb33   :  { %v2284_v32 = vadd.f32 1.0, %v3077_v41  ;;  %v2265_v17 = vpop.f32.mrf.mxu2 }
 0xb34   :  { %v2278_v7 = vpop.f32.mrf.mxu3 }
 0xb35   :  { %3080 = vrcp.f32 %v2284_v32  ;;  %v2296_v18 = vand.u32 2147483648, %v2284_v32  ;;  %v2294_v54 = vand.u32 2147483647, %v2284_v32  ;;  %vm2290_vm9 = vweird.f32 %v2284_v32 }
 0xb37   :  { %v2297_v28 = vor.u32 1.1754944e-38, %v2296_v18  ;;  %vm2295_vm11 = vcmp.eq.f32.partialorder %v2294_v54, 8.507059e+37 }
 0xb38   :  { %v3079_v13 = vpop.eup %3078 }
 0xb39   :  { %v2304_v30 = vadd.f32 1.0, %v3079_v13 }
 0xb3b   :  { %v3081_v56 = vpop.eup %3080  ;;  %3082 = vrcp.f32 %v2304_v30  ;;  %v2316_v49 = vand.u32 2147483648, %v2304_v30  ;;  %v2314_v21 = vand.u32 2147483647, %v2304_v30  ;;  %vm2310_vm13 = vweird.f32 %v2304_v30 }
 0xb3c   :  { %v2286_v38 = vmul.f32 %v3081_v56, %v2284_v32  ;;  %vm2291_vm8 = vweird.f32 %v3081_v56 }
 0xb3d   :  { %vm2292_vm10 = vmor %vm2290_vm9, %vm2291_vm8  ;;  %v2317_v3 = vor.u32 1.1754944e-38, %v2316_v49  ;;  %vm2315_vm15 = vcmp.eq.f32.partialorder %v2314_v21, 8.507059e+37 }
 0xb3e   :  { %v2287_v5 = vsub.f32 1.0, %v2286_v38 }
 0xb40   :  { %v2288_v10 = vmul.f32 %v3081_v56, %v2287_v5 }
 0xb41   :  { %v3083_v47 = vpop.eup %3082 }
 0xb42   :  { %v2306_v19 = vmul.f32 %v3083_v47, %v2304_v30  ;;  %v2289_v16 = vadd.f32 %v3081_v56, %v2288_v10  ;;  %vm2311_vm12 = vweird.f32 %v3083_v47 }
 0xb43   :  { %vm2312_vm14 = vmor %vm2310_vm13, %vm2311_vm12 }
 0xb44   :  { %v2307_v25 = vsub.f32 1.0, %v2306_v19  ;;  %v2293_v55 = vsel %vm2292_vm10, %v3081_v56, %v2289_v16 }
 0xb45   :  { %v2298_v31 = vsel %vm2295_vm11, %v2297_v28, %v2293_v55 }
 0xb46   :  { %v2308_v26 = vmul.f32 %v3083_v47, %v2307_v25  ;;  %v2320_v48 = vmul.f32 %v2298_v31, %v2277_v8 }
 0xb48   :  { %v2309_v36 = vadd.f32 %v3083_v47, %v2308_v26  ;;  %v2321_v58 = vadd.f32 %v2320_v48, %v1462_v33 }
 0xb4a   :  { %v2313_v22 = vsel %vm2312_vm14, %v3083_v47, %v2309_v36  ;;  %3084 = vtanh.f32 %v2321_v58 }
 0xb4b   :  { %v2318_v23 = vsel %vm2315_vm15, %v2317_v3, %v2313_v22 }
 0xb4c   :  { %v2323_v24 = vsub.f32 1.0, %v2318_v23  ;;  %v2325_v59 = vmul.f32 %v2318_v23, %v4597_v50 }
 0xb50   :  { %v3085_v57 = vpop.eup %3084 }
 0xb51   :  { %v2324_v35 = vmul.f32 %v3085_v57, %v2323_v24 }
 0xb53   :  { %v2326_v53 = vadd.f32 %v2325_v59, %v2324_v35 }
 0xb55   :  { %2363 = vmatmul.f32.vlgmr.msrb.gmra.mxu0 %v2326_v53 }
 0xbd2   :  { %v2364_v39 = vpop.f32.mrf.mxu0 }
 0xbd3   :  { %v2365_v44 = vadd.f32 %v2925_v62, %v2364_v39 }
 0xbd5   :  { %v2823_v0 = vmul.f32 -1.442695, %v2365_v44 }
 0xbd7   :  { %3086 = vpow2.f32 %v2823_v0 }
 0xbdd   :  { %v3087_v52 = vpop.eup %3086 }
 0xbde   :  { %v2370_v9 = vadd.f32 1.0, %v3087_v52 }
 0xbe0   :  { %3088 = vrcp.f32 %v2370_v9  ;;  %v2382_v1 = vand.u32 2147483648, %v2370_v9  ;;  %v2380_v50 = vand.u32 2147483647, %v2370_v9  ;;  %vm2376_vm1 = vweird.f32 %v2370_v9 }
 0xbe2   :  { %v2383_v60 = vor.u32 1.1754944e-38, %v2382_v1  ;;  %vm2381_vm3 = vcmp.eq.f32.partialorder %v2380_v50, 8.507059e+37 }
 0xbe6   :  { %v3089_v61 = vpop.eup %3088 }
 0xbe7   :  { %v2372_v15 = vmul.f32 %v3089_v61, %v2370_v9  ;;  %vm2377_vm0 = vweird.f32 %v3089_v61 }
 0xbe8   :  { %vm2378_vm2 = vmor %vm2376_vm1, %vm2377_vm0 }
 0xbe9   :  { %v2373_v34 = vsub.f32 1.0, %v2372_v15 }
 0xbeb   :  { %v2374_v51 = vmul.f32 %v3089_v61, %v2373_v34 }
 0xbed   :  { %v2375_v42 = vadd.f32 %v3089_v61, %v2374_v51 }
 0xbef   :  { %v2379_v43 = vsel %vm2378_vm2, %v3089_v61, %v2375_v42 }
 0xbf0   :  { %v2384_v45 = vsel %vm2381_vm3, %v2383_v60, %v2379_v43 }
 0xbf1   :  { %2386 = vst [vmem:[%s4676_s11] sm:$0xff] %v2384_v45 }

</bundles_post_ra>
